<compile_context>
chip_gen: v7x
topology: tpu7x:2x2x1
jax: 0.10.0
libtpu: 0.0.40
codegen_flags: <defaults>
</compile_context>

<pallas_src>
import functools

import jax
import jax.numpy as jnp
import numpy as np
from jax.experimental import pallas as pl
from jax.experimental.pallas import tpu as pltpu

LN_EPS = 1e-5
NUM_HEADS = 16
MLP_RATIO = 4


# ----------------------------------------------------------------------------
# Fused Pallas kernel: all transformer blocks, token state resident in VMEM.
# Grid = (batch_blocks, depth); layer axis is "arbitrary", batch axis parallel.
# ----------------------------------------------------------------------------
def _gate_kernel(x_ref, mask_ref, sel_ref,
                 ln1_w, ln1_b, qkv_w, qkv_b, proj_w, proj_b,
                 ln2_w, ln2_b, fc1_w, fc1_b, fc2_w, fc2_b,
                 o_ref, state, *, num_heads, tokens_per_batch):
    l = pl.program_id(1)                       # layer index ("arbitrary" axis)

    @pl.when(l == 0)
    def _():                                   # load tokens once per batch group
        state[...] = x_ref[...].astype(jnp.float32)

    f32, bf16 = jnp.float32, jnp.bfloat16
    x = state[...]                             # (M, D) f32 residual stream
    M, D = x.shape
    N = tokens_per_batch
    G = M // N                                 # batch elements in this block
    H = num_heads

    hm = mask_ref[...]                         # (H*N, D) bf16 block-diag head mask
    sel = sel_ref[...]                         # (N, H*N) bf16 head-sum selector

    def layer_norm(z, w_ref, b_ref):
        mu = jnp.mean(z, axis=-1, keepdims=True)
        var = jnp.mean((z - mu) ** 2, axis=-1, keepdims=True)
        return (z - mu) * jax.lax.rsqrt(var + LN_EPS) * w_ref[0] + b_ref[0]

    # ---- Attention branch ---------------------------------------------------
    xn = layer_norm(x, ln1_w, ln1_b).astype(bf16)                       # (M, D)
    # Single lane-dense qkv matmul; 1/sqrt(Dh) already folded into q weights.
    qkv = jnp.dot(xn, qkv_w[0], preferred_element_type=f32) + qkv_b[0]  # (M, 3D)
    q = qkv[:, :D]                             # 128-aligned lane splits, f32
    k = qkv[:, D:2 * D]
    v = qkv[:, 2 * D:]

    outs = []
    for g in range(G):                         # static, tiny (1 or 2)
        rows = slice(g * N, (g + 1) * N)
        qg = q[rows, :].astype(bf16)           # (N, D)
        kgT = k[rows, :].T.astype(bf16)        # (D, N)  (2-D f32 transpose)
        vg = v[rows, :].astype(bf16)           # (N, D)

        # Stack queries per head along sublanes; the block-diagonal mask keeps
        # only each head's 8 feature lanes -> per-head scores from ONE
        # full-contraction-depth matmul (no per-head MXU passes).
        qs = jnp.concatenate([qg] * H, axis=0) * hm                     # (H*N, D)
        s = jnp.dot(qs, kgT, preferred_element_type=f32)                # (H*N, N)
        s = s - jnp.max(s, axis=-1, keepdims=True)                      # per-(h,n) max
        p = jnp.exp(s)
        p = p * pl.reciprocal(jnp.sum(p, axis=-1, keepdims=True), approx=True)

        o = jnp.dot(p.astype(bf16), vg, preferred_element_type=f32)     # (H*N, D)
        # Keep each head's own lanes, then fold the H stacked copies back to
        # (N, D) with a constant selector matmul (replaces the VPU tree-sum).
        o = jnp.dot(sel, o.astype(bf16) * hm, preferred_element_type=f32)  # (N, D)
        outs.append(o)
    o_all = outs[0] if G == 1 else jnp.concatenate(outs, axis=0)        # (M, D)

    # Single full-depth output projection (head re-assembly already done).
    attn = jnp.dot(o_all.astype(bf16), proj_w[0],
                   preferred_element_type=f32) + proj_b[0]              # (M, D)
    x1 = x + attn

    # ---- MLP branch ----------------------------------------------------------
    x1n = layer_norm(x1, ln2_w, ln2_b).astype(bf16)
    h1 = jnp.dot(x1n, fc1_w[0], preferred_element_type=f32) + fc1_b[0]
    # TODO(synk): PyTorch nn.GELU defaults to the exact erf form; tanh approx used here.
    h1 = jax.nn.gelu(h1, approximate=True)
    h2 = jnp.dot(h1.astype(bf16), fc2_w[0], preferred_element_type=f32) + fc2_b[0]
    x2 = x1 + h2

    state[...] = x2                            # carry to next layer

    @pl.when(l == pl.num_programs(1) - 1)
    def _():
        o_ref[...] = x2.astype(o_ref.dtype)


# ----------------------------------------------------------------------------
# Host-side weight packing: torch-layout per-layer params -> kernel layouts,
# stacked along a leading depth axis.  Matmul weights are pre-cast to bf16;
# LN params / biases stay f32.  The attention scale is folded into q cols.
# ----------------------------------------------------------------------------
def pack_params(block_params, num_heads=NUM_HEADS):
    D = block_params[0]["qkv_w"].shape[0]
    Dh = D // num_heads
    scale = float(Dh) ** -0.5
    bf16 = jnp.bfloat16

    def stack(key, dtype=None):
        a = jnp.stack([p[key] for p in block_params], axis=0)
        return a.astype(dtype) if dtype is not None else a

    def fold_scale(a):                         # scale the q third of last axis
        return jnp.concatenate([a[..., :D] * scale, a[..., D:]], axis=-1)

    return dict(
        ln1_w=stack("ln1_w"), ln1_b=stack("ln1_b"),
        qkv_w=fold_scale(stack("qkv_w")).astype(bf16),   # (depth, D, 3D) bf16
        qkv_b=fold_scale(stack("qkv_b")),                # (depth, 1, 3D) f32
        proj_w=stack("proj_w", bf16), proj_b=stack("proj_b"),
        ln2_w=stack("ln2_w"), ln2_b=stack("ln2_b"),
        fc1_w=stack("fc1_w", bf16), fc1_b=stack("fc1_b"),
        fc2_w=stack("fc2_w", bf16), fc2_b=stack("fc2_b"),
    )


def make_attn_constants(patch_num, dim, num_heads):
    """Constant 0/1 matrices for the stacked-head attention formulation."""
    N, D, H = patch_num, dim, num_heads
    Dh = D // H
    row_head = np.repeat(np.arange(H), N)[:, None]          # (H*N, 1)
    col_head = (np.arange(D) // Dh)[None, :]                 # (1, D)
    head_mask = (row_head == col_head).astype(np.float32)    # (H*N, D)
    tok = np.tile(np.arange(N), H)[None, :]                   # (1, H*N)
    sel = (np.arange(N)[:, None] == tok).astype(np.float32)  # (N, H*N)
    return jnp.asarray(head_mask, jnp.bfloat16), jnp.asarray(sel, jnp.bfloat16)


def run_blocks_pallas(emb, block_params, num_heads=NUM_HEADS, batch_blocks=1):
    """emb: (B, N, D) f32 tokens -> (B, N, D) after `depth` transformer blocks.

    batch_blocks=1 folds the whole batch into one grid step (weights DMA'd once
    per layer).  On v7x set batch_blocks=2 so the leading "parallel" grid axis
    feeds both TensorCores.
    """
    B, N, D = emb.shape
    depth = len(block_params)
    H = num_heads
    Hd = D * MLP_RATIO
    assert B % batch_blocks == 0
    M = (B // batch_blocks) * N                # rows per grid block

    pp = pack_params(block_params, num_heads)
    head_mask, sel = make_attn_constants(N, D, num_heads)
    x_flat = emb.reshape(B * N, D)             # host-side flatten (free)

    def wspec(shape):                          # layer-indexed weight BlockSpec
        zeros = (0,) * len(shape)
        return pl.BlockSpec((1,) + tuple(shape), lambda nb, l: (l,) + zeros)

    kernel = functools.partial(_gate_kernel, num_heads=num_heads,
                               tokens_per_batch=N)
    out = pl.pallas_call(
        kernel,
        out_shape=jax.ShapeDtypeStruct((B * N, D), emb.dtype),
        grid=(batch_blocks, depth),
        in_specs=[
            pl.BlockSpec((M, D), lambda nb, l: (nb, 0)),          # tokens
            pl.BlockSpec((H * N, D), lambda nb, l: (0, 0)),        # head mask
            pl.BlockSpec((N, H * N), lambda nb, l: (0, 0)),        # selector
            wspec((1, D)), wspec((1, D)),                          # ln1
            wspec((D, 3 * D)), wspec((1, 3 * D)),                  # qkv
            wspec((D, D)), wspec((1, D)),                          # proj
            wspec((1, D)), wspec((1, D)),                          # ln2
            wspec((D, Hd)), wspec((1, Hd)),                        # fc1
            wspec((Hd, D)), wspec((1, D)),                         # fc2
        ],
        out_specs=pl.BlockSpec((M, D), lambda nb, l: (nb, 0)),
        scratch_shapes=[pltpu.VMEM((M, D), jnp.float32)],          # resident tokens
        compiler_params=pltpu.CompilerParams(
            dimension_semantics=("parallel", "arbitrary")),
        # NOTE: at dim>=512 also pass vmem_limit_bytes and/or K-tile fc1/fc2
        # (v7x has 64 MiB VMEM, 32 MiB default scoped limit).
    )(x_flat, head_mask, sel,
      pp["ln1_w"], pp["ln1_b"], pp["qkv_w"], pp["qkv_b"],
      pp["proj_w"], pp["proj_b"], pp["ln2_w"], pp["ln2_b"],
      pp["fc1_w"], pp["fc1_b"], pp["fc2_w"], pp["fc2_b"])
    return out.reshape(B, N, D)


# ----------------------------------------------------------------------------
# Pure-JAX reference blocks (f32) for the numerical check.
# ----------------------------------------------------------------------------
def run_block_ref(x, p, num_heads=NUM_HEADS):
    B, N, D = x.shape
    Dh = D // num_heads

    def ln(z, w, b):
        mu = z.mean(-1, keepdims=True)
        var = ((z - mu) ** 2).mean(-1, keepdims=True)
        return (z - mu) / jnp.sqrt(var + LN_EPS) * w[0] + b[0]

    xn = ln(x, p["ln1_w"], p["ln1_b"])
    qkv = xn @ p["qkv_w"] + p["qkv_b"][0]
    q, k, v = jnp.split(qkv, 3, axis=-1)
    q = q.reshape(B, N, num_heads, Dh).transpose(0, 2, 1, 3) * (Dh ** -0.5)
    k = k.reshape(B, N, num_heads, Dh).transpose(0, 2, 1, 3)
    v = v.reshape(B, N, num_heads, Dh).transpose(0, 2, 1, 3)
    a = jax.nn.softmax(q @ jnp.swapaxes(k, -1, -2), axis=-1)
    o = (a @ v).transpose(0, 2, 1, 3).reshape(B, N, D)
    x1 = x + o @ p["proj_w"] + p["proj_b"][0]
    h = jax.nn.gelu(ln(x1, p["ln2_w"], p["ln2_b"]) @ p["fc1_w"] + p["fc1_b"][0],
                    approximate=True)
    return x1 + h @ p["fc2_w"] + p["fc2_b"][0]


def run_blocks_ref(emb, block_params, num_heads=NUM_HEADS):
    for p in block_params:
        emb = run_block_ref(emb, p, num_heads)
    return emb


# ----------------------------------------------------------------------------
# TransformerGate forward (patchify / unpatchify glue + blocks + concat).
# ----------------------------------------------------------------------------
def transformer_gate(x, emb_pos, block_params, in_channels, skip_channels, ps,
                     block_impl=run_blocks_pallas):
    xin = x[:, :in_channels]
    skip = x[:, in_channels:]
    b, c, h, w = skip.shape

    # skip.view(b, c, ps, h//ps, ps, w//ps).permute(0,1,2,4,3,5).view(b, c*ps*ps, -1)
    s = skip.reshape(b, c, ps, h // ps, ps, w // ps)
    s = jnp.transpose(s, (0, 1, 2, 4, 3, 5))
    s = s.reshape(b, c * ps * ps, (h // ps) * (w // ps))
    emb = jnp.transpose(s, (0, 2, 1)) + emb_pos          # (b, patch_num, dim)

    emb = block_impl(emb, block_params)

    e = jnp.transpose(emb, (0, 2, 1))
    e = e.reshape(b, c, ps, ps, h // ps, w // ps)
    e = jnp.transpose(e, (0, 1, 2, 4, 3, 5))
    e = e.reshape(b, c, h, w)
    return jnp.concatenate([xin, e], axis=1)


# ----------------------------------------------------------------------------
# Deterministic parameter init (shapes from the module's __init__).
# ----------------------------------------------------------------------------
def init_block_params(key, dim, mlp_ratio=MLP_RATIO):
    ks = jax.random.split(key, 4)
    hidden = dim * mlp_ratio
    s = 0.02
    f32 = jnp.float32
    return dict(
        ln1_w=jnp.ones((1, dim), f32),
        ln1_b=jnp.zeros((1, dim), f32),
        qkv_w=(jax.random.normal(ks[0], (dim, 3 * dim)) * s).astype(f32),
        qkv_b=jnp.zeros((1, 3 * dim), f32),
        proj_w=(jax.random.normal(ks[1], (dim, dim)) * s).astype(f32),
        proj_b=jnp.zeros((1, dim), f32),
        ln2_w=jnp.ones((1, dim), f32),
        ln2_b=jnp.zeros((1, dim), f32),
        fc1_w=(jax.random.normal(ks[2], (dim, hidden)) * s).astype(f32),
        fc1_b=jnp.zeros((1, hidden), f32),
        fc2_w=(jax.random.normal(ks[3], (hidden, dim)) * s).astype(f32),
        fc2_b=jnp.zeros((1, dim), f32),
    )


if __name__ == "__main__":
    # Small shapes consistent with the module:
    #   in_channels=4, skip_channels=8, patch_size=4, H=W=16
    #   -> dim = 8*4*4 = 128, patch_num = (16/4)^2 = 16, depth = 2
    in_channels, skip_channels, ps = 4, 8, 4
    B, Hs, Ws = 2, 16, 16
    depth = 2
    dim = skip_channels * ps * ps
    patch_num = (Hs // ps) * (Ws // ps)

    key = jax.random.PRNGKey(0)
    kx, kp = jax.random.split(key)
    x = jax.random.normal(kx, (B, in_channels + skip_channels, Hs, Ws), jnp.float32)
    emb_pos = jnp.zeros((1, patch_num, dim), jnp.float32)  # nn.Parameter(torch.zeros(...))
    params = [init_block_params(k, dim) for k in jax.random.split(kp, depth)]

    out = transformer_gate(x, emb_pos, params, in_channels, skip_channels, ps,
                           block_impl=run_blocks_pallas)
    out = jax.block_until_ready(out)
    assert out.shape == (B, in_channels + skip_channels, Hs, Ws)

    ref = transformer_gate(x, emb_pos, params, in_channels, skip_channels, ps,
                           block_impl=run_blocks_ref)
    # bf16 MXU operands vs. f32 reference -> slightly looser tolerance.
    np.testing.assert_allclose(np.asarray(out), np.asarray(ref), atol=2e-2, rtol=2e-2)

    print("KERNEL_OK")
</pallas_src>

<mosaic_0001>
module attributes {stable_mosaic.version = 11 : i64} {
  func.func @_gate_kernel(%arg0: i32, %arg1: i32, %arg2: memref<32x128xf32, #tpu.memory_space<vmem>>, %arg3: memref<256x128xbf16, #tpu.memory_space<vmem>>, %arg4: memref<16x256xbf16, #tpu.memory_space<vmem>>, %arg5: memref<1x1x128xf32, #tpu.memory_space<vmem>>, %arg6: memref<1x1x128xf32, #tpu.memory_space<vmem>>, %arg7: memref<1x128x384xbf16, #tpu.memory_space<vmem>>, %arg8: memref<1x1x384xf32, #tpu.memory_space<vmem>>, %arg9: memref<1x128x128xbf16, #tpu.memory_space<vmem>>, %arg10: memref<1x1x128xf32, #tpu.memory_space<vmem>>, %arg11: memref<1x1x128xf32, #tpu.memory_space<vmem>>, %arg12: memref<1x1x128xf32, #tpu.memory_space<vmem>>, %arg13: memref<1x128x512xbf16, #tpu.memory_space<vmem>>, %arg14: memref<1x1x512xf32, #tpu.memory_space<vmem>>, %arg15: memref<1x512x128xbf16, #tpu.memory_space<vmem>>, %arg16: memref<1x1x128xf32, #tpu.memory_space<vmem>>, %arg17: memref<32x128xf32, #tpu.memory_space<vmem>>, %arg18: memref<32x128xf32, #tpu.memory_space<vmem>>) attributes {dimension_semantics = [#tpu.dimension_semantics<parallel>, #tpu.dimension_semantics<arbitrary>], iteration_bounds = array<i64: 1, 2>, scalar_prefetch = 0 : i64, scratch_operands = 1 : i64, tpu.core_type = #tpu.core_type<tc>, window_params = [{transform_indices = @transform_0, window_bounds = array<i64: 32, 128>}, {pipeline_mode = #tpu.pipeline_mode<synchronous>, transform_indices = @transform_1, window_bounds = array<i64: 256, 128>}, {pipeline_mode = #tpu.pipeline_mode<synchronous>, transform_indices = @transform_2, window_bounds = array<i64: 16, 256>}, {transform_indices = @transform_3, window_bounds = array<i64: 1, 1, 128>}, {transform_indices = @transform_4, window_bounds = array<i64: 1, 1, 128>}, {transform_indices = @transform_5, window_bounds = array<i64: 1, 128, 384>}, {transform_indices = @transform_6, window_bounds = array<i64: 1, 1, 384>}, {transform_indices = @transform_7, window_bounds = array<i64: 1, 128, 128>}, {transform_indices = @transform_8, window_bounds = array<i64: 1, 1, 128>}, {transform_indices = @transform_9, window_bounds = array<i64: 1, 1, 128>}, {transform_indices = @transform_10, window_bounds = array<i64: 1, 1, 128>}, {transform_indices = @transform_11, window_bounds = array<i64: 1, 128, 512>}, {transform_indices = @transform_12, window_bounds = array<i64: 1, 1, 512>}, {transform_indices = @transform_13, window_bounds = array<i64: 1, 512, 128>}, {transform_indices = @transform_14, window_bounds = array<i64: 1, 1, 128>}, {transform_indices = @transform_15, window_bounds = array<i64: 32, 128>}]} {
    %c0_i32 = arith.constant 0 : i32
    %0 = arith.cmpi eq, %arg1, %c0_i32 : i32
    %1 = arith.extui %0 : i1 to i32
    %c0_i32_0 = arith.constant 0 : i32
    %2 = arith.cmpi ne, %1, %c0_i32_0 : i32
    scf.if %2 {
      %c0_72 = arith.constant 0 : index
      %c0_73 = arith.constant 0 : index
      %163 = vector.load %arg2[%c0_72, %c0_73] : memref<32x128xf32, #tpu.memory_space<vmem>>, vector<32x128xf32>
      %c0_74 = arith.constant 0 : index
      %c0_75 = arith.constant 0 : index
      %164 = vector.load %arg18[%c0_74, %c0_75] : memref<32x128xf32, #tpu.memory_space<vmem>>, vector<32x128xf32>
      tpu.vector_store %arg18[%c0_74, %c0_75], %163 {strides = array<i32>} : memref<32x128xf32, #tpu.memory_space<vmem>>, vector<32x128xf32>,
    } else {
    }
    %c0 = arith.constant 0 : index
    %c0_1 = arith.constant 0 : index
    %3 = vector.load %arg18[%c0, %c0_1] : memref<32x128xf32, #tpu.memory_space<vmem>>, vector<32x128xf32>
    %c0_2 = arith.constant 0 : index
    %c0_3 = arith.constant 0 : index
    %4 = vector.load %arg3[%c0_2, %c0_3] : memref<256x128xbf16, #tpu.memory_space<vmem>>, vector<256x128xbf16>
    %c0_4 = arith.constant 0 : index
    %c0_5 = arith.constant 0 : index
    %5 = vector.load %arg4[%c0_4, %c0_5] : memref<16x256xbf16, #tpu.memory_space<vmem>>, vector<16x256xbf16>
    %cst = arith.constant dense<0.000000e+00> : vector<32xf32>
    %6 = vector.multi_reduction <add>, %3, %cst [1] : vector<32x128xf32> to vector<32xf32>
    %7 = vector.shape_cast %6 : vector<32xf32> to vector<32x1xf32>
    %cst_6 = arith.constant 1.280000e+02 : f32
    %8 = vector.broadcast %cst_6 : f32 to vector<32x1xf32>
    %9 = arith.divf %7, %8 : vector<32x1xf32>
    %10 = vector.broadcast %9 : vector<32x1xf32> to vector<32x128xf32>
    %11 = arith.subf %3, %10 : vector<32x128xf32>
    %12 = arith.mulf %11, %11 : vector<32x128xf32>
    %cst_7 = arith.constant dense<0.000000e+00> : vector<32xf32>
    %13 = vector.multi_reduction <add>, %12, %cst_7 [1] : vector<32x128xf32> to vector<32xf32>
    %14 = vector.shape_cast %13 : vector<32xf32> to vector<32x1xf32>
    %cst_8 = arith.constant 1.280000e+02 : f32
    %15 = vector.broadcast %cst_8 : f32 to vector<32x1xf32>
    %16 = arith.divf %14, %15 : vector<32x1xf32>
    %17 = vector.broadcast %9 : vector<32x1xf32> to vector<32x128xf32>
    %18 = arith.subf %3, %17 : vector<32x128xf32>
    %cst_9 = arith.constant 9.99999974E-6 : f32
    %19 = vector.broadcast %cst_9 : f32 to vector<32x1xf32>
    %20 = arith.addf %16, %19 : vector<32x1xf32>
    %21 = math.rsqrt %20 : vector<32x1xf32>
    %22 = vector.broadcast %21 : vector<32x1xf32> to vector<32x128xf32>
    %23 = arith.mulf %18, %22 : vector<32x128xf32>
    %c0_10 = arith.constant 0 : index
    %c0_11 = arith.constant 0 : index
    %c0_12 = arith.constant 0 : index
    %24 = vector.load %arg5[%c0_10, %c0_11, %c0_12] : memref<1x1x128xf32, #tpu.memory_space<vmem>>, vector<1x1x128xf32>
    %25 = vector.shape_cast %24 : vector<1x1x128xf32> to vector<1x128xf32>
    %26 = vector.broadcast %25 : vector<1x128xf32> to vector<32x128xf32>
    %27 = arith.mulf %23, %26 : vector<32x128xf32>
    %c0_13 = arith.constant 0 : index
    %c0_14 = arith.constant 0 : index
    %c0_15 = arith.constant 0 : index
    %28 = vector.load %arg6[%c0_13, %c0_14, %c0_15] : memref<1x1x128xf32, #tpu.memory_space<vmem>>, vector<1x1x128xf32>
    %29 = vector.shape_cast %28 : vector<1x1x128xf32> to vector<1x128xf32>
    %30 = vector.broadcast %29 : vector<1x128xf32> to vector<32x128xf32>
    %31 = arith.addf %27, %30 : vector<32x128xf32>
    %32 = arith.truncf %31 : vector<32x128xf32> to vector<32x128xbf16>
    %c0_16 = arith.constant 0 : index
    %c0_17 = arith.constant 0 : index
    %c0_18 = arith.constant 0 : index
    %33 = vector.load %arg7[%c0_16, %c0_17, %c0_18] : memref<1x128x384xbf16, #tpu.memory_space<vmem>>, vector<1x128x384xbf16>
    %34 = vector.shape_cast %33 : vector<1x128x384xbf16> to vector<128x384xbf16>
    %cst_19 = arith.constant dense<0.000000e+00> : vector<32x384xf32>
    %35 = tpu.matmul %32, %34, %cst_19 {dimension_numbers = #tpu.dot_dimension_numbers<[1], [0], [0], [1], [0, 0, 1, 1], [], []>} : vector<32x128xbf16>, vector<128x384xbf16>, vector<32x384xf32> -> vector<32x384xf32>
    %c0_20 = arith.constant 0 : index
    %c0_21 = arith.constant 0 : index
    %c0_22 = arith.constant 0 : index
    %36 = vector.load %arg8[%c0_20, %c0_21, %c0_22] : memref<1x1x384xf32, #tpu.memory_space<vmem>>, vector<1x1x384xf32>
    %37 = vector.shape_cast %36 : vector<1x1x384xf32> to vector<1x384xf32>
    %38 = vector.broadcast %37 : vector<1x384xf32> to vector<32x384xf32>
    %39 = arith.addf %35, %38 : vector<32x384xf32>
    %40 = vector.extract_strided_slice %39 {offsets = [0, 0], sizes = [32, 128], strides = [1, 1]} : vector<32x384xf32> to vector<32x128xf32>
    %41 = vector.extract_strided_slice %39 {offsets = [0, 128], sizes = [32, 128], strides = [1, 1]} : vector<32x384xf32> to vector<32x128xf32>
    %42 = vector.extract_strided_slice %39 {offsets = [0, 256], sizes = [32, 128], strides = [1, 1]} : vector<32x384xf32> to vector<32x128xf32>
    %43 = vector.extract_strided_slice %40 {offsets = [0, 0], sizes = [16, 128], strides = [1, 1]} : vector<32x128xf32> to vector<16x128xf32>
    %44 = arith.truncf %43 : vector<16x128xf32> to vector<16x128xbf16>
    %45 = vector.extract_strided_slice %41 {offsets = [0, 0], sizes = [16, 128], strides = [1, 1]} : vector<32x128xf32> to vector<16x128xf32>
    %46 = tpu.transpose %45, [1, 0] : vector<16x128xf32> -> vector<128x16xf32>
    %47 = arith.truncf %46 : vector<128x16xf32> to vector<128x16xbf16>
    %48 = vector.extract_strided_slice %42 {offsets = [0, 0], sizes = [16, 128], strides = [1, 1]} : vector<32x128xf32> to vector<16x128xf32>
    %49 = arith.truncf %48 : vector<16x128xf32> to vector<16x128xbf16>
    %50 = tpu.concatenate %44, %44, %44, %44, %44, %44, %44, %44, %44, %44, %44, %44, %44, %44, %44, %44 in 0 : vector<16x128xbf16>, vector<16x128xbf16>, vector<16x128xbf16>, vector<16x128xbf16>, vector<16x128xbf16>, vector<16x128xbf16>, vector<16x128xbf16>, vector<16x128xbf16>, vector<16x128xbf16>, vector<16x128xbf16>, vector<16x128xbf16>, vector<16x128xbf16>, vector<16x128xbf16>, vector<16x128xbf16>, vector<16x128xbf16>, vector<16x128xbf16> -> vector<256x128xbf16>
    %51 = arith.mulf %50, %4 : vector<256x128xbf16>
    %cst_23 = arith.constant dense<0.000000e+00> : vector<256x16xf32>
    %52 = tpu.matmul %51, %47, %cst_23 {dimension_numbers = #tpu.dot_dimension_numbers<[1], [0], [0], [1], [0, 0, 1, 1], [], []>} : vector<256x128xbf16>, vector<128x16xbf16>, vector<256x16xf32> -> vector<256x16xf32>
    %cst_24 = arith.constant dense<0xFF800000> : vector<256xf32>
    %53 = vector.multi_reduction <maximumf>, %52, %cst_24 [1] : vector<256x16xf32> to vector<256xf32>
    %54 = vector.shape_cast %53 : vector<256xf32> to vector<256x1xf32>
    %55 = vector.broadcast %54 : vector<256x1xf32> to vector<256x16xf32>
    %56 = arith.subf %52, %55 : vector<256x16xf32>
    %57 = math.exp %56 : vector<256x16xf32>
    %cst_25 = arith.constant dense<0.000000e+00> : vector<256xf32>
    %58 = vector.multi_reduction <add>, %57, %cst_25 [1] : vector<256x16xf32> to vector<256xf32>
    %59 = vector.shape_cast %58 : vector<256xf32> to vector<256x1xf32>
    %60 = tpu.reciprocal %59 {approx = true} : vector<256x1xf32> -> vector<256x1xf32>
    %61 = vector.broadcast %60 : vector<256x1xf32> to vector<256x16xf32>
    %62 = arith.mulf %57, %61 : vector<256x16xf32>
    %63 = arith.truncf %62 : vector<256x16xf32> to vector<256x16xbf16>
    %cst_26 = arith.constant dense<0.000000e+00> : vector<256x128xf32>
    %64 = tpu.matmul %63, %49, %cst_26 {dimension_numbers = #tpu.dot_dimension_numbers<[1], [0], [0], [1], [0, 0, 1, 1], [], []>} : vector<256x16xbf16>, vector<16x128xbf16>, vector<256x128xf32> -> vector<256x128xf32>
    %65 = arith.truncf %64 : vector<256x128xf32> to vector<256x128xbf16>
    %66 = arith.mulf %65, %4 : vector<256x128xbf16>
    %cst_27 = arith.constant dense<0.000000e+00> : vector<16x128xf32>
    %67 = tpu.matmul %5, %66, %cst_27 {dimension_numbers = #tpu.dot_dimension_numbers<[1], [0], [0], [1], [0, 0, 1, 1], [], []>} : vector<16x256xbf16>, vector<256x128xbf16>, vector<16x128xf32> -> vector<16x128xf32>
    %68 = vector.extract_strided_slice %40 {offsets = [16, 0], sizes = [16, 128], strides = [1, 1]} : vector<32x128xf32> to vector<16x128xf32>
    %69 = arith.truncf %68 : vector<16x128xf32> to vector<16x128xbf16>
    %70 = vector.extract_strided_slice %41 {offsets = [16, 0], sizes = [16, 128], strides = [1, 1]} : vector<32x128xf32> to vector<16x128xf32>
    %71 = tpu.transpose %70, [1, 0] : vector<16x128xf32> -> vector<128x16xf32>
    %72 = arith.truncf %71 : vector<128x16xf32> to vector<128x16xbf16>
    %73 = vector.extract_strided_slice %42 {offsets = [16, 0], sizes = [16, 128], strides = [1, 1]} : vector<32x128xf32> to vector<16x128xf32>
    %74 = arith.truncf %73 : vector<16x128xf32> to vector<16x128xbf16>
    %75 = tpu.concatenate %69, %69, %69, %69, %69, %69, %69, %69, %69, %69, %69, %69, %69, %69, %69, %69 in 0 : vector<16x128xbf16>, vector<16x128xbf16>, vector<16x128xbf16>, vector<16x128xbf16>, vector<16x128xbf16>, vector<16x128xbf16>, vector<16x128xbf16>, vector<16x128xbf16>, vector<16x128xbf16>, vector<16x128xbf16>, vector<16x128xbf16>, vector<16x128xbf16>, vector<16x128xbf16>, vector<16x128xbf16>, vector<16x128xbf16>, vector<16x128xbf16> -> vector<256x128xbf16>
    %76 = arith.mulf %75, %4 : vector<256x128xbf16>
    %cst_28 = arith.constant dense<0.000000e+00> : vector<256x16xf32>
    %77 = tpu.matmul %76, %72, %cst_28 {dimension_numbers = #tpu.dot_dimension_numbers<[1], [0], [0], [1], [0, 0, 1, 1], [], []>} : vector<256x128xbf16>, vector<128x16xbf16>, vector<256x16xf32> -> vector<256x16xf32>
    %cst_29 = arith.constant dense<0xFF800000> : vector<256xf32>
    %78 = vector.multi_reduction <maximumf>, %77, %cst_29 [1] : vector<256x16xf32> to vector<256xf32>
    %79 = vector.shape_cast %78 : vector<256xf32> to vector<256x1xf32>
    %80 = vector.broadcast %79 : vector<256x1xf32> to vector<256x16xf32>
    %81 = arith.subf %77, %80 : vector<256x16xf32>
    %82 = math.exp %81 : vector<256x16xf32>
    %cst_30 = arith.constant dense<0.000000e+00> : vector<256xf32>
    %83 = vector.multi_reduction <add>, %82, %cst_30 [1] : vector<256x16xf32> to vector<256xf32>
    %84 = vector.shape_cast %83 : vector<256xf32> to vector<256x1xf32>
    %85 = tpu.reciprocal %84 {approx = true} : vector<256x1xf32> -> vector<256x1xf32>
    %86 = vector.broadcast %85 : vector<256x1xf32> to vector<256x16xf32>
    %87 = arith.mulf %82, %86 : vector<256x16xf32>
    %88 = arith.truncf %87 : vector<256x16xf32> to vector<256x16xbf16>
    %cst_31 = arith.constant dense<0.000000e+00> : vector<256x128xf32>
    %89 = tpu.matmul %88, %74, %cst_31 {dimension_numbers = #tpu.dot_dimension_numbers<[1], [0], [0], [1], [0, 0, 1, 1], [], []>} : vector<256x16xbf16>, vector<16x128xbf16>, vector<256x128xf32> -> vector<256x128xf32>
    %90 = arith.truncf %89 : vector<256x128xf32> to vector<256x128xbf16>
    %91 = arith.mulf %90, %4 : vector<256x128xbf16>
    %cst_32 = arith.constant dense<0.000000e+00> : vector<16x128xf32>
    %92 = tpu.matmul %5, %91, %cst_32 {dimension_numbers = #tpu.dot_dimension_numbers<[1], [0], [0], [1], [0, 0, 1, 1], [], []>} : vector<16x256xbf16>, vector<256x128xbf16>, vector<16x128xf32> -> vector<16x128xf32>
    %93 = tpu.concatenate %67, %92 in 0 : vector<16x128xf32>, vector<16x128xf32> -> vector<32x128xf32>
    %94 = arith.truncf %93 : vector<32x128xf32> to vector<32x128xbf16>
    %c0_33 = arith.constant 0 : index
    %c0_34 = arith.constant 0 : index
    %c0_35 = arith.constant 0 : index
    %95 = vector.load %arg9[%c0_33, %c0_34, %c0_35] : memref<1x128x128xbf16, #tpu.memory_space<vmem>>, vector<1x128x128xbf16>
    %96 = vector.shape_cast %95 : vector<1x128x128xbf16> to vector<128x128xbf16>
    %cst_36 = arith.constant dense<0.000000e+00> : vector<32x128xf32>
    %97 = tpu.matmul %94, %96, %cst_36 {dimension_numbers = #tpu.dot_dimension_numbers<[1], [0], [0], [1], [0, 0, 1, 1], [], []>} : vector<32x128xbf16>, vector<128x128xbf16>, vector<32x128xf32> -> vector<32x128xf32>
    %c0_37 = arith.constant 0 : index
    %c0_38 = arith.constant 0 : index
    %c0_39 = arith.constant 0 : index
    %98 = vector.load %arg10[%c0_37, %c0_38, %c0_39] : memref<1x1x128xf32, #tpu.memory_space<vmem>>, vector<1x1x128xf32>
    %99 = vector.shape_cast %98 : vector<1x1x128xf32> to vector<1x128xf32>
    %100 = vector.broadcast %99 : vector<1x128xf32> to vector<32x128xf32>
    %101 = arith.addf %97, %100 : vector<32x128xf32>
    %102 = arith.addf %3, %101 : vector<32x128xf32>
    %cst_40 = arith.constant dense<0.000000e+00> : vector<32xf32>
    %103 = vector.multi_reduction <add>, %102, %cst_40 [1] : vector<32x128xf32> to vector<32xf32>
    %104 = vector.shape_cast %103 : vector<32xf32> to vector<32x1xf32>
    %cst_41 = arith.constant 1.280000e+02 : f32
    %105 = vector.broadcast %cst_41 : f32 to vector<32x1xf32>
    %106 = arith.divf %104, %105 : vector<32x1xf32>
    %107 = vector.broadcast %106 : vector<32x1xf32> to vector<32x128xf32>
    %108 = arith.subf %102, %107 : vector<32x128xf32>
    %109 = arith.mulf %108, %108 : vector<32x128xf32>
    %cst_42 = arith.constant dense<0.000000e+00> : vector<32xf32>
    %110 = vector.multi_reduction <add>, %109, %cst_42 [1] : vector<32x128xf32> to vector<32xf32>
    %111 = vector.shape_cast %110 : vector<32xf32> to vector<32x1xf32>
    %cst_43 = arith.constant 1.280000e+02 : f32
    %112 = vector.broadcast %cst_43 : f32 to vector<32x1xf32>
    %113 = arith.divf %111, %112 : vector<32x1xf32>
    %114 = vector.broadcast %106 : vector<32x1xf32> to vector<32x128xf32>
    %115 = arith.subf %102, %114 : vector<32x128xf32>
    %cst_44 = arith.constant 9.99999974E-6 : f32
    %116 = vector.broadcast %cst_44 : f32 to vector<32x1xf32>
    %117 = arith.addf %113, %116 : vector<32x1xf32>
    %118 = math.rsqrt %117 : vector<32x1xf32>
    %119 = vector.broadcast %118 : vector<32x1xf32> to vector<32x128xf32>
    %120 = arith.mulf %115, %119 : vector<32x128xf32>
    %c0_45 = arith.constant 0 : index
    %c0_46 = arith.constant 0 : index
    %c0_47 = arith.constant 0 : index
    %121 = vector.load %arg11[%c0_45, %c0_46, %c0_47] : memref<1x1x128xf32, #tpu.memory_space<vmem>>, vector<1x1x128xf32>
    %122 = vector.shape_cast %121 : vector<1x1x128xf32> to vector<1x128xf32>
    %123 = vector.broadcast %122 : vector<1x128xf32> to vector<32x128xf32>
    %124 = arith.mulf %120, %123 : vector<32x128xf32>
    %c0_48 = arith.constant 0 : index
    %c0_49 = arith.constant 0 : index
    %c0_50 = arith.constant 0 : index
    %125 = vector.load %arg12[%c0_48, %c0_49, %c0_50] : memref<1x1x128xf32, #tpu.memory_space<vmem>>, vector<1x1x128xf32>
    %126 = vector.shape_cast %125 : vector<1x1x128xf32> to vector<1x128xf32>
    %127 = vector.broadcast %126 : vector<1x128xf32> to vector<32x128xf32>
    %128 = arith.addf %124, %127 : vector<32x128xf32>
    %129 = arith.truncf %128 : vector<32x128xf32> to vector<32x128xbf16>
    %c0_51 = arith.constant 0 : index
    %c0_52 = arith.constant 0 : index
    %c0_53 = arith.constant 0 : index
    %130 = vector.load %arg13[%c0_51, %c0_52, %c0_53] : memref<1x128x512xbf16, #tpu.memory_space<vmem>>, vector<1x128x512xbf16>
    %131 = vector.shape_cast %130 : vector<1x128x512xbf16> to vector<128x512xbf16>
    %cst_54 = arith.constant dense<0.000000e+00> : vector<32x512xf32>
    %132 = tpu.matmul %129, %131, %cst_54 {dimension_numbers = #tpu.dot_dimension_numbers<[1], [0], [0], [1], [0, 0, 1, 1], [], []>} : vector<32x128xbf16>, vector<128x512xbf16>, vector<32x512xf32> -> vector<32x512xf32>
    %c0_55 = arith.constant 0 : index
    %c0_56 = arith.constant 0 : index
    %c0_57 = arith.constant 0 : index
    %133 = vector.load %arg14[%c0_55, %c0_56, %c0_57] : memref<1x1x512xf32, #tpu.memory_space<vmem>>, vector<1x1x512xf32>
    %134 = vector.shape_cast %133 : vector<1x1x512xf32> to vector<1x512xf32>
    %135 = vector.broadcast %134 : vector<1x512xf32> to vector<32x512xf32>
    %136 = arith.addf %132, %135 : vector<32x512xf32>
    %137 = arith.mulf %136, %136 : vector<32x512xf32>
    %138 = arith.mulf %136, %137 : vector<32x512xf32>
    %cst_58 = arith.constant 4.471500e-02 : f32
    %139 = vector.broadcast %cst_58 : f32 to vector<32x512xf32>
    %140 = arith.mulf %139, %138 : vector<32x512xf32>
    %141 = arith.addf %136, %140 : vector<32x512xf32>
    %cst_59 = arith.constant 0.797884583 : f32
    %142 = vector.broadcast %cst_59 : f32 to vector<32x512xf32>
    %143 = arith.mulf %142, %141 : vector<32x512xf32>
    %144 = math.tanh %143 : vector<32x512xf32>
    %cst_60 = arith.constant 1.000000e+00 : f32
    %145 = vector.broadcast %cst_60 : f32 to vector<32x512xf32>
    %146 = arith.addf %145, %144 : vector<32x512xf32>
    %cst_61 = arith.constant 5.000000e-01 : f32
    %147 = vector.broadcast %cst_61 : f32 to vector<32x512xf32>
    %148 = arith.mulf %147, %146 : vector<32x512xf32>
    %149 = arith.mulf %136, %148 : vector<32x512xf32>
    %150 = arith.truncf %149 : vector<32x512xf32> to vector<32x512xbf16>
    %c0_62 = arith.constant 0 : index
    %c0_63 = arith.constant 0 : index
    %c0_64 = arith.constant 0 : index
    %151 = vector.load %arg15[%c0_62, %c0_63, %c0_64] : memref<1x512x128xbf16, #tpu.memory_space<vmem>>, vector<1x512x128xbf16>
    %152 = vector.shape_cast %151 : vector<1x512x128xbf16> to vector<512x128xbf16>
    %cst_65 = arith.constant dense<0.000000e+00> : vector<32x128xf32>
    %153 = tpu.matmul %150, %152, %cst_65 {dimension_numbers = #tpu.dot_dimension_numbers<[1], [0], [0], [1], [0, 0, 1, 1], [], []>} : vector<32x512xbf16>, vector<512x128xbf16>, vector<32x128xf32> -> vector<32x128xf32>
    %c0_66 = arith.constant 0 : index
    %c0_67 = arith.constant 0 : index
    %c0_68 = arith.constant 0 : index
    %154 = vector.load %arg16[%c0_66, %c0_67, %c0_68] : memref<1x1x128xf32, #tpu.memory_space<vmem>>, vector<1x1x128xf32>
    %155 = vector.shape_cast %154 : vector<1x1x128xf32> to vector<1x128xf32>
    %156 = vector.broadcast %155 : vector<1x128xf32> to vector<32x128xf32>
    %157 = arith.addf %153, %156 : vector<32x128xf32>
    %158 = arith.addf %102, %157 : vector<32x128xf32>
    %c0_69 = arith.constant 0 : index
    %c0_70 = arith.constant 0 : index
    %159 = vector.load %arg18[%c0_69, %c0_70] : memref<32x128xf32, #tpu.memory_space<vmem>>, vector<32x128xf32>
    tpu.vector_store %arg18[%c0_69, %c0_70], %158 {strides = array<i32>} : memref<32x128xf32, #tpu.memory_space<vmem>>, vector<32x128xf32>,
    %c1_i32 = arith.constant 1 : i32
    %160 = arith.cmpi eq, %arg1, %c1_i32 : i32
    %161 = arith.extui %160 : i1 to i32
    %c0_i32_71 = arith.constant 0 : i32
    %162 = arith.cmpi ne, %161, %c0_i32_71 : i32
    scf.if %162 {
      %c0_72 = arith.constant 0 : index
      %c0_73 = arith.constant 0 : index
      %163 = vector.load %arg17[%c0_72, %c0_73] : memref<32x128xf32, #tpu.memory_space<vmem>>, vector<32x128xf32>
      tpu.vector_store %arg17[%c0_72, %c0_73], %158 {strides = array<i32>} : memref<32x128xf32, #tpu.memory_space<vmem>>, vector<32x128xf32>,
    } else {
    }
    return
  }
  func.func @transform_0(%arg0: i32, %arg1: i32) -> (i32, i32) {
    %c0_i32 = arith.constant 0 : i32
    %c0_i32_0 = arith.constant 0 : i32
    return %arg0, %c0_i32 : i32, i32
  }
  func.func @transform_1(%arg0: i32, %arg1: i32) -> (i32, i32) {
    %c0_i32 = arith.constant 0 : i32
    %c0_i32_0 = arith.constant 0 : i32
    %c0_i32_1 = arith.constant 0 : i32
    return %c0_i32, %c0_i32_0 : i32, i32
  }
  func.func @transform_2(%arg0: i32, %arg1: i32) -> (i32, i32) {
    %c0_i32 = arith.constant 0 : i32
    %c0_i32_0 = arith.constant 0 : i32
    %c0_i32_1 = arith.constant 0 : i32
    return %c0_i32, %c0_i32_0 : i32, i32
  }
  func.func @transform_3(%arg0: i32, %arg1: i32) -> (i32, i32, i32) {
    %c0_i32 = arith.constant 0 : i32
    %c0_i32_0 = arith.constant 0 : i32
    %c0_i32_1 = arith.constant 0 : i32
    return %arg1, %c0_i32, %c0_i32_0 : i32, i32, i32
  }
  func.func @transform_4(%arg0: i32, %arg1: i32) -> (i32, i32, i32) {
    %c0_i32 = arith.constant 0 : i32
    %c0_i32_0 = arith.constant 0 : i32
    %c0_i32_1 = arith.constant 0 : i32
    return %arg1, %c0_i32, %c0_i32_0 : i32, i32, i32
  }
  func.func @transform_5(%arg0: i32, %arg1: i32) -> (i32, i32, i32) {
    %c0_i32 = arith.constant 0 : i32
    %c0_i32_0 = arith.constant 0 : i32
    %c0_i32_1 = arith.constant 0 : i32
    return %arg1, %c0_i32, %c0_i32_0 : i32, i32, i32
  }
  func.func @transform_6(%arg0: i32, %arg1: i32) -> (i32, i32, i32) {
    %c0_i32 = arith.constant 0 : i32
    %c0_i32_0 = arith.constant 0 : i32
    %c0_i32_1 = arith.constant 0 : i32
    return %arg1, %c0_i32, %c0_i32_0 : i32, i32, i32
  }
  func.func @transform_7(%arg0: i32, %arg1: i32) -> (i32, i32, i32) {
    %c0_i32 = arith.constant 0 : i32
    %c0_i32_0 = arith.constant 0 : i32
    %c0_i32_1 = arith.constant 0 : i32
    return %arg1, %c0_i32, %c0_i32_0 : i32, i32, i32
  }
  func.func @transform_8(%arg0: i32, %arg1: i32) -> (i32, i32, i32) {
    %c0_i32 = arith.constant 0 : i32
    %c0_i32_0 = arith.constant 0 : i32
    %c0_i32_1 = arith.constant 0 : i32
    return %arg1, %c0_i32, %c0_i32_0 : i32, i32, i32
  }
  func.func @transform_9(%arg0: i32, %arg1: i32) -> (i32, i32, i32) {
    %c0_i32 = arith.constant 0 : i32
    %c0_i32_0 = arith.constant 0 : i32
    %c0_i32_1 = arith.constant 0 : i32
    return %arg1, %c0_i32, %c0_i32_0 : i32, i32, i32
  }
  func.func @transform_10(%arg0: i32, %arg1: i32) -> (i32, i32, i32) {
    %c0_i32 = arith.constant 0 : i32
    %c0_i32_0 = arith.constant 0 : i32
    %c0_i32_1 = arith.constant 0 : i32
    return %arg1, %c0_i32, %c0_i32_0 : i32, i32, i32
  }
  func.func @transform_11(%arg0: i32, %arg1: i32) -> (i32, i32, i32) {
    %c0_i32 = arith.constant 0 : i32
    %c0_i32_0 = arith.constant 0 : i32
    %c0_i32_1 = arith.constant 0 : i32
    return %arg1, %c0_i32, %c0_i32_0 : i32, i32, i32
  }
  func.func @transform_12(%arg0: i32, %arg1: i32) -> (i32, i32, i32) {
    %c0_i32 = arith.constant 0 : i32
    %c0_i32_0 = arith.constant 0 : i32
    %c0_i32_1 = arith.constant 0 : i32
    return %arg1, %c0_i32, %c0_i32_0 : i32, i32, i32
  }
  func.func @transform_13(%arg0: i32, %arg1: i32) -> (i32, i32, i32) {
    %c0_i32 = arith.constant 0 : i32
    %c0_i32_0 = arith.constant 0 : i32
    %c0_i32_1 = arith.constant 0 : i32
    return %arg1, %c0_i32, %c0_i32_0 : i32, i32, i32
  }
  func.func @transform_14(%arg0: i32, %arg1: i32) -> (i32, i32, i32) {
    %c0_i32 = arith.constant 0 : i32
    %c0_i32_0 = arith.constant 0 : i32
    %c0_i32_1 = arith.constant 0 : i32
    return %arg1, %c0_i32, %c0_i32_0 : i32, i32, i32
  }
  func.func @transform_15(%arg0: i32, %arg1: i32) -> (i32, i32) {
    %c0_i32 = arith.constant 0 : i32
    %c0_i32_0 = arith.constant 0 : i32
    return %arg0, %c0_i32 : i32, i32
  }
}

</mosaic_0001>

<bundles_post_ra>
// kernel: tpu_custom_call.1
= control target key start
LH: loop header
LB: loop body
LE: loop exit
PB: predicated region body
PF: predicated region fallthrough
CT: control target
= control target key end

     0   :  { %s7764_s0 = inlined_call_operand.hbm [shape: f32[32,128], index: 0, kind: input, shape index: {}]   ;;  %s7765_s1 = inlined_call_operand.hbm [shape: bf16[256,128], index: 1, kind: input, shape index: {}]   ;;  %s7766_s2 = inlined_call_operand.hbm [shape: bf16[16,256], index: 2, kind: input, shape index: {}]   ;;  %s7767_s3 = inlined_call_operand.hbm [shape: f32[2,1,128], index: 3, kind: input, shape index: {}]   ;;  %s7768_s4 = inlined_call_operand.hbm [shape: f32[2,1,128], index: 4, kind: input, shape index: {}]   ;;  %s7769_s5 = inlined_call_operand.hbm [shape: bf16[2,128,384], index: 5, kind: input, shape index: {}]   ;;  %s7770_s6 = inlined_call_operand.vmem [shape: f32[2,1,384], index: 6, kind: input, shape index: {}]   ;;  %s7771_s7 = inlined_call_operand.hbm [shape: bf16[2,128,128], index: 7, kind: input, shape index: {}]   ;;  %s7772_s8 = inlined_call_operand.vmem [shape: f32[2,1,128], index: 8, kind: input, shape index: {}]   ;;  %s7773_s9 = inlined_call_operand.vmem [shape: f32[2,1,128], index: 9, kind: input, shape index: {}]   ;;  %s7774_s10 = inlined_call_operand.vmem [shape: f32[2,1,128], index: 10, kind: input, shape index: {}]   ;;  %s7775_s11 = inlined_call_operand.hbm [shape: bf16[2,128,512], index: 11, kind: input, shape index: {}]   ;;  %s7776_s12 = inlined_call_operand.vmem [shape: f32[2,1,512], index: 12, kind: input, shape index: {}]   ;;  %s7777_s13 = inlined_call_operand.hbm [shape: bf16[2,512,128], index: 13, kind: input, shape index: {}]   ;;  %s7778_s14 = inlined_call_operand.vmem [shape: f32[2,1,128], index: 14, kind: input, shape index: {}]   ;;  %s7779_s15 = inlined_call_operand.hbm [shape: f32[32,128], index: 15, kind: output, shape index: {}]  }
   0x1   :  { %7818 = sst [smem:[#allocation36_spill]] %s7764_s0 }
   0x2   :  { %7819 = sst [smem:[#allocation37_spill]] %s7765_s1 }
   0x3   :  { %7820 = sst [smem:[#allocation38_spill]] %s7766_s2 }
   0x4   :  { %7821 = sst [smem:[#allocation39_spill]] %s7767_s3 }
   0x5   :  { %7822 = sst [smem:[#allocation40_spill]] %s7768_s4 }
   0x6   :  { %7823 = sst [smem:[#allocation41_spill]] %s7769_s5 }
   0x7   :  { %7824 = sst [smem:[#allocation42_spill]] %s7770_s6 }
   0x8   :  { %7825 = sst [smem:[#allocation43_spill]] %s7771_s7 }
   0x9   :  { %7826 = sst [smem:[#allocation44_spill]] %s7772_s8 }
   0xa   :  { %7827 = sst [smem:[#allocation45_spill]] %s7773_s9 }
   0xb   :  { %7828 = sst [smem:[#allocation46_spill]] %s7774_s10 }
   0xc   :  { %7829 = sst [smem:[#allocation47_spill]] %s7775_s11 }
   0xd   :  { %7830 = sst [smem:[#allocation48_spill]] %s7776_s12 }
   0xe   :  { %7831 = sst [smem:[#allocation49_spill]] %s7778_s14 }
   0xf   :  { %7832 = sst [smem:[#allocation50_spill]] %s7779_s15 }
  0x10   :  { %20 = vsyncpa [#allocation4], 0 }
  0x11   :  { %21 = vsyncpa [#allocation7], 0 }
  0x12   :  { %22 = vsyncpa [#allocation10], 0 }
  0x13   :  { %24 = vsyncpa [#allocation10 + $0x1], 0 }
  0x14   :  { %25 = vsyncpa [#allocation13], 0 }
  0x15   :  { %27 = vsyncpa [#allocation13 + $0x1], 0 }
  0x16   :  { %28 = vsyncpa [#allocation16], 0 }
  0x17   :  { %30 = vsyncpa [#allocation16 + $0x1], 0 }
  0x18   :  { %31 = vsyncpa [#allocation5], 0  ;;  %s6047_s18 = smov 0   ;;  %s6049_s19 = smov 0  }
  0x19   :  { %s6051_s20 = smov 0   ;;  %s6053_s21 = smov 0  }
  0x1a   :  { %s6055_s22 = smov 0   ;;  %s6057_s23 = smov 0  }
  0x1b LB: > { %7833 = sst [smem:[#allocation25_spill]] %s5928_s19  ;;  %s6076_s24 = sadd.s32 4294967295, %s5944_s23   ;;  %s5944_s23 = sphi %s6057_s23, %s37_s23   ;;  %s5940_s22 = sphi %s6055_s22, %s7910_s22   ;;  %s5936_s21 = sphi %s6053_s21, %s7909_s21   ;;  %s5932_s20 = sphi %s6051_s20, %s7907_s20   ;;  %s5928_s19 = sphi %s6049_s19, %s7906_s19   ;;  %s5924_s18 = sphi %s6047_s18, %s7905_s18  }
  0x1c   : > { %7834 = sst [smem:[#allocation26_spill]] %s5932_s20  ;;  %p137_p0 = scmp.ne.s32.totalorder %s5928_s19, %s5924_s18 }
  0x1d   : > { %7835 = sst [smem:[#allocation27_spill]] %s5936_s21  ;;  %p7781_p1 = scmp.eq.s32.totalorder %s6076_s24, 0 }
  0x1e   : > { %7836 = sst [smem:[#allocation28_spill]] %s5944_s23  ;;  %p4395_p2 = scmp.ge.s32.totalorder %s5944_s23, 1 }
  0x1f   : > { %7837 = sst [smem:[#allocation29_spill]] %s6076_s24  ;;  %p460_p3 = scmp.lt.s32.totalorder %s5944_s23, 3 }
  0x20   : > { %p6084_p4 = por %p7781_p1, %p137_p0  ;;  %s5946_s27 = smov [#allocation6]  }
  0x21   : > { %p6088_p5 = pnand %p4395_p2, %p460_p3  ;;  %s488_s28 = sshll.u32 %s5946_s27, 4  ;;  %s489_s28 = int_to_ptr.vmem [resolvable:$true] %s488_s28 }
  0x22   : > { %s7838_s25 = scalar_select %p6084_p4, 1, 0 }
  0x23   : > { %s7840_s26 = scalar_select %p6088_p5, 1, 0 }
  0x24   : > { %7839 = sst [smem:[#allocation30_spill]] %s7838_s25  ;;  %p5019_p6 = pneg %p6088_p5 }
  0x25   : > { %s46_s30 = sadd.s32 1, %s5940_s22  ;;  %s7842_s1 = sld [smem:[#allocation37_spill]] }
  0x26   : > { %p6096_p7 = pnand %p5019_p6, %p7781_p1 }
  0x28   : > { %s7841_s29 = scalar_select %p6096_p7, 1, 0 }
  0x29   : > { %p6109_p9 = pneg %p6096_p7 }
  0x2b   : > { %s5584_s18 = scalar_lea.hbm %s7842_s1, 2048 }
  0x2c   : > { %p5585_p8 = scmp.ne.s32.totalorder %s7842_s1, %s5584_s18  ;;  %p5591_p12 = scmp.lt.u32.totalorder %s5584_s18, %s7842_s1 }
  0x2d   : > { %s7843_s27 = scalar_select %p6109_p9, 1, 0 }
  0x2e   : > { %p5587_p10 = pnand %p6109_p9, %p5585_p8 }
  0x30   : > { %p5588_p11 = pneg %p5587_p10 }
  0x32   : > { %p5593_p13 = pnand %p5591_p12, %p5588_p11 }
  0x34   : > { %5596 = shalt.err (!%p5593_p13)
}
  0x35   : > { %s5597_s16 = scalar_lea.vmem %s489_s28, 2048  ;;  %p5605_p6 = scmp.lt.s32.totalorder %s489_s28, %s489_s28 }
  0x36   : > { %p5598_p0 = scmp.ne.s32.totalorder %s489_s28, %s5597_s16  ;;  %p5606_p1 = scmp.lt.s32.totalorder %s5597_s16, %s5597_s16 }
  0x38   : > { %p5600_p2 = pnand %p5598_p0, %p6109_p9  ;;  %p5607_p4 = por %p5606_p1, %p5605_p6 }
  0x3a   : > { %p5601_p3 = pneg %p5600_p2 }
  0x3c   : > { %p5608_p5 = pnand %p5607_p4, %p5601_p3 }
  0x3e   : > { %5611 = shalt.err (!%p5608_p5)
}
  0x3f   : > { %s7784_s14 = smov 64   ;;  %s7786_s6 = smov 4  }
  0x40   : > { %5025 = dma.hbm_to_vmem [thread:$0]  (!%p6096_p7), %s7842_s1, 2048, %s489_s28, [#allocation7], %s7784_s14, %s7784_s14, %s7786_s6  }
  0x41   : > { %p47_p1 = scmp.ge.s32.totalorder %s46_s30, 2  ;;  %s124_s17 = sadd.s32 1, %s5932_s20 }
  0x42   : > { %p131_p4 = scmp.ne.s32.totalorder %s5932_s20, %s5928_s19  ;;  %p132_p5 = scmp.eq.s32.totalorder %s5944_s23, 0 }
  0x43   : > { %s7912_s30 = smov (%p47_p1, %s46_s30), 0  ;;  %p5051_p10 = scmp.lt.s32.totalorder %s5944_s23, 2 }
  0x44   : > { %7844 = sst [smem:[#allocation31_spill]] %s7912_s30  ;;  %p133_p8 = por %p132_p5, %p131_p4 }
  0x45   : > { %s121_s18 = ssub.s32 %s5940_s22, %s7912_s30  ;;  %s6138_s16 = sand.u32 1, %s5944_s23  }
  0x46   : > { %p122_p11 = scmp.eq.s32.totalorder %s121_s18, 0  ;;  %s6141_s10 = sand.u32 1, %s5932_s20  }
  0x47   : > { %s7789_s9 = sshll.u32 %s5940_s22, 4  ;;  %s7846_s3 = sld [smem:[#allocation39_spill]] }
  0x48   : > { %s6145_s12 = scalar_select %p122_p11, %s5932_s20, %s124_s17  }
  0x49   : > { %s518_s6 = scalar_lea.vmem [#allocation9], %s6141_s10  ;;  %p6155_p12 = pnand %p5051_p10, %p133_p8 }
  0x4a   : > { %7845 = sst [smem:[#allocation32_spill]] %s6145_s12  ;;  %s525_s1 = sshll.u32 %s518_s6, 4  ;;  %s6159_s1 = int_to_ptr.vmem [resolvable:$true] %s525_s1 }
  0x4b   : > { %s7847_s18 = scalar_select %p6155_p12, 1, 0 }
  0x4c   : > { %p6166_p0 = pneg %p6155_p12 }
  0x4d   : > { %s6152_s14 = scalar_lea.hbm %s7846_s3, %s7789_s9  ;;  %s5617_s9 = scalar_lea.hbm %s7846_s3, 32 }
  0x4e   : > { %s5612_s30 = scalar_lea.hbm %s6152_s14, 16  ;;  %p5618_p6 = scmp.lt.u32.totalorder %s6152_s14, %s7846_s3 }
  0x4f   : > { %p5613_p13 = scmp.ne.s32.totalorder %s6152_s14, %s5612_s30  ;;  %p5619_p1 = scmp.lt.u32.totalorder %s5617_s9, %s5612_s30 }
  0x50   : > { %s7848_s28 = scalar_select %p6166_p0, 1, 0 }
  0x51   : > { %p5615_p2 = pnand %p6166_p0, %p5613_p13  ;;  %p5620_p4 = por %p5619_p1, %p5618_p6 }
  0x52   : > { %p5621_p5 = scmp.lt.u32.totalorder %s5612_s30, %s6152_s14 }
  0x53   : > { %p5616_p3 = pneg %p5615_p2 }
  0x54   : > { %p5622_p8 = por %p5621_p5, %p5620_p4 }
  0x56   : > { %p5623_p10 = pnand %p5622_p8, %p5616_p3 }
  0x58   : > { %5626 = shalt.err (!%p5623_p10)
}
  0x59   : > { %s5627_s17 = scalar_lea.vmem %s6159_s1, 16  ;;  %s5949_s6 = smov [#allocation9]  }
  0x5a   : > { %p5628_p11 = scmp.ne.s32.totalorder %s6159_s1, %s5627_s17  ;;  %s5632_s15 = sshll.u32 %s5949_s6, 4  ;;  %s5633_s15 = int_to_ptr.vmem [resolvable:$false] %s5632_s15 }
  0x5b   : > { %s5634_s20 = scalar_lea.vmem %s5633_s15, 32  ;;  %p5635_p7 = scmp.lt.s32.totalorder %s6159_s1, %s5633_s15 }
  0x5c   : > { %p5630_p13 = pnand %p5628_p11, %p6166_p0  ;;  %p5636_p9 = scmp.lt.s32.totalorder %s5634_s20, %s5627_s17 }
  0x5e   : > { %p5631_p2 = pneg %p5630_p13  ;;  %p5637_p6 = por %p5636_p9, %p5635_p7 }
  0x60   : > { %p5638_p1 = pnand %p5637_p6, %p5631_p2 }
  0x62   : > { %5641 = shalt.err (!%p5638_p1)
}
  0x63   : > { %s7849_s9 = scalar_lea.sflag [#allocation10], %s6138_s16  ;;  %s4987_s30 = smul.u32 192, %s6141_s10 }
  0x64   : > { %5032 = dma.hbm_to_vmem [thread:$0]  (!%p6155_p12), %s6152_s14, 16, %s6159_s1, %s7849_s9  }
  0x65   : > { %s4988_s12 = smul.u32 3072, %s5940_s22  ;;  %s7850_s5 = sld [smem:[#allocation41_spill]] }
  0x66   : > { %s553_s20 = scalar_lea.vmem [#allocation12], %s4987_s30  ;;  %s4406_s23 = sshll.u32 %s6141_s10, 8 }
  0x67   : > { %s560_s3 = sshll.u32 %s553_s20, 4  ;;  %s7797_s8 = scalar_lea.sflag [#allocation13], %s6138_s16  ;;  %s6198_s3 = int_to_ptr.vmem [resolvable:$true] %s560_s3 }
  0x6b   : > { %s6196_s17 = scalar_lea.hbm %s7850_s5, %s4988_s12  ;;  %s5647_s9 = scalar_lea.hbm %s7850_s5, 6144 }
  0x6c   : > { %s5642_s21 = scalar_lea.hbm %s6196_s17, 3072  ;;  %p5648_p4 = scmp.lt.u32.totalorder %s6196_s17, %s7850_s5 }
  0x6d   : > { %p5643_p7 = scmp.ne.s32.totalorder %s6196_s17, %s5642_s21  ;;  %p5649_p5 = scmp.lt.u32.totalorder %s5647_s9, %s5642_s21 }
  0x6e   : > { %p5651_p10 = scmp.lt.u32.totalorder %s5642_s21, %s6196_s17 }
  0x6f   : > { %p5645_p9 = pnand %p5643_p7, %p6166_p0  ;;  %p5650_p8 = por %p5649_p5, %p5648_p4 }
  0x71   : > { %p5646_p3 = pneg %p5645_p9  ;;  %p5652_p11 = por %p5651_p10, %p5650_p8 }
  0x73   : > { %p5653_p13 = pnand %p5652_p11, %p5646_p3 }
  0x75   : > { %5656 = shalt.err (!%p5653_p13)
}
  0x76   : > { %s5657_s30 = scalar_lea.vmem %s6198_s3, 3072  ;;  %s5950_s15 = smov [#allocation12]  }
  0x77   : > { %p5658_p2 = scmp.ne.s32.totalorder %s6198_s3, %s5657_s30  ;;  %s5662_s20 = sshll.u32 %s5950_s15, 4  ;;  %s5663_s20 = int_to_ptr.vmem [resolvable:$false] %s5662_s20 }
  0x78   : > { %s5664_s1 = scalar_lea.vmem %s5663_s20, 6144  ;;  %p5665_p7 = scmp.lt.s32.totalorder %s6198_s3, %s5663_s20 }
  0x79   : > { %p5660_p6 = pnand %p5658_p2, %p6166_p0  ;;  %p5666_p9 = scmp.lt.s32.totalorder %s5664_s1, %s5657_s30 }
  0x7b   : > { %p5661_p1 = pneg %p5660_p6  ;;  %p5667_p4 = por %p5666_p9, %p5665_p7 }
  0x7d   : > { %p5668_p5 = pnand %p5667_p4, %p5661_p1 }
  0x7f   : > { %5671 = shalt.err (!%p5668_p5)
}
  0x80   : > { %s5951_s21 = smov 192   ;;  %s5952_s14 = smov 12  }
  0x81   : > { %5038 = dma.hbm_to_vmem [thread:$0]  (!%p6155_p12), %s6196_s17, 3072, %s6198_s3, %s7797_s8, %s5951_s21, %s5951_s21, %s5952_s14  }
  0x82   : > { %s4579_s9 = sshll.u32 %s5940_s22, 12  ;;  %s7851_s11 = sld [smem:[#allocation47_spill]] }
  0x83   : > { %s620_s15 = scalar_lea.vmem [#allocation15], %s4406_s23  ;;  %s7806_s1 = scalar_lea.sflag [#allocation16], %s6138_s16 }
  0x84   : > { %s627_s20 = sshll.u32 %s620_s15, 4  ;;  %s6235_s20 = int_to_ptr.vmem [resolvable:$true] %s627_s20 }
  0x88   : > { %s6231_s30 = scalar_lea.hbm %s7851_s11, %s4579_s9  ;;  %s5677_s21 = scalar_lea.hbm %s7851_s11, 8192 }
  0x89   : > { %s5672_s5 = scalar_lea.hbm %s6231_s30, 4096  ;;  %p5678_p11 = scmp.lt.u32.totalorder %s6231_s30, %s7851_s11 }
  0x8a   : > { %p5673_p3 = scmp.ne.s32.totalorder %s6231_s30, %s5672_s5  ;;  %p5679_p13 = scmp.lt.u32.totalorder %s5677_s21, %s5672_s5 }
  0x8b   : > { %p5681_p6 = scmp.lt.u32.totalorder %s5672_s5, %s6231_s30 }
  0x8c   : > { %p5675_p8 = pnand %p5673_p3, %p6166_p0  ;;  %p5680_p2 = por %p5679_p13, %p5678_p11 }
  0x8e   : > { %p5676_p10 = pneg %p5675_p8  ;;  %p5682_p1 = por %p5681_p6, %p5680_p2 }
  0x90   : > { %p5683_p7 = pnand %p5682_p1, %p5676_p10 }
  0x92   : > { %5686 = shalt.err (!%p5683_p7)
}
  0x93   : > { %s5687_s6 = scalar_lea.vmem %s6235_s20, 4096  ;;  %s5953_s15 = smov [#allocation15]  }
  0x94   : > { %p5688_p9 = scmp.ne.s32.totalorder %s6235_s20, %s5687_s6  ;;  %s5692_s3 = sshll.u32 %s5953_s15, 4  ;;  %s5693_s3 = int_to_ptr.vmem [resolvable:$false] %s5692_s3 }
  0x95   : > { %s5694_s17 = scalar_lea.vmem %s5693_s3, 8192  ;;  %p5695_p3 = scmp.lt.s32.totalorder %s6235_s20, %s5693_s3 }
  0x96   : > { %p5690_p4 = pnand %p5688_p9, %p6166_p0  ;;  %p5696_p8 = scmp.lt.s32.totalorder %s5694_s17, %s5687_s6 }
  0x98   : > { %p5691_p5 = pneg %p5690_p4  ;;  %p5697_p11 = por %p5696_p8, %p5695_p3 }
  0x9a   : > { %p5698_p13 = pnand %p5697_p11, %p5691_p5 }
  0x9c   : > { %5701 = shalt.err (!%p5698_p13)
}
  0x9d   : > { %s5954_s5 = smov 256   ;;  %s5955_s21 = smov 16  }
  0x9e   : > { %5044 = dma.hbm_to_vmem [thread:$0]  (!%p6155_p12), %s6231_s30, 4096, %s6235_s20, %s7806_s1, %s5954_s5, %s5954_s5, %s5955_s21  }
  0x9f   : > { %s7852_s14 = sshll.u32 %s5940_s22, 4  ;;  %s7853_s4 = sld [smem:[#allocation40_spill]] }
  0xa0   : > { %s6273_s8 = scalar_lea.hbm %s7777_s13, %s4579_s9  ;;  %s6277_s11 = scalar_lea.vmem [#allocation17], %s4406_s23 }
  0xa1   : > { %s655_s25 = sshll.u32 %s6277_s11, 4  ;;  %s5956_s19 = smov [#allocation3]   ;;  %s6351_s25 = int_to_ptr.vmem [resolvable:$true] %s655_s25 }
  0xa2   : > { %s475_s24 = sshll.u32 %s5956_s19, 4  ;;  %s7854_s0 = sld [smem:[#allocation36_spill]]  ;;  %s476_s24 = int_to_ptr.vmem [resolvable:$true] %s475_s24 }
  0xa3   : > { %p7855_p2 = scmp.ne.s32.totalorder %s7843_s27, 0 }
  0xa5   : > { %s6266_s6 = scalar_lea.hbm %s7853_s4, %s7852_s14 }
  0xa8   : > { %s5702_s5 = scalar_lea.hbm %s7854_s0, 512 }
  0xa9   : > { %p5703_p10 = scmp.ne.s32.totalorder %s7854_s0, %s5702_s5  ;;  %p5709_p7 = scmp.lt.u32.totalorder %s5702_s5, %s7854_s0 }
  0xab   : > { %p5705_p6 = pnand %p5703_p10, %p7855_p2 }
  0xad   : > { %p5706_p1 = pneg %p5705_p6 }
  0xaf   : > { %p5711_p9 = pnand %p5709_p7, %p5706_p1 }
  0xb1   : > { %5714 = shalt.err (!%p5711_p9)
}
  0xb2   : > { %s5715_s23 = scalar_lea.vmem %s476_s24, 512  ;;  %p5723_p8 = scmp.lt.s32.totalorder %s476_s24, %s476_s24 }
  0xb3   : > { %p5716_p4 = scmp.ne.s32.totalorder %s476_s24, %s5715_s23  ;;  %p5724_p11 = scmp.lt.s32.totalorder %s5715_s23, %s5715_s23 }
  0xb5   : > { %p5718_p5 = pnand %p5716_p4, %p7855_p2  ;;  %p5725_p13 = por %p5724_p11, %p5723_p8 }
  0xb7   : > { %p5719_p3 = pneg %p5718_p5 }
  0xb9   : > { %p5726_p12 = pnand %p5725_p13, %p5719_p3 }
  0xbb   : > { %5729 = shalt.err (!%p5726_p12)
}
  0xbc   : > { %s5957_s19 = smov 128   ;;  %s5958_s15 = smov 8  }
  0xbd   : > { %p7856_p10 = scmp.ne.s32.totalorder %s7841_s29, 0  ;;  %s5959_s30 = smov [#allocation8]  }
  0xbe   : > { %s501_s20 = sshll.u32 %s5959_s30, 4  ;;  %s535_s5 = scalar_lea.vmem [#allocation11], %s6141_s10  ;;  %s502_s20 = int_to_ptr.vmem [resolvable:$true] %s501_s20 }
  0xbf   : > { %5022 = dma.hbm_to_vmem [thread:$0]  (!%p7856_p10), %s7854_s0, 512, %s476_s24, [#allocation4], %s5957_s19, %s5957_s19, %s5958_s15  }
  0xc0   : > { %s542_s21 = sshll.u32 %s535_s5, 4  ;;  %s7857_s2 = sld [smem:[#allocation38_spill]]  ;;  %s6299_s21 = int_to_ptr.vmem [resolvable:$true] %s542_s21 }
  0xc6   : > { %s5730_s12 = scalar_lea.hbm %s7857_s2, 256 }
  0xc7   : > { %p5731_p12 = scmp.ne.s32.totalorder %s7857_s2, %s5730_s12  ;;  %p5737_p7 = scmp.lt.u32.totalorder %s5730_s12, %s7857_s2 }
  0xc9   : > { %p5733_p6 = pnand %p5731_p12, %p7855_p2 }
  0xcb   : > { %p5734_p1 = pneg %p5733_p6 }
  0xcd   : > { %p5739_p9 = pnand %p5737_p7, %p5734_p1 }
  0xcf   : > { %5742 = shalt.err (!%p5739_p9)
}
  0xd0   : > { %s5743_s17 = scalar_lea.vmem %s502_s20, 256  ;;  %p5751_p8 = scmp.lt.s32.totalorder %s502_s20, %s502_s20 }
  0xd1   : > { %p5744_p4 = scmp.ne.s32.totalorder %s502_s20, %s5743_s17  ;;  %p5752_p11 = scmp.lt.s32.totalorder %s5743_s17, %s5743_s17 }
  0xd3   : > { %p5746_p5 = pnand %p5744_p4, %p7855_p2  ;;  %p5753_p13 = por %p5752_p11, %p5751_p8 }
  0xd5   : > { %p5747_p3 = pneg %p5746_p5 }
  0xd7   : > { %p5754_p0 = pnand %p5753_p13, %p5747_p3 }
  0xd9   : > { %5757 = shalt.err (!%p5754_p0)
}
  0xda   : > { %5028 = dma.hbm_to_vmem [thread:$0]  (!%p7856_p10), %s7857_s2, 256, %s502_s20, [#allocation7], %s5957_s19, %s5957_s19, %s5958_s15  }
  0xdb   : > { %s5758_s5 = scalar_lea.hbm %s6266_s6, 16  ;;  %p7858_p2 = scmp.ne.s32.totalorder %s7848_s28, 0 }
  0xdc   : > { %p5759_p12 = scmp.ne.s32.totalorder %s6266_s6, %s5758_s5  ;;  %s5763_s9 = scalar_lea.hbm %s7853_s4, 32 }
  0xdd   : > { %p5764_p0 = scmp.lt.u32.totalorder %s6266_s6, %s7853_s4  ;;  %p5765_p7 = scmp.lt.u32.totalorder %s5763_s9, %s5758_s5 }
  0xde   : > { %p5761_p6 = pnand %p5759_p12, %p7858_p2  ;;  %p5767_p4 = scmp.lt.u32.totalorder %s5758_s5, %s6266_s6 }
  0xdf   : > { %p5766_p9 = por %p5765_p7, %p5764_p0 }
  0xe0   : > { %p5762_p1 = pneg %p5761_p6 }
  0xe1   : > { %p5768_p5 = por %p5767_p4, %p5766_p9 }
  0xe3   : > { %p5769_p3 = pnand %p5768_p5, %p5762_p1 }
  0xe5   : > { %5772 = shalt.err (!%p5769_p3)
}
  0xe6   : > { %s5773_s19 = scalar_lea.vmem %s6299_s21, 16  ;;  %s5960_s15 = smov [#allocation11]  }
  0xe7   : > { %p5774_p10 = scmp.ne.s32.totalorder %s6299_s21, %s5773_s19  ;;  %s5778_s20 = sshll.u32 %s5960_s15, 4  ;;  %s5779_s20 = int_to_ptr.vmem [resolvable:$false] %s5778_s20 }
  0xe8   : > { %s5780_s23 = scalar_lea.vmem %s5779_s20, 32  ;;  %p5781_p13 = scmp.lt.s32.totalorder %s6299_s21, %s5779_s20 }
  0xe9   : > { %p5776_p8 = pnand %p5774_p10, %p7858_p2  ;;  %p5782_p12 = scmp.lt.s32.totalorder %s5780_s23, %s5773_s19 }
  0xeb   : > { %p5777_p11 = pneg %p5776_p8  ;;  %p5783_p6 = por %p5782_p12, %p5781_p13 }
  0xed   : > { %p5784_p0 = pnand %p5783_p6, %p5777_p11 }
  0xef   : > { %5787 = shalt.err (!%p5784_p0)
}
  0xf0   : > { %p7859_p1 = scmp.ne.s32.totalorder %s7847_s18, 0  ;;  %s7860_s3 = scalar_lea.sflag [#allocation10], %s6138_s16 }
  0xf1   : > { %s4403_s24 = sshll.u32 %s6141_s10, 6  ;;  %s4578_s17 = sshll.u32 %s5940_s22, 10 }
  0xf2   : > { %5035 = dma.hbm_to_vmem [thread:$0]  (!%p7859_p1), %s6266_s6, 16, %s6299_s21, %s7860_s3  }
  0xf3   : > { %s7861_s7 = sld [smem:[#allocation43_spill]]  ;;  %s581_s27 = scalar_lea.vmem [#allocation14], %s4403_s24 }
  0xf4   : > { %s588_s14 = sshll.u32 %s581_s27, 4  ;;  %s6353_s14 = int_to_ptr.vmem [resolvable:$true] %s588_s14 }
  0xf9   : > { %s6347_s5 = scalar_lea.hbm %s7861_s7, %s4578_s17  ;;  %s5793_s21 = scalar_lea.hbm %s7861_s7, 2048 }
  0xfa   : > { %s5788_s9 = scalar_lea.hbm %s6347_s5, 1024  ;;  %p5794_p5 = scmp.lt.u32.totalorder %s6347_s5, %s7861_s7 }
  0xfb   : > { %p5789_p7 = scmp.ne.s32.totalorder %s6347_s5, %s5788_s9  ;;  %p5795_p3 = scmp.lt.u32.totalorder %s5793_s21, %s5788_s9 }
  0xfc   : > { %p5797_p8 = scmp.lt.u32.totalorder %s5788_s9, %s6347_s5 }
  0xfd   : > { %p5791_p9 = pnand %p5789_p7, %p7858_p2  ;;  %p5796_p10 = por %p5795_p3, %p5794_p5 }
  0xff   : > { %p5792_p4 = pneg %p5791_p9  ;;  %p5798_p11 = por %p5797_p8, %p5796_p10 }
 0x101   : > { %p5799_p13 = pnand %p5798_p11, %p5792_p4 }
 0x103   : > { %5802 = shalt.err (!%p5799_p13)
}
 0x104   : > { %s5803_s29 = scalar_lea.vmem %s6353_s14, 1024  ;;  %s5961_s19 = smov [#allocation14]  }
 0x105   : > { %p5804_p12 = scmp.ne.s32.totalorder %s6353_s14, %s5803_s29  ;;  %s5808_s15 = sshll.u32 %s5961_s19, 4  ;;  %s5809_s15 = int_to_ptr.vmem [resolvable:$false] %s5808_s15 }
 0x106   : > { %s5810_s20 = scalar_lea.vmem %s5809_s15, 2048  ;;  %p5811_p7 = scmp.lt.s32.totalorder %s6353_s14, %s5809_s15 }
 0x107   : > { %p5806_p6 = pnand %p5804_p12, %p7858_p2  ;;  %p5812_p9 = scmp.lt.s32.totalorder %s5810_s20, %s5803_s29 }
 0x109   : > { %p5807_p0 = pneg %p5806_p6  ;;  %p5813_p5 = por %p5812_p9, %p5811_p7 }
 0x10b   : > { %p5814_p3 = pnand %p5813_p5, %p5807_p0 }
 0x10d   : > { %5817 = shalt.err (!%p5814_p3)
}
 0x10e   : > { %s7862_s23 = smov 4   ;;  %s7863_s3 = smov 64  }
 0x10f   : > { %s7864_s24 = scalar_lea.sflag [#allocation13], %s6138_s16  ;;  %s5818_s17 = scalar_lea.hbm %s6273_s8, 4096 }
 0x110   : > { %5041 = dma.hbm_to_vmem [thread:$0]  (!%p7859_p1), %s6347_s5, 1024, %s6353_s14, %s7864_s24, %s7863_s3, %s7863_s3, %s7862_s23  }
 0x111   : > { %p5819_p4 = scmp.ne.s32.totalorder %s6273_s8, %s5818_s17  ;;  %s5823_s27 = scalar_lea.hbm %s7777_s13, 8192 }
 0x112   : > { %p5824_p11 = scmp.lt.u32.totalorder %s6273_s8, %s7777_s13  ;;  %p5825_p13 = scmp.lt.u32.totalorder %s5823_s27, %s5818_s17 }
 0x113   : > { %p5821_p10 = pnand %p5819_p4, %p7858_p2  ;;  %p5827_p6 = scmp.lt.u32.totalorder %s5818_s17, %s6273_s8 }
 0x114   : > { %p5826_p12 = por %p5825_p13, %p5824_p11 }
 0x115   : > { %p5822_p8 = pneg %p5821_p10 }
 0x116   : > { %p5828_p0 = por %p5827_p6, %p5826_p12 }
 0x118   : > { %p5829_p7 = pnand %p5828_p0, %p5822_p8 }
 0x11a   : > { %5832 = shalt.err (!%p5829_p7)
}
 0x11b   : > { %s5833_s5 = scalar_lea.vmem %s6351_s25, 4096  ;;  %s5962_s14 = smov [#allocation17]  }
 0x11c   : > { %p5834_p9 = scmp.ne.s32.totalorder %s6351_s25, %s5833_s5  ;;  %s5838_s6 = sshll.u32 %s5962_s14, 4  ;;  %s5839_s6 = int_to_ptr.vmem [resolvable:$false] %s5838_s6 }
 0x11d   : > { %s5840_s21 = scalar_lea.vmem %s5839_s6, 8192  ;;  %p5841_p4 = scmp.lt.s32.totalorder %s6351_s25, %s5839_s6 }
 0x11e   : > { %p5836_p5 = pnand %p5834_p9, %p7858_p2  ;;  %p5842_p10 = scmp.lt.s32.totalorder %s5840_s21, %s5833_s5 }
 0x120   : > { %p5837_p3 = pneg %p5836_p5  ;;  %p5843_p11 = por %p5842_p10, %p5841_p4 }
 0x122   : > { %p5844_p13 = pnand %p5843_p11, %p5837_p3 }
 0x124   : > { %5847 = shalt.err (!%p5844_p13)
}
 0x125   : > { %s7865_s11 = scalar_lea.sflag [#allocation16], %s6138_s16  ;;  %p7866_p2 = scmp.ne.s32.totalorder %s7840_s26, 0 }
 0x126   : > { %5047 = dma.hbm_to_vmem [thread:$0]  (!%p7859_p1), %s6273_s8, 4096, %s6351_s25, %s7865_s11, %s7863_s3, %s7863_s3, %s7862_s23  }
 0x127   : > { %673 = sbr.rel (%p7866_p2) target bundleno = 3646 (0xe3e), region = 80 }
 0x12e   : > { %s7867_s28 = sld [smem:[#allocation29_spill]] }
 0x134   : > { %p7868_p8 = scmp.eq.s32.totalorder %s7867_s28, 0 }
 0x136   : > { %5899 = dma.done.wait (%p7868_p8), [#allocation4], 512   ;;  %p7869_p12 = pmov %p7868_p8 }
 0x137   : > { %p7870_p6 = pmov %p7868_p8 }
 0x138   : > { %5901 = vsyncadd (%p7869_p12), [#allocation4], 4294966784 }
 0x139   : > { %5903 = dma.done.wait (%p7870_p6), [#allocation7], 2304   ;;  %p7871_p0 = pmov %p7870_p6 }
 0x13a   : > { %s7872_s16 = sld [smem:[#allocation25_spill]]  ;;  %s7873_s18 = sld [smem:[#allocation30_spill]] }
 0x13b   : > { %5905 = vsyncadd (%p7871_p0), [#allocation7], 4294964992  ;;  %s687_s12 = sand.u32 1, %s7867_s28  }
 0x13c   : > { %s688_s25 = scalar_lea.sflag [#allocation10], %s687_s12 }
 0x140   : > { %s6419_s8 = sand.u32 1, %s7872_s16   ;;  %p7874_p1 = scmp.ne.s32.totalorder %s7873_s18, 0 }
 0x142   : > { %5907 = dma.done.wait (%p7874_p1), %s688_s25, 32  }
 0x143   : > { %5909 = vsyncadd (%p7874_p1), %s688_s25, 4294967264  ;;  %s4989_s29 = smul.u32 192, %s6419_s8  ;;  %s704_s15 = scalar_lea.sflag [#allocation13], %s687_s12 }
 0x145   : > { %s6428_s20 = scalar_lea.vmem [#allocation12], %s4989_s29 }
 0x146   : > { %5911 = dma.done.wait (%p7874_p1), %s704_s15, 4096  }
 0x147   : > { %5913 = vsyncadd (%p7874_p1), %s704_s15, 4294963200  ;;  %s4416_s23 = sshll.u32 %s6419_s8, 6  ;;  %s4417_s3 = sshll.u32 %s6419_s8, 8 }
 0x148   : > { %s6436_s24 = scalar_lea.vmem [#allocation14], %s4416_s23  ;;  %s722_s17 = scalar_lea.sflag [#allocation16], %s687_s12 }
 0x149   : > { %s6438_s1 = scalar_lea.vmem [#allocation15], %s4417_s3 }
 0x14a   : > { %5915 = dma.done.wait (%p7874_p1), %s722_s17, 8192  }
 0x14b   : > { %5917 = vsyncadd (%p7874_p1), %s722_s17, 4294959104  ;;  %s7875_s30 = sld [smem:[#allocation27_spill]]  ;;  %s7876_s14 = sld [smem:[#allocation44_spill]] }
 0x14c   : > { %s7877_s28 = sld [smem:[#allocation45_spill]]  ;;  %s7878_s25 = sld [smem:[#allocation46_spill]] }
 0x14d   : > { %s7879_s17 = sld [smem:[#allocation42_spill]]  ;;  %s7880_s4 = sld [smem:[#allocation48_spill]] }
 0x14e   : > { %s6476_s11 = scalar_lea.vmem [#allocation17], %s4417_s3 }
 0x151   : > { %p820_p7 = scmp.lt.s32.totalorder %s7875_s30, 1  ;;  %p4420_p9 = scmp.ne.s32.totalorder %s7875_s30, 0 }
 0x152   : > { %v846_v0 = vld [vmem:[#allocation3] sm:$0xff] (!%p4420_p9)  ;;  %v847_v1 = vld [vmem:[#allocation3 + $0x8] sm:$0xff] (!%p4420_p9)  ;;  %v848_v2 = vld [vmem:[#allocation3 + $0x10] sm:$0xff] (!%p4420_p9) }
 0x153   : > { %s6446_s27 = scalar_select %p820_p7, %s7875_s30, 1 }
 0x154   : > { %850 = vst [vmem:[#allocation2] sm:$0xff] (!%p4420_p9), %v846_v0  ;;  %851 = vst [vmem:[#allocation2 + $0x8] sm:$0xff] (!%p4420_p9), %v847_v1  ;;  %v849_v3 = vld [vmem:[#allocation3 + $0x18] sm:$0xff] (!%p4420_p9) }
 0x155   : > { %s4990_s9 = smul.u32 3, %s6446_s27  ;;  %s826_s6 = scalar_lea.vmem %s7876_s14, %s6446_s27  ;;  %852 = vst [vmem:[#allocation2 + $0x10] sm:$0xff] (!%p4420_p9), %v848_v2  ;;  %853 = vst [vmem:[#allocation2 + $0x18] sm:$0xff] (!%p4420_p9), %v849_v3 }
 0x156   : > { %s829_s16 = scalar_lea.vmem %s7877_s28, %s6446_s27  ;;  %s832_s29 = scalar_lea.vmem %s7878_s25, %s6446_s27 }
 0x157   : > { %s6464_s19 = scalar_lea.vmem %s7879_s17, %s4990_s9  ;;  %s4419_s26 = sshll.u32 %s6446_s27, 2 }
 0x158   : > { %s6470_s7 = scalar_lea.vmem %s7880_s4, %s4419_s26  ;;  %s7881_s14 = sld [smem:[#allocation49_spill]] }
 0x159   : > { %845 = sbr.rel (%p4420_p9) target bundleno = 352 (0x160), region = 120 }
 0x15e   : > { %s839_s21 = scalar_lea.vmem %s7881_s14, %s6446_s27 }
 0x160 PF: > { %v854_v4 = vld [vmem:[#allocation2] sm:$0xff]  ;;  %v855_v5 = vld [vmem:[#allocation2 + $0x8] sm:$0xff]  ;;  %v856_v6 = vld [vmem:[#allocation2 + $0x10] sm:$0xff]  ;;  %v7812_v27 = vmov 0   ;;  %s7882_s0 = scalar_lea.vmem [#allocation9], %s6419_s8  ;;  %s7883_s2 = scalar_lea.vmem [#allocation11], %s6419_s8 }
 0x161   : > { %892 = vadd.xlane.f32.xlu0 %v854_v4  ;;  %v5121_v7 = vld [vmem:[%s6428_s20 + $0x4] ss:$12 sps:$4 sm:$0xff]   ;;  %v5123_v8 = vld [vmem:[%s6428_s20] ss:$12 sps:$4 sm:$0xff]   ;;  %v5124_v9 = vld [vmem:[%s6428_s20 + $0x1c] ss:$12 sps:$4 sm:$0xff]   ;;  %1170 = vmatprep.mubr.bf16.mxu0 %v7812_v27 }
 0x162   : > { %1138 = vmatprep.subr.bf16.mxu0 %v5121_v7  ;;  %v857_v18 = vld [vmem:[#allocation2 + $0x18] sm:$0xff]  ;;  %v5127_v20 = vld [vmem:[%s6428_s20 + $0x34] ss:$12 sps:$4 sm:$0xff]   ;;  %v5129_v21 = vld [vmem:[%s6428_s20 + $0x30] ss:$12 sps:$4 sm:$0xff]   ;;  %vm1555_vm0 = vcmask 130048  }
 0x163   : > { %1139 = vmatpush1.bf16.msra.mxu0 %v5123_v8  ;;  %v5126_v19 = vld [vmem:[%s6428_s20 + $0x18] ss:$12 sps:$4 sm:$0xff]   ;;  %v5132_v23 = vld [vmem:[%s6428_s20 + $0x48] ss:$12 sps:$4 sm:$0xff]   ;;  %v5135_v25 = vld [vmem:[%s6428_s20 + $0x60] ss:$12 sps:$4 sm:$0xff]  }
 0x164   : > { %1140 = vmatprep.subr.bf16.mxu0 %v5124_v9  ;;  %v5130_v22 = vld [vmem:[%s6428_s20 + $0x4c] ss:$12 sps:$4 sm:$0xff]   ;;  %v5133_v24 = vld [vmem:[%s6428_s20 + $0x64] ss:$12 sps:$4 sm:$0xff]   ;;  %v5136_v26 = vld [vmem:[%s6428_s20 + $0x7c] ss:$12 sps:$4 sm:$0xff]  }
 0x165   : > { %894 = vadd.xlane.f32.xlu0 %v855_v5  ;;  %v5138_v28 = vld [vmem:[%s6428_s20 + $0x78] ss:$12 sps:$4 sm:$0xff]   ;;  %v5139_v29 = vld [vmem:[%s6428_s20 + $0x94] ss:$12 sps:$4 sm:$0xff]   ;;  %v5141_v30 = vld [vmem:[%s6428_s20 + $0x90] ss:$12 sps:$4 sm:$0xff]  }
 0x166   : > { %v5142_v31 = vld [vmem:[%s6428_s20 + $0xac] ss:$12 sps:$4 sm:$0xff]   ;;  %v5144_v32 = vld [vmem:[%s6428_s20 + $0xa8] ss:$12 sps:$4 sm:$0xff]   ;;  %v5148_v61 = vld [vmem:[%s6428_s20 + $0x50] ss:$12 sps:$4 sm:$0xff]  }
 0x167   : > { %1141 = vmatpush1.bf16.msra.mxu0 %v5126_v19  ;;  %v5145_v34 = vld [vmem:[%s6428_s20 + $0x8] ss:$12 sps:$4 sm:$0xff]   ;;  %v5146_v35 = vld [vmem:[%s6428_s20 + $0x20] ss:$12 sps:$4 sm:$0xff]   ;;  %v5147_v38 = vld [vmem:[%s6428_s20 + $0x38] ss:$12 sps:$4 sm:$0xff]  }
 0x168   : > { %1142 = vmatprep.subr.bf16.mxu0 %v5127_v20  ;;  %4783 = vmatprep.subr.bf16.mxu1 %v5145_v34  ;;  %v4421_v52 = vld [vmem:[%s7882_s0] ss:$0 sm:$0xff]  ;;  %v5149_v62 = vld [vmem:[%s6428_s20 + $0x68] ss:$12 sps:$4 sm:$0xff]   ;;  %v5151_v0 = vld [vmem:[%s6428_s20 + $0x98] ss:$12 sps:$4 sm:$0xff]  }
 0x169   : > { %896 = vadd.xlane.f32.xlu0 %v856_v6  ;;  %4784 = vmatpush3.bf16.msra.mxu1 %v5145_v34  ;;  %v4422_v56 = vld [vmem:[%s7883_s2] ss:$0 sm:$0xff]  ;;  %v5152_v1 = vld [vmem:[%s6428_s20 + $0xb0] ss:$12 sps:$4 sm:$0xff]   ;;  %s7901_s27 = sld [smem:[#allocation27_spill]] }
 0x16a   : > { %4785 = vmatprep.subr.bf16.mxu1 %v5146_v35  ;;  %v5150_v63 = vld [vmem:[%s6428_s20 + $0x80] ss:$12 sps:$4 sm:$0xff]  }
 0x16b   : > { %1143 = vmatpush1.bf16.msra.mxu0 %v5129_v21  ;;  %v993_v20 = vld [vmem:[%s6464_s19] sm:$0x7] }
 0x16c   : > { %1144 = vmatprep.subr.bf16.mxu0 %v5130_v22 }
 0x16d   : > { %4786 = vmatpush3.bf16.msra.mxu1 %v5146_v35 }
 0x16e   : > { %4787 = vmatprep.subr.bf16.mxu1 %v5147_v38 }
 0x16f   : > { %1145 = vmatpush1.bf16.msra.mxu0 %v5132_v23  ;;  %p4573_p5 = scmp.ne.s32.totalorder %s7901_s27, 1 }
 0x170   : > { %1146 = vmatprep.subr.bf16.mxu0 %v5133_v24 }
 0x171   : > { %4788 = vmatpush3.bf16.msra.mxu1 %v5147_v38 }
 0x172   : > { %4789 = vmatprep.subr.bf16.mxu1 %v5148_v61 }
 0x173   : > { %1147 = vmatpush1.bf16.msra.mxu0 %v5135_v25 }
 0x174   : > { %1148 = vmatprep.subr.bf16.mxu0 %v5136_v26 }
 0x175   : > { %4790 = vmatpush3.bf16.msra.mxu1 %v5148_v61 }
 0x176   : > { %4791 = vmatprep.subr.bf16.mxu1 %v5149_v62 }
 0x177   : > { %1149 = vmatpush1.bf16.msra.mxu0 %v5138_v28 }
 0x178   : > { %1150 = vmatprep.subr.bf16.mxu0 %v5139_v29 }
 0x179   : > { %4792 = vmatpush3.bf16.msra.mxu1 %v5149_v62 }
 0x17a   : > { %4793 = vmatprep.subr.bf16.mxu1 %v5150_v63 }
 0x17b   : > { %1151 = vmatpush1.bf16.msra.mxu0 %v5141_v30 }
 0x17c   : > { %1152 = vmatprep.subr.bf16.mxu0 %v5142_v31 }
 0x17d   : > { %4794 = vmatpush3.bf16.msra.mxu1 %v5150_v63 }
 0x17e   : > { %4795 = vmatprep.subr.bf16.mxu1 %v5151_v0 }
 0x17f   : > { %1153 = vmatpush1.bf16.msra.mxu0 %v5144_v32  ;;  %v6531_v32 = vld [vmem:[#allocation6] sm:$0xff]  }
 0x181   : > { %4796 = vmatpush3.bf16.msra.mxu1 %v5151_v0 }
 0x182   : > { %4797 = vmatprep.subr.bf16.mxu1 %v5152_v1 }
 0x185   : > { %4798 = vmatpush3.bf16.msra.mxu1 %v5152_v1 }
 0x1ee   : > { %v893_v10 = vpop.xlane.xlu0 %892 }
 0x1ef   : > { %v901_v11 = vmul.f32 0.0078125, %v893_v10 }
 0x1f1   : > { %v6482_v12 = vsub.f32 %v854_v4, %v901_v11 }
 0x1f2   : > { %v895_v13 = vpop.xlane.xlu0 %894 }
 0x1f3   : > { %v902_v14 = vmul.f32 0.0078125, %v895_v13  ;;  %v909_v15 = vmul.f32 %v6482_v12, %v6482_v12 }
 0x1f5   : > { %913 = vadd.xlane.f32.xlu1 %v909_v15  ;;  %v6486_v16 = vsub.f32 %v855_v5, %v902_v14 }
 0x1f6   : > { %v897_v33 = vpop.xlane.xlu0 %896 }
 0x1f7   : > { %v910_v17 = vmul.f32 %v6486_v16, %v6486_v16  ;;  %v903_v36 = vmul.f32 0.0078125, %v897_v33 }
 0x1f9   : > { %915 = vadd.xlane.f32.xlu1 %v910_v17  ;;  %v907_v37 = vsub.f32 %v856_v6, %v903_v36  ;;  %v995_v17 = vlaneseq }
 0x1fb   : > { %v911_v39 = vmul.f32 %v907_v37, %v907_v37 }
 0x1fd   : > { %898 = vadd.xlane.f32.xlu1 %v857_v18  ;;  %917 = vadd.xlane.f32.xlu0 %v911_v39 }
 0x282   : > { %v914_v40 = vpop.xlane.xlu1 %913 }
 0x283   : > { %v921_v41 = vmul.f32 0.0078125, %v914_v40 }
 0x285   : > { %v925_v42 = vadd.f32 1e-05, %v921_v41 }
 0x286   : > { %v916_v43 = vpop.xlane.xlu1 %915 }
 0x287   : > { %5260 = vrsqrt.f32 %v925_v42  ;;  %v922_v44 = vmul.f32 0.0078125, %v916_v43 }
 0x289   : > { %v926_v45 = vadd.f32 1e-05, %v922_v44 }
 0x28a   : > { %v899_v46 = vpop.xlane.xlu1 %898  ;;  %v918_v2 = vpop.xlane.xlu0 %917 }
 0x28b   : > { %5262 = vrsqrt.f32 %v926_v45  ;;  %v904_v47 = vmul.f32 0.0078125, %v899_v46  ;;  %v923_v3 = vmul.f32 0.0078125, %v918_v2 }
 0x28d   : > { %v908_v48 = vsub.f32 %v857_v18, %v904_v47  ;;  %v927_v4 = vadd.f32 1e-05, %v923_v3  ;;  %v6519_v18 = vshrl.u32 %v995_v17, 7 }
 0x28f   : > { %v912_v49 = vmul.f32 %v908_v48, %v908_v48  ;;  %5264 = vrsqrt.f32 %v927_v4  ;;  %7884 = vst [vmem:[#allocation33_spill] sm:$0xff] %v6519_v18  ;;  %v7809_v19 = vsub.s32 1, %v6519_v18  ;;  %v7811_v21 = vsub.s32 0, %v6519_v18 }
 0x290   : > { %v7810_v42 = vsub.s32 2, %v6519_v18 }
 0x291   : > { %v5261_v50 = vpop.eup %5260  ;;  %919 = vadd.xlane.f32.xlu1 %v912_v49  ;;  %v6526_v22 = vrot.slane %v993_v20, %v7809_v19  ;;  %v998_v23 = vrot.slane %v993_v20, %v7811_v21 }
 0x292   : > { %v933_v51 = vmul.f32 %v5261_v50, %v6482_v12  ;;  %v1006_v44 = vrot.slane %v993_v20, %v7810_v42 }
 0x294   : > { %v944_v55 = vmul.f32 %v4421_v52, %v933_v51 }
 0x295   : > { %v5263_v53 = vpop.eup %5262 }
 0x296   : > { %v934_v54 = vmul.f32 %v5263_v53, %v6486_v16  ;;  %v955_v58 = vadd.f32 %v4422_v56, %v944_v55 }
 0x298   : > { %v945_v57 = vmul.f32 %v4421_v52, %v934_v54 }
 0x299   : > { %v5265_v8 = vpop.eup %5264 }
 0x29a   : > { %v956_v59 = vadd.f32 %v4422_v56, %v945_v57  ;;  %v935_v9 = vmul.f32 %v5265_v8, %v907_v37 }
 0x29c   : > { %v959_v60 = vpack.c.bf16 %v956_v59, %v955_v58  ;;  %v946_v10 = vmul.f32 %v4421_v52, %v935_v9 }
 0x29e   : > { %1171 = vmatmul.mubr.bf16.vlgmr.msra.gmra.mrb[0].mxu0 %v959_v60  ;;  %4799 = vmatprep.mubr.bf16.mxu1 %v959_v60  ;;  %v957_v14 = vadd.f32 %v4422_v56, %v946_v10 }
 0x29f   : > { %1180 = vmatprep.mubr.bf16.mxu0 %v7812_v27 }
 0x31e   : > { %v920_v5 = vpop.xlane.xlu1 %919 }
 0x31f   : > { %v924_v6 = vmul.f32 0.0078125, %v920_v5 }
 0x321   : > { %v928_v7 = vadd.f32 1e-05, %v924_v6 }
 0x323   : > { %5266 = vrsqrt.f32 %v928_v7 }
 0x32d   : > { %v5267_v11 = vpop.eup %5266 }
 0x32e   : > { %v936_v12 = vmul.f32 %v5267_v11, %v908_v48 }
 0x330   : > { %v947_v13 = vmul.f32 %v4421_v52, %v936_v12 }
 0x332   : > { %v958_v15 = vadd.f32 %v4422_v56, %v947_v13 }
 0x334   : > { %v960_v16 = vpack.c.bf16 %v958_v15, %v957_v14  ;;  %v6549_v15 = vld [vmem:[#allocation6 + $0x8] sm:$0xff]  }
 0x336   : > { %4800 = vmatmul.mubr.bf16.vlgmr.msra.gmra.mrb[0].mxu1 %v960_v16  ;;  %1181 = vmatmul.mubr.bf16.gmra.mrb[4].mxu0 %v960_v16  ;;  %v6551_v16 = vld [vmem:[#allocation6 + $0x10] sm:$0xff]  }
 0x371   : > { %v1172_v24 = vpop.f32.mrb[0].mxu0 }
 0x372   : > { %v1174_v25 = vpop.f32.mrb[1].mxu0  ;;  %v1173_v29 = vadd.f32 %v1172_v24, %v998_v23  ;;  %v6559_v24 = vld [vmem:[#allocation6 + $0x20] sm:$0xff]  }
 0x373   : > { %v1175_v26 = vadd.f32 %v1174_v25, %v6526_v22  ;;  %v1176_v28 = vpop.f32.mrb[2].mxu0 }
 0x374   : > { %v1177_v30 = vadd.f32 %v1176_v28, %v998_v23  ;;  %v1178_v31 = vpop.f32.mrb[3].mxu0  ;;  %v6565_v28 = vld [vmem:[#allocation6 + $0x28] sm:$0xff]  }
 0x375   : > { %1241 = vxpose.xlu0.b32.start [1/2] (short) %v1175_v26, 128  ;;  %v1179_v34 = vadd.f32 %v1178_v31, %v6526_v22 }
 0x376   : > { %v6533_v33 = vpack.c.bf16 %v1177_v30, %v1173_v29  ;;  %v6567_v29 = vld [vmem:[#allocation6 + $0x30] sm:$0xff]  }
 0x378   : > { %v1378_v35 = vmul.bf16 %v6531_v32, %v6533_v33  ;;  %v1379_v17 = vmul.bf16 %v6549_v15, %v6533_v33  ;;  %v1380_v20 = vmul.bf16 %v6551_v16, %v6533_v33  ;;  %v1382_v26 = vmul.bf16 %v6559_v24, %v6533_v33 }
 0x379   : > { %1242 = vxpose.xlu0.b32.end [2/2] (short) %v1179_v34, 128  ;;  %v1383_v30 = vmul.bf16 %v6565_v28, %v6533_v33  ;;  %v1384_v31 = vmul.bf16 %v6567_v29, %v6533_v33  ;;  %v6573_v34 = vld [vmem:[#allocation6 + $0x38] sm:$0xff]  }
 0x37a   : > { %4819 = vmatprep.mubr.bf16.mxu0 %v1378_v35  ;;  %v6575_v35 = vld [vmem:[#allocation6 + $0x40] sm:$0xff]  }
 0x3f5   : > { %v1257_v36 = vpop.trf.xlu0 }
 0x3f9   : > { %v1258_v37 = vpop.trf.xlu0 }
 0x3fa   : > { %v1273_v38 = vpack.c.bf16 %v1258_v37, %v1257_v36  ;;  %v1385_v36 = vmul.bf16 %v6573_v34, %v6533_v33  ;;  %v1386_v37 = vmul.bf16 %v6575_v35, %v6533_v33 }
 0x3fc   : > { %4803 = vmatprep.subr.bf16.mxu0 %v1273_v38 }
 0x3fd   : > { %4804 = vmatpush3.bf16.msra.mxu0 %v1273_v38  ;;  %v1259_v39 = vpop.trf.xlu0  ;;  %v6581_v38 = vld [vmem:[#allocation6 + $0x48] sm:$0xff]  }
 0x401   : > { %v1260_v40 = vpop.trf.xlu0 }
 0x402   : > { %v1274_v41 = vpack.c.bf16 %v1260_v40, %v1259_v39  ;;  %v6583_v39 = vld [vmem:[#allocation6 + $0x50] sm:$0xff]   ;;  %v1387_v40 = vmul.bf16 %v6581_v38, %v6533_v33 }
 0x404   : > { %4805 = vmatprep.subr.bf16.mxu0 %v1274_v41 }
 0x405   : > { %4806 = vmatpush3.bf16.msra.mxu0 %v1274_v41  ;;  %v1261_v43 = vpop.trf.xlu0  ;;  %v1388_v41 = vmul.bf16 %v6583_v39, %v6533_v33 }
 0x409   : > { %v1262_v45 = vpop.trf.xlu0  ;;  %v4801_v46 = vpop.f32.mrb[0].mxu1 }
 0x40a   : > { %v1275_v47 = vpack.c.bf16 %v1262_v45, %v1261_v43  ;;  %v1234_v48 = vadd.f32 %v4801_v46, %v1006_v44  ;;  %v1182_v49 = vpop.f32.mrb[4].mxu0  ;;  %v1225_v50 = vpop.f32.mrb[1].mxu1  ;;  %v6589_v43 = vld [vmem:[#allocation6 + $0x58] sm:$0xff]  }
 0x40b   : > { %v1183_v51 = vadd.f32 %v1182_v49, %v998_v23  ;;  %v1226_v52 = vadd.f32 %v1225_v50, %v1006_v44  ;;  %v6541_v53 = vpop.f32.mrb[5].mxu0  ;;  %v4802_v54 = vpop.f32.mrb[2].mxu1  ;;  %v1389_v45 = vmul.bf16 %v6589_v43, %v6533_v33 }
 0x40c   : > { %4807 = vmatprep.subr.bf16.mxu0 %v1275_v47  ;;  %v1237_v55 = vadd.f32 %v4802_v54, %v1006_v44  ;;  %v1186_v56 = vpop.f32.mrb[6].mxu0  ;;  %v1228_v57 = vpop.f32.mrb[3].mxu1 }
 0x40d   : > { %4808 = vmatpush3.bf16.msra.mxu0 %v1275_v47  ;;  %v1263_v58 = vpop.trf.xlu0  ;;  %v1187_v59 = vadd.f32 %v1186_v56, %v998_v23  ;;  %v1229_v60 = vadd.f32 %v1228_v57, %v1006_v44  ;;  %v6543_v61 = vpop.f32.mrb[7].mxu0  ;;  %v6557_v23 = vld [vmem:[#allocation6 + $0x18] sm:$0xff]   ;;  %v6591_v44 = vld [vmem:[#allocation6 + $0x60] sm:$0xff]   ;;  %v6597_v47 = vld [vmem:[#allocation6 + $0x68] sm:$0xff]  }
 0x40e   : > { %v6545_v62 = vpack.c.bf16 %v1237_v55, %v1234_v48  ;;  %v1381_v25 = vmul.bf16 %v6557_v23, %v6533_v33  ;;  %v1390_v46 = vmul.bf16 %v6591_v44, %v6533_v33  ;;  %v6599_v48 = vld [vmem:[#allocation6 + $0x70] sm:$0xff]   ;;  %v1391_v49 = vmul.bf16 %v6597_v47, %v6533_v33 }
 0x40f   : > { %v6547_v63 = vpack.c.bf16 %v1187_v59, %v1183_v51  ;;  %v1281_v0 = vpack.c.bf16 %v1229_v60, %v1226_v52  ;;  %v1392_v50 = vmul.bf16 %v6599_v48, %v6533_v33  ;;  %v6605_v51 = vld [vmem:[#allocation6 + $0x78] sm:$0xff]  }
 0x410   : > { %v1393_v52 = vmul.bf16 %v6605_v51, %v6533_v33 }
 0x411   : > { %v1264_v1 = vpop.trf.xlu0  ;;  %4851 = vmatprep.subr.bf16.mxu1 %v1281_v0  ;;  %v2258_v54 = vmul.bf16 %v6531_v32, %v6547_v63 }
 0x412   : > { %v1276_v2 = vpack.c.bf16 %v1264_v1, %v1263_v58  ;;  %4852 = vmatpush3.bf16.msra.mxu1 %v1281_v0 }
 0x414   : > { %4809 = vmatprep.subr.bf16.mxu0 %v1276_v2 }
 0x415   : > { %4810 = vmatpush3.bf16.msra.mxu0 %v1276_v2  ;;  %v1265_v3 = vpop.trf.xlu0 }
 0x419   : > { %v1266_v4 = vpop.trf.xlu0 }
 0x41a   : > { %v1277_v5 = vpack.c.bf16 %v1266_v4, %v1265_v3 }
 0x41c   : > { %4811 = vmatprep.subr.bf16.mxu0 %v1277_v5 }
 0x41d   : > { %4812 = vmatpush3.bf16.msra.mxu0 %v1277_v5  ;;  %v1267_v6 = vpop.trf.xlu0 }
 0x421   : > { %v1268_v7 = vpop.trf.xlu0 }
 0x422   : > { %v1278_v8 = vpack.c.bf16 %v1268_v7, %v1267_v6 }
 0x424   : > { %4813 = vmatprep.subr.bf16.mxu0 %v1278_v8 }
 0x425   : > { %4814 = vmatpush3.bf16.msra.mxu0 %v1278_v8  ;;  %v1269_v9 = vpop.trf.xlu0 }
 0x429   : > { %v1270_v10 = vpop.trf.xlu0 }
 0x42a   : > { %v1279_v11 = vpack.c.bf16 %v1270_v10, %v1269_v9 }
 0x42c   : > { %4815 = vmatprep.subr.bf16.mxu0 %v1279_v11 }
 0x42d   : > { %4816 = vmatpush3.bf16.msra.mxu0 %v1279_v11  ;;  %v1271_v12 = vpop.trf.xlu0 }
 0x431   : > { %v1272_v13 = vpop.trf.xlu0 }
 0x432   : > { %v1280_v14 = vpack.c.bf16 %v1272_v13, %v1271_v12 }
 0x434   : > { %4817 = vmatprep.subr.bf16.mxu0 %v1280_v14 }
 0x435   : > { %4818 = vmatpush3.bf16.msra.mxu0 %v1280_v14 }
 0x438   : > { %4820 = vmatmul.mubr.bf16.vlgmr.msra.gmra.mrb[8].mxu0 %v1379_v17 }
 0x439   : > { %4823 = vmatprep.mubr.bf16.mxu0 %v1380_v20 }
 0x440   : > { %4824 = vmatmul.mubr.bf16.gmra.mrb[12].mxu0 %v1381_v25 }
 0x441   : > { %4827 = vmatprep.mubr.bf16.mxu0 %v1382_v26 }
 0x448   : > { %4828 = vmatmul.mubr.bf16.gmra.mrb[16].mxu0 %v1383_v30 }
 0x449   : > { %4831 = vmatprep.mubr.bf16.mxu0 %v1384_v31 }
 0x450   : > { %4832 = vmatmul.mubr.bf16.gmra.mrb[20].mxu0 %v1385_v36 }
 0x451   : > { %4835 = vmatprep.mubr.bf16.mxu0 %v1386_v37 }
 0x458   : > { %4836 = vmatmul.mubr.bf16.gmra.mrb[24].mxu0 %v1387_v40 }
 0x459   : > { %4839 = vmatprep.mubr.bf16.mxu0 %v1388_v41 }
 0x460   : > { %4840 = vmatmul.mubr.bf16.gmra.mrb[28].mxu0 %v1389_v45 }
 0x461   : > { %4843 = vmatprep.mubr.bf16.mxu0 %v1390_v46 }
 0x468   : > { %4844 = vmatmul.mubr.bf16.gmra.mrb[32].mxu0 %v1391_v49 }
 0x469   : > { %4847 = vmatprep.mubr.bf16.mxu0 %v1392_v50 }
 0x470   : > { %4848 = vmatmul.mubr.bf16.gmra.mrb[36].mxu0 %v1393_v52 }
 0x471   : > { %4901 = vmatprep.mubr.bf16.mxu0 %v2258_v54 }
 0x50b   : > { %v6611_v55 = vpop.f32.mrb[8].mxu0 }
 0x50c   : > { %v6613_v56 = vpop.f32.mrb[9].mxu0  ;;  %v1562_v57 = vsel %vm1555_vm0, %v6611_v55, -inf }
 0x50d   : > { %1563 = vmax.xlane.f32.xlu1 %v1562_v57  ;;  %v6617_v58 = vpop.f32.mrb[10].mxu0  ;;  %v1556_v33 = vsel %vm1555_vm0, %v6613_v56, -inf }
 0x50e   : > { %v6619_v59 = vpop.f32.mrb[11].mxu0  ;;  %v1565_v0 = vsel %vm1555_vm0, %v6617_v58, -inf }
 0x50f   : > { %v1559_v4 = vsel %vm1555_vm0, %v6619_v59, -inf }
 0x511   : > { %1557 = vmax.xlane.f32.xlu1 %v1556_v33 }
 0x513   : > { %v6623_v32 = vpop.f32.mrb[12].mxu0 }
 0x514   : > { %v6625_v60 = vpop.f32.mrb[13].mxu0  ;;  %v1574_v5 = vsel %vm1555_vm0, %v6623_v32, -inf }
 0x515   : > { %1566 = vmax.xlane.f32.xlu1 %v1565_v0  ;;  %v6629_v1 = vpop.f32.mrb[14].mxu0  ;;  %v1568_v2 = vsel %vm1555_vm0, %v6625_v60, -inf }
 0x516   : > { %1569 = vmax.xlane.f32.xlu0 %v1568_v2  ;;  %v6633_v3 = vpop.f32.mrb[15].mxu0  ;;  %v1577_v9 = vsel %vm1555_vm0, %v6629_v1, -inf }
 0x519   : > { %1560 = vmax.xlane.f32.xlu1 %v1559_v4 }
 0x51a   : > { %1575 = vmax.xlane.f32.xlu0 %v1574_v5 }
 0x51b   : > { %v6639_v6 = vpop.f32.mrb[16].mxu0 }
 0x51c   : > { %v6641_v7 = vpop.f32.mrb[17].mxu0  ;;  %v1586_v25 = vsel %vm1555_vm0, %v6639_v6, -inf }
 0x51d   : > { %v6643_v8 = vpop.f32.mrb[18].mxu0  ;;  %v1580_v11 = vsel %vm1555_vm0, %v6641_v7, -inf }
 0x51e   : > { %1578 = vmax.xlane.f32.xlu0 %v1577_v9  ;;  %v6647_v10 = vpop.f32.mrb[19].mxu0 }
 0x51f   : > { %v1583_v17 = vsel %vm1555_vm0, %v6647_v10, -inf }
 0x522   : > { %1581 = vmax.xlane.f32.xlu0 %v1580_v11 }
 0x523   : > { %v6651_v12 = vpop.f32.mrb[20].mxu0 }
 0x524   : > { %v6653_v13 = vpop.f32.mrb[21].mxu0  ;;  %v1598_v40 = vsel %vm1555_vm0, %v6651_v12, -inf }
 0x525   : > { %v6655_v14 = vpop.f32.mrb[22].mxu0  ;;  %v1592_v36 = vsel %vm1555_vm0, %v6653_v13, -inf }
 0x526   : > { %1584 = vmax.xlane.f32.xlu0 %v1583_v17  ;;  %v6659_v20 = vpop.f32.mrb[23].mxu0 }
 0x52a   : > { %1587 = vmax.xlane.f32.xlu0 %v1586_v25 }
 0x52b   : > { %v6663_v26 = vpop.f32.mrb[24].mxu0 }
 0x52c   : > { %v6665_v30 = vpop.f32.mrb[25].mxu0  ;;  %v1610_v52 = vsel %vm1555_vm0, %v6663_v26, -inf }
 0x52d   : > { %v6667_v31 = vpop.f32.mrb[26].mxu0  ;;  %v1604_v49 = vsel %vm1555_vm0, %v6665_v30, -inf }
 0x52e   : > { %1593 = vmax.xlane.f32.xlu0 %v1592_v36  ;;  %v6671_v37 = vpop.f32.mrb[27].mxu0 }
 0x532   : > { %1599 = vmax.xlane.f32.xlu0 %v1598_v40  ;;  %v1185_v40 = vadd.f32 %v6541_v53, %v6526_v22 }
 0x533   : > { %v6675_v41 = vpop.f32.mrb[28].mxu0 }
 0x534   : > { %v6677_v45 = vpop.f32.mrb[29].mxu0  ;;  %v1622_v4 = vsel %vm1555_vm0, %v6675_v41, -inf }
 0x535   : > { %v6679_v46 = vpop.f32.mrb[30].mxu0  ;;  %v1616_v0 = vsel %vm1555_vm0, %v6677_v45, -inf }
 0x536   : > { %1605 = vmax.xlane.f32.xlu0 %v1604_v49  ;;  %v6683_v50 = vpop.f32.mrb[31].mxu0 }
 0x53a   : > { %1611 = vmax.xlane.f32.xlu0 %v1610_v52  ;;  %v1189_v52 = vadd.f32 %v6543_v61, %v6526_v22 }
 0x53b   : > { %v6687_v54 = vpop.f32.mrb[32].mxu0 }
 0x53c   : > { %v6689_v57 = vpop.f32.mrb[33].mxu0  ;;  %v1634_v36 = vsel %vm1555_vm0, %v6687_v54, -inf }
 0x53d   : > { %v6691_v33 = vpop.f32.mrb[34].mxu0  ;;  %v1628_v17 = vsel %vm1555_vm0, %v6689_v57, -inf }
 0x53e   : > { %1617 = vmax.xlane.f32.xlu0 %v1616_v0  ;;  %v6695_v2 = vpop.f32.mrb[35].mxu0 }
 0x542   : > { %1623 = vmax.xlane.f32.xlu0 %v1622_v4 }
 0x543   : > { %v6699_v5 = vpop.f32.mrb[36].mxu0 }
 0x544   : > { %v6701_v9 = vpop.f32.mrb[37].mxu0  ;;  %v1646_v0 = vsel %vm1555_vm0, %v6699_v5, -inf }
 0x545   : > { %v6703_v11 = vpop.f32.mrb[38].mxu0  ;;  %v1640_v49 = vsel %vm1555_vm0, %v6701_v9, -inf }
 0x546   : > { %1629 = vmax.xlane.f32.xlu0 %v1628_v17  ;;  %v6707_v25 = vpop.f32.mrb[39].mxu0 }
 0x54a   : > { %1635 = vmax.xlane.f32.xlu0 %v1634_v36 }
 0x54c   : > { %2217 = vxpose.xlu1.b32.start [1/2] (short) %v1185_v40, 128 }
 0x54e   : > { %1641 = vmax.xlane.f32.xlu0 %v1640_v49 }
 0x550   : > { %2218 = vxpose.xlu1.b32.end [2/2] (short) %v1189_v52, 128 }
 0x552   : > { %1647 = vmax.xlane.f32.xlu0 %v1646_v0 }
 0x59a   : > { %v1564_v4 = vpop.xlane.xlu1 %1563 }
 0x59b   : > { %v1654_v17 = vsub.f32 %v6611_v55, %v1564_v4 }
 0x59d   : > { %v1688_v36 = vmul.f32 1.442695, %v1654_v17 }
 0x59e   : > { %v1558_v19 = vpop.xlane.xlu1 %1557 }
 0x59f   : > { %v1652_v53 = vsub.f32 %v6613_v56, %v1558_v19  ;;  %v1571_v19 = vsel %vm1555_vm0, %v6633_v3, -inf }
 0x5a1   : > { %v1684_v40 = vmul.f32 1.442695, %v1652_v53 }
 0x5a3   : > { %5268 = vpow2.f32 %v1684_v40  ;;  %v1570_v42 = vpop.xlane.xlu0 %1569 }
 0x5a4   : > { %v1656_v21 = vsub.f32 %v6625_v60, %v1570_v42  ;;  %5270 = vpow2.f32 %v1688_v36  ;;  %v1589_v60 = vsel %vm1555_vm0, %v6643_v8, -inf  ;;  %v1595_v36 = vsel %vm1555_vm0, %v6659_v20, -inf }
 0x5a6   : > { %v1692_v22 = vmul.f32 1.442695, %v1656_v21 }
 0x5a7   : > { %v1576_v61 = vpop.xlane.xlu0 %1575 }
 0x5a8   : > { %v1658_v49 = vsub.f32 %v6623_v32, %v1576_v61  ;;  %5272 = vpow2.f32 %v1692_v22 }
 0x5aa   : > { %v1696_v52 = vmul.f32 1.442695, %v1658_v49 }
 0x5ab   : > { %v6723_v0 = vpop.xlane.xlu0 %1578 }
 0x5ac   : > { %5274 = vpow2.f32 %v1696_v52  ;;  %v1601_v52 = vsel %vm1555_vm0, %v6655_v14, -inf }
 0x5ad   : > { %v6725_v27 = vpop.eup %5268 }
 0x5ae   : > { %v1748_v55 = vsel %vm1555_vm0, %v6725_v27, 0.0  ;;  %v6731_v56 = vpop.eup %5270 }
 0x5af   : > { %1572 = vmax.xlane.f32.xlu1 %v1571_v19  ;;  %v1582_v21 = vpop.xlane.xlu0 %1581  ;;  %1749 = vadd.xlane.f32.xlu0 %v1748_v55  ;;  %v1754_v4 = vsel %vm1555_vm0, %v6731_v56, 0.0 }
 0x5b0   : > { %v1660_v42 = vsub.f32 %v6641_v7, %v1582_v21 }
 0x5b2   : > { %v1700_v32 = vmul.f32 1.442695, %v1660_v42  ;;  %v6738_v17 = vpop.eup %5272 }
 0x5b3   : > { %1590 = vmax.xlane.f32.xlu1 %v1589_v60  ;;  %v6740_v53 = vpop.xlane.xlu0 %1584  ;;  %1755 = vadd.xlane.f32.xlu0 %v1754_v4  ;;  %v1760_v7 = vsel %vm1555_vm0, %v6738_v17, 0.0  ;;  %v1607_v60 = vsel %vm1555_vm0, %v6671_v37, -inf }
 0x5b4   : > { %5276 = vpow2.f32 %v1700_v32 }
 0x5b6   : > { %v6746_v40 = vpop.eup %5274 }
 0x5b7   : > { %v1588_v22 = vpop.xlane.xlu0 %1587  ;;  %1596 = vmax.xlane.f32.xlu1 %v1595_v36  ;;  %1761 = vadd.xlane.f32.xlu0 %v1760_v7  ;;  %v1766_v19 = vsel %vm1555_vm0, %v6746_v40, 0.0  ;;  %v1567_v36 = vpop.xlane.xlu1 %1566 }
 0x5b8   : > { %v1662_v61 = vsub.f32 %v6639_v6, %v1588_v22 }
 0x5ba   : > { %v1704_v49 = vmul.f32 1.442695, %v1662_v61 }
 0x5bb   : > { %v1594_v55 = vpop.xlane.xlu0 %1593  ;;  %1602 = vmax.xlane.f32.xlu1 %v1601_v52  ;;  %1767 = vadd.xlane.f32.xlu0 %v1766_v19  ;;  %v1561_v19 = vpop.xlane.xlu1 %1560 }
 0x5bc   : > { %5278 = vpow2.f32 %v1704_v49  ;;  %v1664_v21 = vsub.f32 %v6653_v13, %v1594_v55  ;;  %v1613_v13 = vsel %vm1555_vm0, %v6667_v31, -inf }
 0x5be   : > { %v6754_v42 = vpop.eup %5276  ;;  %v1708_v32 = vmul.f32 1.442695, %v1664_v21  ;;  %v1619_v21 = vsel %vm1555_vm0, %v6683_v50, -inf }
 0x5bf   : > { %v1600_v6 = vpop.xlane.xlu0 %1599  ;;  %1608 = vmax.xlane.f32.xlu1 %v1607_v60  ;;  %v1772_v4 = vsel %vm1555_vm0, %v6754_v42, 0.0 }
 0x5c0   : > { %5280 = vpow2.f32 %v1708_v32  ;;  %v1666_v7 = vsub.f32 %v6651_v12, %v1600_v6  ;;  %1773 = vadd.xlane.f32.xlu0 %v1772_v4  ;;  %v1653_v6 = vsub.f32 %v6619_v59, %v1561_v19 }
 0x5c2   : > { %v1712_v22 = vmul.f32 1.442695, %v1666_v7  ;;  %v1625_v7 = vsel %vm1555_vm0, %v6679_v46, -inf }
 0x5c3   : > { %v1606_v61 = vpop.xlane.xlu0 %1605  ;;  %1614 = vmax.xlane.f32.xlu1 %v1613_v13 }
 0x5c4   : > { %5282 = vpow2.f32 %v1712_v22  ;;  %v1668_v49 = vsub.f32 %v6665_v30, %v1606_v61 }
 0x5c6   : > { %v6764_v52 = vpop.eup %5278  ;;  %v1716_v55 = vmul.f32 1.442695, %v1668_v49 }
 0x5c7   : > { %v1612_v32 = vpop.xlane.xlu0 %1611  ;;  %1620 = vmax.xlane.f32.xlu1 %v1619_v21  ;;  %v1778_v12 = vsel %vm1555_vm0, %v6764_v52, 0.0  ;;  %v1631_v21 = vsel %vm1555_vm0, %v6695_v2, -inf }
 0x5c8   : > { %5284 = vpow2.f32 %v1716_v55  ;;  %v1670_v60 = vsub.f32 %v6663_v26, %v1612_v32  ;;  %1779 = vadd.xlane.f32.xlu0 %v1778_v12  ;;  %v1655_v26 = vsub.f32 %v6617_v58, %v1567_v36  ;;  %v1686_v55 = vmul.f32 1.442695, %v1653_v6 }
 0x5ca   : > { %v6772_v4 = vpop.eup %5280  ;;  %v1720_v30 = vmul.f32 1.442695, %v1670_v60 }
 0x5cb   : > { %v1618_v22 = vpop.xlane.xlu0 %1617  ;;  %1626 = vmax.xlane.f32.xlu1 %v1625_v7  ;;  %v1784_v13 = vsel %vm1555_vm0, %v6772_v4, 0.0  ;;  %v1637_v7 = vsel %vm1555_vm0, %v6691_v33, -inf }
 0x5cc   : > { %5286 = vpow2.f32 %v1720_v30  ;;  %v1672_v61 = vsub.f32 %v6677_v45, %v1618_v22  ;;  %v2233_v49 = vpop.trf.xlu1  ;;  %1785 = vadd.xlane.f32.xlu0 %v1784_v13  ;;  %v1690_v30 = vmul.f32 1.442695, %v1655_v26 }
 0x5ce   : > { %v6780_v59 = vpop.eup %5282  ;;  %v1724_v19 = vmul.f32 1.442695, %v1672_v61 }
 0x5cf   : > { %v1624_v32 = vpop.xlane.xlu0 %1623  ;;  %1632 = vmax.xlane.f32.xlu1 %v1631_v21  ;;  %v1790_v12 = vsel %vm1555_vm0, %v6780_v59, 0.0 }
 0x5d0   : > { %5288 = vpow2.f32 %v1724_v19  ;;  %v1674_v60 = vsub.f32 %v6675_v41, %v1624_v32  ;;  %v2234_v45 = vpop.trf.xlu1  ;;  %1791 = vadd.xlane.f32.xlu0 %v1790_v12 }
 0x5d1   : > { %5290 = vpow2.f32 %v1686_v55  ;;  %v2249_v58 = vpack.c.bf16 %v2234_v45, %v2233_v49  ;;  %v1643_v55 = vsel %vm1555_vm0, %v6707_v25, -inf }
 0x5d2   : > { %v6787_v36 = vpop.eup %5284  ;;  %v1728_v6 = vmul.f32 1.442695, %v1674_v60 }
 0x5d3   : > { %4885 = vmatprep.subr.bf16.mxu0 %v2249_v58  ;;  %v1630_v22 = vpop.xlane.xlu0 %1629  ;;  %1638 = vmax.xlane.f32.xlu1 %v1637_v7  ;;  %v1796_v13 = vsel %vm1555_vm0, %v6787_v36, 0.0 }
 0x5d4   : > { %5292 = vpow2.f32 %v1728_v6  ;;  %v1676_v41 = vsub.f32 %v6689_v57, %v1630_v22  ;;  %4886 = vmatpush3.bf16.msra.mxu0 %v2249_v58  ;;  %v2235_v61 = vpop.trf.xlu1  ;;  %1797 = vadd.xlane.f32.xlu0 %v1796_v13 }
 0x5d5   : > { %5294 = vpow2.f32 %v1690_v30  ;;  %v1649_v30 = vsel %vm1555_vm0, %v6703_v11, -inf }
 0x5d6   : > { %v6794_v49 = vpop.eup %5286  ;;  %v1732_v26 = vmul.f32 1.442695, %v1676_v41 }
 0x5d7   : > { %v1636_v19 = vpop.xlane.xlu0 %1635  ;;  %1644 = vmax.xlane.f32.xlu1 %v1643_v55  ;;  %v1802_v21 = vsel %vm1555_vm0, %v6794_v49, 0.0 }
 0x5d8   : > { %5296 = vpow2.f32 %v1732_v26  ;;  %v1678_v32 = vsub.f32 %v6687_v54, %v1636_v19  ;;  %v2236_v12 = vpop.trf.xlu1  ;;  %1803 = vadd.xlane.f32.xlu0 %v1802_v21 }
 0x5d9   : > { %v2250_v57 = vpack.c.bf16 %v2236_v12, %v2235_v61 }
 0x5da   : > { %v6801_v60 = vpop.eup %5288  ;;  %v1736_v45 = vmul.f32 1.442695, %v1678_v32 }
 0x5db   : > { %v6805_v58 = vpop.eup %5290  ;;  %4887 = vmatprep.subr.bf16.mxu0 %v2250_v57  ;;  %v1642_v6 = vpop.xlane.xlu0 %1641  ;;  %1650 = vmax.xlane.f32.xlu1 %v1649_v30  ;;  %v1808_v7 = vsel %vm1555_vm0, %v6801_v60, 0.0 }
 0x5dc   : > { %5298 = vpow2.f32 %v1736_v45  ;;  %v1680_v54 = vsub.f32 %v6701_v9, %v1642_v6  ;;  %4888 = vmatpush3.bf16.msra.mxu0 %v2250_v57  ;;  %v2237_v22 = vpop.trf.xlu1  ;;  %1809 = vadd.xlane.f32.xlu0 %v1808_v7  ;;  %v1751_v61 = vsel %vm1555_vm0, %v6805_v58, 0.0 }
 0x5de   : > { %v6810_v13 = vpop.eup %5292  ;;  %v1740_v41 = vmul.f32 1.442695, %v1680_v54 }
 0x5df   : > { %v6814_v26 = vpop.eup %5294  ;;  %v1648_v55 = vpop.xlane.xlu0 %1647  ;;  %1752 = vadd.xlane.f32.xlu1 %v1751_v61  ;;  %v1814_v19 = vsel %vm1555_vm0, %v6810_v13, 0.0 }
 0x5e0   : > { %5300 = vpow2.f32 %v1740_v41  ;;  %v1682_v21 = vsub.f32 %v6699_v5, %v1648_v55  ;;  %v2238_v9 = vpop.trf.xlu1  ;;  %1815 = vadd.xlane.f32.xlu0 %v1814_v19  ;;  %v1757_v45 = vsel %vm1555_vm0, %v6814_v26, 0.0 }
 0x5e1   : > { %v2251_v32 = vpack.c.bf16 %v2238_v9, %v2237_v22 }
 0x5e2   : > { %v6819_v12 = vpop.eup %5296  ;;  %v1744_v57 = vmul.f32 1.442695, %v1682_v21 }
 0x5e3   : > { %4889 = vmatprep.subr.bf16.mxu0 %v2251_v32  ;;  %1758 = vadd.xlane.f32.xlu1 %v1757_v45  ;;  %v1820_v30 = vsel %vm1555_vm0, %v6819_v12, 0.0 }
 0x5e4   : > { %5302 = vpow2.f32 %v1744_v57  ;;  %4890 = vmatpush3.bf16.msra.mxu0 %v2251_v32  ;;  %v2239_v6 = vpop.trf.xlu1  ;;  %1821 = vadd.xlane.f32.xlu0 %v1820_v30 }
 0x5e6   : > { %v6825_v7 = vpop.eup %5298 }
 0x5e7   : > { %v1826_v5 = vsel %vm1555_vm0, %v6825_v7, 0.0 }
 0x5e8   : > { %v2240_v54 = vpop.trf.xlu1  ;;  %1827 = vadd.xlane.f32.xlu0 %v1826_v5 }
 0x5e9   : > { %v2252_v22 = vpack.c.bf16 %v2240_v54, %v2239_v6 }
 0x5ea   : > { %v6829_v41 = vpop.eup %5300 }
 0x5eb   : > { %4891 = vmatprep.subr.bf16.mxu0 %v2252_v22  ;;  %v1832_v61 = vsel %vm1555_vm0, %v6829_v41, 0.0 }
 0x5ec   : > { %4892 = vmatpush3.bf16.msra.mxu0 %v2252_v22  ;;  %v2241_v55 = vpop.trf.xlu1  ;;  %1833 = vadd.xlane.f32.xlu0 %v1832_v61 }
 0x5ee   : > { %v6833_v19 = vpop.eup %5302 }
 0x5ef   : > { %v1838_v21 = vsel %vm1555_vm0, %v6833_v19, 0.0 }
 0x5f0   : > { %v2242_v9 = vpop.trf.xlu1  ;;  %1839 = vadd.xlane.f32.xlu0 %v1838_v21  ;;  %v2260_v21 = vmul.bf16 %v6551_v16, %v6547_v63  ;;  %v2266_v16 = vmul.bf16 %v6575_v35, %v6547_v63 }
 0x5f1   : > { %v2253_v32 = vpack.c.bf16 %v2242_v9, %v2241_v55  ;;  %v2259_v55 = vmul.bf16 %v6549_v15, %v6547_v63  ;;  %v2261_v9 = vmul.bf16 %v6557_v23, %v6547_v63  ;;  %v2265_v15 = vmul.bf16 %v6573_v34, %v6547_v63 }
 0x5f2   : > { %v2267_v23 = vmul.bf16 %v6581_v38, %v6547_v63  ;;  %v1659_v34 = vsub.f32 %v6629_v1, %v6723_v0  ;;  %v2271_v38 = vmul.bf16 %v6597_v47, %v6547_v63  ;;  %v2273_v47 = vmul.bf16 %v6605_v51, %v6547_v63 }
 0x5f3   : > { %4893 = vmatprep.subr.bf16.mxu0 %v2253_v32 }
 0x5f4   : > { %4894 = vmatpush3.bf16.msra.mxu0 %v2253_v32  ;;  %v2243_v57 = vpop.trf.xlu1  ;;  %v2262_v32 = vmul.bf16 %v6559_v24, %v6547_v63  ;;  %v2268_v24 = vmul.bf16 %v6583_v39, %v6547_v63  ;;  %v2272_v39 = vmul.bf16 %v6599_v48, %v6547_v63 }
 0x5f8   : > { %v2244_v45 = vpop.trf.xlu1 }
 0x5f9   : > { %v2254_v30 = vpack.c.bf16 %v2244_v45, %v2243_v57  ;;  %v2263_v57 = vmul.bf16 %v6565_v28, %v6547_v63  ;;  %v2269_v28 = vmul.bf16 %v6589_v43, %v6547_v63  ;;  %v1661_v43 = vsub.f32 %v6647_v10, %v6740_v53 }
 0x5fb   : > { %4895 = vmatprep.subr.bf16.mxu0 %v2254_v30  ;;  %v1702_v1 = vmul.f32 1.442695, %v1661_v43 }
 0x5fc   : > { %4896 = vmatpush3.bf16.msra.mxu0 %v2254_v30  ;;  %v2245_v6 = vpop.trf.xlu1  ;;  %v1698_v30 = vmul.f32 1.442695, %v1659_v34 }
 0x600   : > { %v2246_v5 = vpop.trf.xlu1 }
 0x601   : > { %v2255_v54 = vpack.c.bf16 %v2246_v5, %v2245_v6 }
 0x603   : > { %4897 = vmatprep.subr.bf16.mxu0 %v2255_v54 }
 0x604   : > { %4898 = vmatpush3.bf16.msra.mxu0 %v2255_v54  ;;  %v2247_v22 = vpop.trf.xlu1 }
 0x608   : > { %v2248_v61 = vpop.trf.xlu1 }
 0x609   : > { %v2256_v18 = vpack.c.bf16 %v2248_v61, %v2247_v22 }
 0x60b   : > { %4899 = vmatprep.subr.bf16.mxu0 %v2256_v18 }
 0x60c   : > { %4900 = vmatpush3.bf16.msra.mxu0 %v2256_v18  ;;  %v2264_v18 = vmul.bf16 %v6567_v29, %v6547_v63  ;;  %v2270_v29 = vmul.bf16 %v6591_v44, %v6547_v63 }
 0x60f   : > { %4902 = vmatmul.mubr.bf16.vlgmr.msra.gmra.mrb[40].mxu0 %v2259_v55 }
 0x610   : > { %4905 = vmatprep.mubr.bf16.mxu0 %v2260_v21 }
 0x617   : > { %4906 = vmatmul.mubr.bf16.gmra.mrb[44].mxu0 %v2261_v9 }
 0x618   : > { %4909 = vmatprep.mubr.bf16.mxu0 %v2262_v32 }
 0x61f   : > { %4910 = vmatmul.mubr.bf16.gmra.mrb[48].mxu0 %v2263_v57 }
 0x620   : > { %4913 = vmatprep.mubr.bf16.mxu0 %v2264_v18 }
 0x627   : > { %4914 = vmatmul.mubr.bf16.gmra.mrb[52].mxu0 %v2265_v15 }
 0x628   : > { %4917 = vmatprep.mubr.bf16.mxu0 %v2266_v16 }
 0x62f   : > { %4918 = vmatmul.mubr.bf16.gmra.mrb[56].mxu0 %v2267_v23 }
 0x630   : > { %4921 = vmatprep.mubr.bf16.mxu0 %v2268_v24 }
 0x637   : > { %4922 = vmatmul.mubr.bf16.gmra.mrb[60].mxu0 %v2269_v28 }
 0x638   : > { %4925 = vmatprep.mubr.bf16.mxu0 %v2270_v29 }
 0x63c   : > { %v1573_v35 = vpop.xlane.xlu1 %1572 }
 0x63d   : > { %v1657_v45 = vsub.f32 %v6633_v3, %v1573_v35 }
 0x63f   : > { %v1694_v6 = vmul.f32 1.442695, %v1657_v45  ;;  %4926 = vmatmul.mubr.bf16.gmra.mrb[64].mxu0 %v2271_v38 }
 0x640   : > { %4929 = vmatprep.mubr.bf16.mxu0 %v2272_v39  ;;  %v1591_v44 = vpop.xlane.xlu1 %1590 }
 0x641   : > { %5304 = vpow2.f32 %v1694_v6  ;;  %v1663_v0 = vsub.f32 %v6643_v8, %v1591_v44  ;;  %v1750_v44 = vpop.xlane.xlu0 %1749 }
 0x642   : > { %5306 = vpow2.f32 %v1698_v30 }
 0x643   : > { %5308 = vpow2.f32 %v1702_v1  ;;  %v1706_v5 = vmul.f32 1.442695, %v1663_v0 }
 0x644   : > { %v1597_v3 = vpop.xlane.xlu1 %1596 }
 0x645   : > { %v1665_v48 = vsub.f32 %v6659_v20, %v1597_v3  ;;  %5310 = vpow2.f32 %v1706_v5 }
 0x647   : > { %4930 = vmatmul.mubr.bf16.gmra.mrb[68].mxu0 %v2273_v47  ;;  %v1710_v53 = vmul.f32 1.442695, %v1665_v48 }
 0x648   : > { %v1603_v54 = vpop.xlane.xlu1 %1602 }
 0x649   : > { %v1667_v22 = vsub.f32 %v6655_v14, %v1603_v54  ;;  %5312 = vpow2.f32 %v1710_v53 }
 0x64b   : > { %v6874_v10 = vpop.eup %5304  ;;  %v1714_v63 = vmul.f32 1.442695, %v1667_v22 }
 0x64c   : > { %v1609_v61 = vpop.xlane.xlu1 %1608  ;;  %v1763_v8 = vsel %vm1555_vm0, %v6874_v10, 0.0  ;;  %v6879_v55 = vpop.eup %5306 }
 0x64d   : > { %1764 = vadd.xlane.f32.xlu1 %v1763_v8  ;;  %v1669_v51 = vsub.f32 %v6671_v37, %v1609_v61  ;;  %v1769_v21 = vsel %vm1555_vm0, %v6879_v55, 0.0  ;;  %v6884_v9 = vpop.eup %5308  ;;  %5314 = vpow2.f32 %v1714_v63 }
 0x64e   : > { %v1775_v18 = vsel %vm1555_vm0, %v6884_v9, 0.0 }
 0x64f   : > { %v1718_v14 = vmul.f32 1.442695, %v1669_v51  ;;  %v6889_v15 = vpop.eup %5310 }
 0x650   : > { %v1615_v20 = vpop.xlane.xlu1 %1614  ;;  %v1781_v24 = vsel %vm1555_vm0, %v6889_v15, 0.0 }
 0x651   : > { %1770 = vadd.xlane.f32.xlu1 %v1769_v21  ;;  %v1671_v32 = vsub.f32 %v6667_v31, %v1615_v20  ;;  %5316 = vpow2.f32 %v1718_v14 }
 0x653   : > { %v1722_v37 = vmul.f32 1.442695, %v1671_v32  ;;  %v6894_v28 = vpop.eup %5312 }
 0x654   : > { %v1621_v57 = vpop.xlane.xlu1 %1620  ;;  %v1787_v35 = vsel %vm1555_vm0, %v6894_v28, 0.0 }
 0x655   : > { %1776 = vadd.xlane.f32.xlu1 %v1775_v18  ;;  %v1673_v16 = vsub.f32 %v6683_v50, %v1621_v57  ;;  %5318 = vpow2.f32 %v1722_v37 }
 0x657   : > { %v1726_v31 = vmul.f32 1.442695, %v1673_v16  ;;  %v6899_v45 = vpop.eup %5314 }
 0x658   : > { %v1627_v23 = vpop.xlane.xlu1 %1626  ;;  %v1793_v30 = vsel %vm1555_vm0, %v6899_v45, 0.0 }
 0x659   : > { %1782 = vadd.xlane.f32.xlu1 %v1781_v24  ;;  %v1675_v29 = vsub.f32 %v6679_v46, %v1627_v23  ;;  %5320 = vpow2.f32 %v1726_v31 }
 0x65b   : > { %v1730_v50 = vmul.f32 1.442695, %v1675_v29  ;;  %v6904_v43 = vpop.eup %5316 }
 0x65c   : > { %v1633_v34 = vpop.xlane.xlu1 %1632  ;;  %v1799_v0 = vsel %vm1555_vm0, %v6904_v43, 0.0 }
 0x65d   : > { %1788 = vadd.xlane.f32.xlu1 %v1787_v35  ;;  %v1677_v38 = vsub.f32 %v6695_v2, %v1633_v34  ;;  %5322 = vpow2.f32 %v1730_v50 }
 0x65f   : > { %v1734_v46 = vmul.f32 1.442695, %v1677_v38  ;;  %v6909_v3 = vpop.eup %5318 }
 0x660   : > { %v1639_v39 = vpop.xlane.xlu1 %1638  ;;  %v1805_v48 = vsel %vm1555_vm0, %v6909_v3, 0.0 }
 0x661   : > { %1794 = vadd.xlane.f32.xlu1 %v1793_v30  ;;  %v1679_v6 = vsub.f32 %v6691_v33, %v1639_v39  ;;  %5324 = vpow2.f32 %v1734_v46  ;;  %v1756_v33 = vpop.xlane.xlu0 %1755 }
 0x663   : > { %v1738_v2 = vmul.f32 1.442695, %v1679_v6  ;;  %v6914_v54 = vpop.eup %5320 }
 0x664   : > { %v1645_v1 = vpop.xlane.xlu1 %1644  ;;  %v1811_v8 = vsel %vm1555_vm0, %v6914_v54, 0.0 }
 0x665   : > { %1800 = vadd.xlane.f32.xlu1 %v1799_v0  ;;  %v1681_v47 = vsub.f32 %v6707_v25, %v1645_v1  ;;  %5326 = vpow2.f32 %v1738_v2 }
 0x666   : > { %5328 = vrcp.f32 %v1750_v44 }
 0x667   : > { %v1742_v53 = vmul.f32 1.442695, %v1681_v47  ;;  %v6919_v63 = vpop.eup %5322  ;;  %5330 = vrcp.f32 %v1756_v33 }
 0x668   : > { %v1651_v5 = vpop.xlane.xlu1 %1650  ;;  %v1817_v20 = vsel %vm1555_vm0, %v6919_v63, 0.0 }
 0x669   : > { %1806 = vadd.xlane.f32.xlu1 %v1805_v48  ;;  %v1683_v22 = vsub.f32 %v6703_v11, %v1651_v5 }
 0x66b   : > { %v1746_v25 = vmul.f32 1.442695, %v1683_v22  ;;  %v6923_v21 = vpop.eup %5324 }
 0x66c   : > { %v1753_v61 = vpop.xlane.xlu1 %1752  ;;  %v1823_v11 = vsel %vm1555_vm0, %v6923_v21, 0.0 }
 0x66d   : > { %1812 = vadd.xlane.f32.xlu1 %v1811_v8  ;;  %5332 = vrcp.f32 %v1753_v61 }
 0x66e   : > { %5334 = vpow2.f32 %v1742_v53 }
 0x66f   : > { %v6927_v14 = vpop.eup %5326 }
 0x670   : > { %v1759_v51 = vpop.xlane.xlu1 %1758  ;;  %v5329_v32 = vpop.eup %5328  ;;  %v1829_v37 = vsel %vm1555_vm0, %v6927_v14, 0.0 }
 0x671   : > { %5336 = vrcp.f32 %v1759_v51  ;;  %1818 = vadd.xlane.f32.xlu1 %v1817_v20  ;;  %v5331_v57 = vpop.eup %5330  ;;  %v1876_v23 = vmul.f32 %v5329_v32, %v6725_v27 }
 0x672   : > { %5338 = vpow2.f32 %v1746_v25  ;;  %v1878_v34 = vmul.f32 %v5331_v57, %v6731_v56 }
 0x675   : > { %1824 = vadd.xlane.f32.xlu1 %v1823_v11 }
 0x677   : > { %v5333_v18 = vpop.eup %5332 }
 0x678   : > { %v6931_v16 = vpop.eup %5334  ;;  %v1877_v24 = vmul.f32 %v5333_v18, %v6805_v58  ;;  %v1762_v58 = vpop.xlane.xlu0 %1761 }
 0x679   : > { %1830 = vadd.xlane.f32.xlu1 %v1829_v37  ;;  %v1835_v50 = vsel %vm1555_vm0, %v6931_v16, 0.0  ;;  %5340 = vrcp.f32 %v1762_v58 }
 0x67a   : > { %v1908_v29 = vpack.c.bf16 %v1877_v24, %v1876_v23 }
 0x67b   : > { %v5337_v31 = vpop.eup %5336 }
 0x67c   : > { %v1879_v35 = vmul.f32 %v5337_v31, %v6814_v26  ;;  %v6939_v38 = vpop.eup %5338  ;;  %4853 = vmatprep.mubr.msk.bf16.mxu1 %vm1555_vm0, %v1908_v29  ;;  %v1768_v30 = vpop.xlane.xlu0 %1767 }
 0x67d   : > { %1836 = vadd.xlane.f32.xlu1 %v1835_v50  ;;  %v1841_v27 = vsel %vm1555_vm0, %v6939_v38, 0.0 }
 0x67e   : > { %v1909_v39 = vpack.c.bf16 %v1879_v35, %v1878_v34 }
 0x680   : > { %4854 = vmatmul.mubr.msk.bf16.vlgmr.msra.gmra.mrb[4].mxu1 %vm1555_vm0, %v1909_v39  ;;  %v1774_v56 = vpop.xlane.xlu0 %1773 }
 0x681   : > { %1842 = vadd.xlane.f32.xlu1 %v1841_v27 }
 0x683   : > { %v5341_v5 = vpop.eup %5340 }
 0x684   : > { %v1780_v46 = vpop.xlane.xlu0 %1779  ;;  %v1880_v20 = vmul.f32 %v5341_v5, %v6738_v17 }
 0x688   : > { %v1786_v26 = vpop.xlane.xlu0 %1785 }
 0x68c   : > { %v1792_v6 = vpop.xlane.xlu0 %1791 }
 0x690   : > { %v1798_v0 = vpop.xlane.xlu0 %1797 }
 0x694   : > { %v1804_v61 = vpop.xlane.xlu0 %1803 }
 0x698   : > { %v1810_v34 = vpop.xlane.xlu0 %1809 }
 0x6da   : > { %v1765_v44 = vpop.xlane.xlu1 %1764 }
 0x6db   : > { %5342 = vrcp.f32 %v1765_v44 }
 0x6dc   : > { %5344 = vrcp.f32 %v1768_v30 }
 0x6de   : > { %v1771_v1 = vpop.xlane.xlu1 %1770 }
 0x6df   : > { %5346 = vrcp.f32 %v1771_v1 }
 0x6e0   : > { %5348 = vrcp.f32 %v1774_v56 }
 0x6e2   : > { %v6945_v2 = vpop.f32.mrb[40].mxu0  ;;  %v1777_v47 = vpop.xlane.xlu1 %1776 }
 0x6e3   : > { %5350 = vrcp.f32 %v1777_v47  ;;  %v6947_v48 = vpop.f32.mrb[41].mxu0  ;;  %v2441_v57 = vsel %vm1555_vm0, %v6945_v2, -inf  ;;  %v1816_v47 = vpop.xlane.xlu0 %1815 }
 0x6e4   : > { %v6949_v33 = vpop.f32.mrb[42].mxu0  ;;  %v2435_v53 = vsel %vm1555_vm0, %v6947_v48, -inf  ;;  %5352 = vrcp.f32 %v1780_v46 }
 0x6e5   : > { %v5343_v22 = vpop.eup %5342  ;;  %2436 = vmax.xlane.f32.xlu0 %v2435_v53  ;;  %v6953_v8 = vpop.f32.mrb[43].mxu0  ;;  %v2444_v17 = vsel %vm1555_vm0, %v6949_v33, -inf }
 0x6e6   : > { %v1783_v25 = vpop.xlane.xlu1 %1782  ;;  %v2438_v51 = vsel %vm1555_vm0, %v6953_v8, -inf  ;;  %v1881_v11 = vmul.f32 %v5343_v22, %v6874_v10  ;;  %v5345_v32 = vpop.eup %5344 }
 0x6e7   : > { %5354 = vrcp.f32 %v1783_v25  ;;  %2439 = vmax.xlane.f32.xlu1 %v2438_v51  ;;  %v1882_v10 = vmul.f32 %v5345_v32, %v6746_v40 }
 0x6e8   : > { %v1910_v18 = vpack.c.bf16 %v1881_v11, %v1880_v20  ;;  %5356 = vrcp.f32 %v1786_v26 }
 0x6e9   : > { %v5347_v37 = vpop.eup %5346  ;;  %2442 = vmax.xlane.f32.xlu0 %v2441_v57 }
 0x6ea   : > { %4857 = vmatprep.mubr.msk.bf16.mxu1 %vm1555_vm0, %v1910_v18  ;;  %v6962_v23 = vpop.f32.mrb[44].mxu0  ;;  %v1789_v24 = vpop.xlane.xlu1 %1788  ;;  %v1883_v31 = vmul.f32 %v5347_v37, %v6879_v55 }
 0x6eb   : > { %v5349_v29 = vpop.eup %5348  ;;  %5358 = vrcp.f32 %v1789_v24  ;;  %v6968_v35 = vpop.f32.mrb[45].mxu0  ;;  %2445 = vmax.xlane.f32.xlu1 %v2444_v17  ;;  %v2453_v44 = vsel %vm1555_vm0, %v6962_v23, -inf }
 0x6ec   : > { %v6970_v50 = vpop.f32.mrb[46].mxu0  ;;  %v2447_v39 = vsel %vm1555_vm0, %v6968_v35, -inf  ;;  %v1911_v27 = vpack.c.bf16 %v1883_v31, %v1882_v10  ;;  %5360 = vrcp.f32 %v1792_v6  ;;  %v1884_v56 = vmul.f32 %v5349_v29, %v6754_v42  ;;  %v1822_v17 = vpop.xlane.xlu0 %1821 }
 0x6ed   : > { %v5351_v58 = vpop.eup %5350  ;;  %2448 = vmax.xlane.f32.xlu0 %v2447_v39  ;;  %v6974_v30 = vpop.f32.mrb[47].mxu0  ;;  %v2456_v42 = vsel %vm1555_vm0, %v6970_v50, -inf }
 0x6ee   : > { %4858 = vmatmul.mubr.msk.bf16.gmra.mrb[8].mxu1 %vm1555_vm0, %v1911_v27  ;;  %v1795_v40 = vpop.xlane.xlu1 %1794  ;;  %v2450_v55 = vsel %vm1555_vm0, %v6974_v30, -inf  ;;  %v1885_v46 = vmul.f32 %v5351_v58, %v6884_v9  ;;  %v5353_v26 = vpop.eup %5352 }
 0x6ef   : > { %5362 = vrcp.f32 %v1795_v40  ;;  %2451 = vmax.xlane.f32.xlu1 %v2450_v55  ;;  %v1886_v9 = vmul.f32 %v5353_v26, %v6764_v52 }
 0x6f0   : > { %v1912_v6 = vpack.c.bf16 %v1885_v46, %v1884_v56  ;;  %5364 = vrcp.f32 %v1798_v0  ;;  %v1828_v26 = vpop.xlane.xlu0 %1827 }
 0x6f1   : > { %v5355_v1 = vpop.eup %5354  ;;  %2454 = vmax.xlane.f32.xlu0 %v2453_v44 }
 0x6f2   : > { %4861 = vmatprep.mubr.msk.bf16.mxu1 %vm1555_vm0, %v1912_v6  ;;  %v6984_v5 = vpop.f32.mrb[48].mxu0  ;;  %v1801_v53 = vpop.xlane.xlu1 %1800  ;;  %v1887_v22 = vmul.f32 %v5355_v1, %v6889_v15 }
 0x6f3   : > { %v5357_v25 = vpop.eup %5356  ;;  %5366 = vrcp.f32 %v1801_v53  ;;  %v6990_v51 = vpop.f32.mrb[49].mxu0  ;;  %2457 = vmax.xlane.f32.xlu1 %v2456_v42 }
 0x6f4   : > { %v6992_v0 = vpop.f32.mrb[50].mxu0  ;;  %v2459_v20 = vsel %vm1555_vm0, %v6990_v51, -inf  ;;  %v1913_v11 = vpack.c.bf16 %v1887_v22, %v1886_v9  ;;  %5368 = vrcp.f32 %v1804_v61  ;;  %v1888_v18 = vmul.f32 %v5357_v25, %v6772_v4 }
 0x6f5   : > { %v5359_v32 = vpop.eup %5358  ;;  %2460 = vmax.xlane.f32.xlu0 %v2459_v20  ;;  %v6996_v57 = vpop.f32.mrb[51].mxu0  ;;  %v2465_v61 = vsel %vm1555_vm0, %v6984_v5, -inf  ;;  %v2468_v4 = vsel %vm1555_vm0, %v6992_v0, -inf }
 0x6f6   : > { %4862 = vmatmul.mubr.msk.bf16.gmra.mrb[12].mxu1 %vm1555_vm0, %v1913_v11  ;;  %v1807_v52 = vpop.xlane.xlu1 %1806  ;;  %v2462_v15 = vsel %vm1555_vm0, %v6996_v57, -inf  ;;  %v1889_v37 = vmul.f32 %v5359_v32, %v6894_v28  ;;  %v5361_v24 = vpop.eup %5360 }
 0x6f7   : > { %5370 = vrcp.f32 %v1807_v52  ;;  %2463 = vmax.xlane.f32.xlu1 %v2462_v15  ;;  %v1890_v28 = vmul.f32 %v5361_v24, %v6780_v59  ;;  %v1834_v32 = vpop.xlane.xlu0 %1833 }
 0x6f8   : > { %v1914_v10 = vpack.c.bf16 %v1889_v37, %v1888_v18  ;;  %5372 = vrcp.f32 %v1810_v34 }
 0x6f9   : > { %v5363_v31 = vpop.eup %5362  ;;  %2466 = vmax.xlane.f32.xlu0 %v2465_v61 }
 0x6fa   : > { %4865 = vmatprep.mubr.msk.bf16.mxu1 %vm1555_vm0, %v1914_v10  ;;  %v7006_v29 = vpop.f32.mrb[52].mxu0  ;;  %v1813_v39 = vpop.xlane.xlu1 %1812  ;;  %v1891_v27 = vmul.f32 %v5363_v31, %v6899_v45 }
 0x6fb   : > { %v5365_v58 = vpop.eup %5364  ;;  %5374 = vrcp.f32 %v1813_v39  ;;  %v7012_v40 = vpop.f32.mrb[53].mxu0  ;;  %2469 = vmax.xlane.f32.xlu1 %v2468_v4 }
 0x6fc   : > { %v7014_v55 = vpop.f32.mrb[54].mxu0  ;;  %v2471_v34 = vsel %vm1555_vm0, %v7012_v40, -inf  ;;  %v1915_v56 = vpack.c.bf16 %v1891_v27, %v1890_v28  ;;  %5376 = vrcp.f32 %v1816_v47  ;;  %v1892_v6 = vmul.f32 %v5365_v58, %v6787_v36  ;;  %v1840_v27 = vpop.xlane.xlu0 %1839 }
 0x6fd   : > { %v5367_v46 = vpop.eup %5366  ;;  %2472 = vmax.xlane.f32.xlu0 %v2471_v34  ;;  %v7018_v44 = vpop.f32.mrb[55].mxu0  ;;  %v2477_v47 = vsel %vm1555_vm0, %v7006_v29, -inf  ;;  %v2480_v36 = vsel %vm1555_vm0, %v7014_v55, -inf }
 0x6fe   : > { %4866 = vmatmul.mubr.msk.bf16.gmra.mrb[16].mxu1 %vm1555_vm0, %v1915_v56  ;;  %v1819_v59 = vpop.xlane.xlu1 %1818  ;;  %v2474_v45 = vsel %vm1555_vm0, %v7018_v44, -inf  ;;  %v1893_v1 = vmul.f32 %v5367_v46, %v6904_v43  ;;  %v5369_v53 = vpop.eup %5368 }
 0x6ff   : > { %5378 = vrcp.f32 %v1819_v59  ;;  %2475 = vmax.xlane.f32.xlu1 %v2474_v45  ;;  %v1894_v43 = vmul.f32 %v5369_v53, %v6794_v49 }
 0x700   : > { %v1916_v42 = vpack.c.bf16 %v1893_v1, %v1892_v6  ;;  %5380 = vrcp.f32 %v1822_v17 }
 0x701   : > { %v5371_v9 = vpop.eup %5370  ;;  %2478 = vmax.xlane.f32.xlu0 %v2477_v47 }
 0x702   : > { %4869 = vmatprep.mubr.msk.bf16.mxu1 %vm1555_vm0, %v1916_v42  ;;  %v7028_v22 = vpop.f32.mrb[56].mxu0  ;;  %v1825_v25 = vpop.xlane.xlu1 %1824  ;;  %v1895_v20 = vmul.f32 %v5371_v9, %v6909_v3 }
 0x703   : > { %v5373_v11 = vpop.eup %5372  ;;  %5382 = vrcp.f32 %v1825_v25  ;;  %v7034_v52 = vpop.f32.mrb[57].mxu0  ;;  %2481 = vmax.xlane.f32.xlu1 %v2480_v36  ;;  %v2489_v39 = vsel %vm1555_vm0, %v7028_v22, -inf }
 0x704   : > { %v7036_v15 = vpop.f32.mrb[58].mxu0  ;;  %v2483_v18 = vsel %vm1555_vm0, %v7034_v52, -inf  ;;  %v1917_v37 = vpack.c.bf16 %v1895_v20, %v1894_v43  ;;  %5384 = vrcp.f32 %v1828_v26  ;;  %v1896_v61 = vmul.f32 %v5373_v11, %v6801_v60 }
 0x705   : > { %v5375_v24 = vpop.eup %5374  ;;  %2484 = vmax.xlane.f32.xlu0 %v2483_v18  ;;  %v7040_v17 = vpop.f32.mrb[59].mxu0  ;;  %v2492_v60 = vsel %vm1555_vm0, %v7036_v15, -inf }
 0x706   : > { %4870 = vmatmul.mubr.msk.bf16.gmra.mrb[20].mxu1 %vm1555_vm0, %v1917_v37  ;;  %v1831_v49 = vpop.xlane.xlu1 %1830  ;;  %v2486_v3 = vsel %vm1555_vm0, %v7040_v17, -inf  ;;  %v1897_v10 = vmul.f32 %v5375_v24, %v6914_v54  ;;  %v5377_v31 = vpop.eup %5376 }
 0x707   : > { %5386 = vrcp.f32 %v1831_v49  ;;  %2487 = vmax.xlane.f32.xlu1 %v2486_v3  ;;  %v1898_v54 = vmul.f32 %v5377_v31, %v6810_v13 }
 0x708   : > { %v1918_v4 = vpack.c.bf16 %v1897_v10, %v1896_v61  ;;  %5388 = vrcp.f32 %v1834_v32 }
 0x709   : > { %v5379_v28 = vpop.eup %5378  ;;  %2490 = vmax.xlane.f32.xlu0 %v2489_v39 }
 0x70a   : > { %4873 = vmatprep.mubr.msk.bf16.mxu1 %vm1555_vm0, %v1918_v4  ;;  %v7050_v58 = vpop.f32.mrb[60].mxu0  ;;  %v1837_v34 = vpop.xlane.xlu1 %1836  ;;  %v1899_v56 = vmul.f32 %v5379_v28, %v6919_v63 }
 0x70b   : > { %v5381_v46 = vpop.eup %5380  ;;  %5390 = vrcp.f32 %v1837_v34  ;;  %v7056_v26 = vpop.f32.mrb[61].mxu0  ;;  %2493 = vmax.xlane.f32.xlu1 %v2492_v60  ;;  %v2501_v25 = vsel %vm1555_vm0, %v7050_v58, -inf }
 0x70c   : > { %v7058_v59 = vpop.f32.mrb[62].mxu0  ;;  %v2495_v45 = vsel %vm1555_vm0, %v7056_v26, -inf  ;;  %v1919_v6 = vpack.c.bf16 %v1899_v56, %v1898_v54  ;;  %5392 = vrcp.f32 %v1840_v27  ;;  %v1900_v47 = vmul.f32 %v5381_v46, %v6819_v12 }
 0x70d   : > { %v5383_v1 = vpop.eup %5382  ;;  %2496 = vmax.xlane.f32.xlu0 %v2495_v45  ;;  %v7062_v53 = vpop.f32.mrb[63].mxu0  ;;  %v2504_v11 = vsel %vm1555_vm0, %v7058_v59, -inf }
 0x70e   : > { %4874 = vmatmul.mubr.msk.bf16.gmra.mrb[24].mxu1 %vm1555_vm0, %v1919_v6  ;;  %v1843_v13 = vpop.xlane.xlu1 %1842  ;;  %v2498_v63 = vsel %vm1555_vm0, %v7062_v53, -inf  ;;  %v1901_v42 = vmul.f32 %v5383_v1, %v6923_v21  ;;  %v5385_v9 = vpop.eup %5384 }
 0x70f   : > { %5394 = vrcp.f32 %v1843_v13  ;;  %2499 = vmax.xlane.f32.xlu1 %v2498_v63  ;;  %v1902_v12 = vmul.f32 %v5385_v9, %v6825_v7 }
 0x710   : > { %v1920_v36 = vpack.c.bf16 %v1901_v42, %v1900_v47 }
 0x711   : > { %v5387_v43 = vpop.eup %5386  ;;  %2502 = vmax.xlane.f32.xlu0 %v2501_v25 }
 0x712   : > { %4877 = vmatprep.mubr.msk.bf16.mxu1 %vm1555_vm0, %v1920_v36  ;;  %v7072_v20 = vpop.f32.mrb[64].mxu0  ;;  %v1903_v21 = vmul.f32 %v5387_v43, %v6927_v14  ;;  %v5389_v32 = vpop.eup %5388 }
 0x713   : > { %v7078_v18 = vpop.f32.mrb[65].mxu0  ;;  %2505 = vmax.xlane.f32.xlu1 %v2504_v11  ;;  %v1904_v14 = vmul.f32 %v5389_v32, %v6829_v41  ;;  %v2513_v39 = vsel %vm1555_vm0, %v7072_v20, -inf }
 0x714   : > { %v7080_v37 = vpop.f32.mrb[66].mxu0  ;;  %v2507_v24 = vsel %vm1555_vm0, %v7078_v18, -inf  ;;  %v1921_v49 = vpack.c.bf16 %v1903_v21, %v1902_v12 }
 0x715   : > { %v5391_v3 = vpop.eup %5390  ;;  %2508 = vmax.xlane.f32.xlu0 %v2507_v24  ;;  %v7084_v61 = vpop.f32.mrb[67].mxu0  ;;  %v2516_v34 = vsel %vm1555_vm0, %v7080_v37, -inf }
 0x716   : > { %4878 = vmatmul.mubr.msk.bf16.gmra.mrb[28].mxu1 %vm1555_vm0, %v1921_v49  ;;  %v2510_v7 = vsel %vm1555_vm0, %v7084_v61, -inf  ;;  %v1905_v10 = vmul.f32 %v5391_v3, %v6931_v16  ;;  %v5393_v31 = vpop.eup %5392 }
 0x717   : > { %2511 = vmax.xlane.f32.xlu1 %v2510_v7  ;;  %v1906_v60 = vmul.f32 %v5393_v31, %v6833_v19 }
 0x718   : > { %v1922_v4 = vpack.c.bf16 %v1905_v10, %v1904_v14 }
 0x719   : > { %v5395_v28 = vpop.eup %5394  ;;  %2514 = vmax.xlane.f32.xlu0 %v2513_v39 }
 0x71a   : > { %4881 = vmatprep.mubr.msk.bf16.mxu1 %vm1555_vm0, %v1922_v4  ;;  %v7094_v27 = vpop.f32.mrb[68].mxu0  ;;  %v1907_v41 = vmul.f32 %v5395_v28, %v6939_v38 }
 0x71b   : > { %v7100_v16 = vpop.f32.mrb[69].mxu0  ;;  %2517 = vmax.xlane.f32.xlu1 %v2516_v34  ;;  %v2525_v19 = vsel %vm1555_vm0, %v7094_v27, -inf  ;;  %v7134_v34 = vld [vmem:[#allocation8 + $0x4] ss:$8 sps:$4 sm:$0xff]  }
 0x71c   : > { %v7102_v54 = vpop.f32.mrb[70].mxu0  ;;  %v2519_v56 = vsel %vm1555_vm0, %v7100_v16, -inf  ;;  %v1923_v46 = vpack.c.bf16 %v1907_v41, %v1906_v60 }
 0x71d   : > { %2520 = vmax.xlane.f32.xlu0 %v2519_v56  ;;  %v7106_v45 = vpop.f32.mrb[71].mxu0  ;;  %v2528_v38 = vsel %vm1555_vm0, %v7102_v54, -inf }
 0x71e   : > { %4882 = vmatmul.mubr.msk.bf16.gmra.mrb[32].mxu1 %vm1555_vm0, %v1923_v46  ;;  %v2522_v6 = vsel %vm1555_vm0, %v7106_v45, -inf }
 0x71f   : > { %2523 = vmax.xlane.f32.xlu1 %v2522_v6  ;;  %2207 = vmatprep.mubr.bf16.mxu1 %v7134_v34 }
 0x721   : > { %2526 = vmax.xlane.f32.xlu0 %v2525_v19 }
 0x723   : > { %2529 = vmax.xlane.f32.xlu1 %v2528_v38 }
 0x753   : > { %v7115_v1 = vpop.f32.mrb[4].mxu1 }
 0x754   : > { %v7117_v13 = vpop.f32.mrb[5].mxu1 }
 0x755   : > { %v7119_v63 = vpop.f32.mrb[6].mxu1 }
 0x756   : > { %v2134_v47 = vpack.c.bf16 %v7119_v63, %v7115_v1  ;;  %v7123_v42 = vpop.f32.mrb[7].mxu1 }
 0x757   : > { %v2133_v9 = vpack.c.bf16 %v7123_v42, %v7117_v13 }
 0x772   : > { %v2437_v25 = vpop.xlane.xlu0 %2436 }
 0x773   : > { %v2531_v36 = vsub.f32 %v6947_v48, %v2437_v25 }
 0x774   : > { %v2440_v43 = vpop.xlane.xlu1 %2439 }
 0x775   : > { %v2563_v11 = vmul.f32 1.442695, %v2531_v36  ;;  %v2532_v12 = vsub.f32 %v6953_v8, %v2440_v43 }
 0x776   : > { %v2443_v21 = vpop.xlane.xlu0 %2442 }
 0x777   : > { %5396 = vpow2.f32 %v2563_v11  ;;  %v2565_v32 = vmul.f32 1.442695, %v2532_v12  ;;  %v2533_v24 = vsub.f32 %v6945_v2, %v2443_v21 }
 0x778   : > { %v2446_v49 = vpop.xlane.xlu1 %2445 }
 0x779   : > { %5398 = vpow2.f32 %v2565_v32  ;;  %v2567_v3 = vmul.f32 1.442695, %v2533_v24  ;;  %v2534_v7 = vsub.f32 %v6949_v33, %v2446_v49 }
 0x77a   : > { %v2449_v14 = vpop.xlane.xlu0 %2448 }
 0x77b   : > { %5400 = vpow2.f32 %v2567_v3  ;;  %v2569_v10 = vmul.f32 1.442695, %v2534_v7  ;;  %v2535_v31 = vsub.f32 %v6968_v35, %v2449_v14 }
 0x77c   : > { %v2452_v48 = vpop.xlane.xlu1 %2451 }
 0x77d   : > { %5402 = vpow2.f32 %v2569_v10  ;;  %v2571_v39 = vmul.f32 1.442695, %v2535_v31  ;;  %v2536_v8 = vsub.f32 %v6974_v30, %v2452_v48 }
 0x77e   : > { %v2455_v4 = vpop.xlane.xlu0 %2454 }
 0x77f   : > { %5404 = vpow2.f32 %v2571_v39  ;;  %v2573_v28 = vmul.f32 1.442695, %v2536_v8  ;;  %v2537_v2 = vsub.f32 %v6962_v23, %v2455_v4 }
 0x780   : > { %v2458_v60 = vpop.xlane.xlu1 %2457 }
 0x781   : > { %v7136_v41 = vpop.eup %5396  ;;  %5406 = vpow2.f32 %v2573_v28  ;;  %v2575_v33 = vmul.f32 1.442695, %v2537_v2  ;;  %v2538_v56 = vsub.f32 %v6970_v50, %v2458_v60 }
 0x782   : > { %v2461_v35 = vpop.xlane.xlu0 %2460  ;;  %v2627_v30 = vsel %vm1555_vm0, %v7136_v41, 0.0 }
 0x783   : > { %v7142_v46 = vpop.eup %5398  ;;  %5408 = vpow2.f32 %v2575_v33  ;;  %v2577_v6 = vmul.f32 1.442695, %v2538_v56  ;;  %v2539_v23 = vsub.f32 %v6990_v51, %v2461_v35  ;;  %2628 = vadd.xlane.f32.xlu0 %v2627_v30 }
 0x784   : > { %v2464_v19 = vpop.xlane.xlu1 %2463  ;;  %v2630_v38 = vsel %vm1555_vm0, %v7142_v46, 0.0 }
 0x785   : > { %v7147_v25 = vpop.eup %5400  ;;  %5410 = vpow2.f32 %v2577_v6  ;;  %v2579_v50 = vmul.f32 1.442695, %v2539_v23  ;;  %v2540_v36 = vsub.f32 %v6996_v57, %v2464_v19  ;;  %2631 = vadd.xlane.f32.xlu1 %v2630_v38 }
 0x786   : > { %v2467_v43 = vpop.xlane.xlu0 %2466  ;;  %v2633_v11 = vsel %vm1555_vm0, %v7147_v25, 0.0 }
 0x787   : > { %v7152_v12 = vpop.eup %5402  ;;  %5412 = vpow2.f32 %v2579_v50  ;;  %v2581_v51 = vmul.f32 1.442695, %v2540_v36  ;;  %v2541_v21 = vsub.f32 %v6984_v5, %v2467_v43  ;;  %2634 = vadd.xlane.f32.xlu0 %v2633_v11 }
 0x788   : > { %v2470_v32 = vpop.xlane.xlu1 %2469  ;;  %v2636_v24 = vsel %vm1555_vm0, %v7152_v12, 0.0 }
 0x789   : > { %v7157_v49 = vpop.eup %5404  ;;  %5414 = vpow2.f32 %v2581_v51  ;;  %v2583_v57 = vmul.f32 1.442695, %v2541_v21  ;;  %v2542_v3 = vsub.f32 %v6992_v0, %v2470_v32  ;;  %2637 = vadd.xlane.f32.xlu1 %v2636_v24 }
 0x78a   : > { %v2473_v7 = vpop.xlane.xlu0 %2472  ;;  %v2639_v14 = vsel %vm1555_vm0, %v7157_v49, 0.0 }
 0x78b   : > { %v7162_v10 = vpop.eup %5406  ;;  %5416 = vpow2.f32 %v2583_v57  ;;  %v2585_v5 = vmul.f32 1.442695, %v2542_v3  ;;  %v2543_v31 = vsub.f32 %v7012_v40, %v2473_v7  ;;  %2640 = vadd.xlane.f32.xlu0 %v2639_v14 }
 0x78c   : > { %v2476_v48 = vpop.xlane.xlu1 %2475  ;;  %v2642_v39 = vsel %vm1555_vm0, %v7162_v10, 0.0 }
 0x78d   : > { %v7167_v8 = vpop.eup %5408  ;;  %5418 = vpow2.f32 %v2585_v5  ;;  %v2587_v0 = vmul.f32 1.442695, %v2543_v31  ;;  %v2544_v4 = vsub.f32 %v7018_v44, %v2476_v48  ;;  %2643 = vadd.xlane.f32.xlu1 %v2642_v39 }
 0x78e   : > { %v2479_v28 = vpop.xlane.xlu0 %2478  ;;  %v2645_v2 = vsel %vm1555_vm0, %v7167_v8, 0.0 }
 0x78f   : > { %v7172_v60 = vpop.eup %5410  ;;  %5420 = vpow2.f32 %v2587_v0  ;;  %v2589_v40 = vmul.f32 1.442695, %v2544_v4  ;;  %v2545_v33 = vsub.f32 %v7006_v29, %v2479_v28  ;;  %2646 = vadd.xlane.f32.xlu0 %v2645_v2 }
 0x790   : > { %v2482_v56 = vpop.xlane.xlu1 %2481  ;;  %v2648_v35 = vsel %vm1555_vm0, %v7172_v60, 0.0 }
 0x791   : > { %v7177_v30 = vpop.eup %5412  ;;  %5422 = vpow2.f32 %v2589_v40  ;;  %v2591_v44 = vmul.f32 1.442695, %v2545_v33  ;;  %v2546_v6 = vsub.f32 %v7014_v55, %v2482_v56  ;;  %2649 = vadd.xlane.f32.xlu1 %v2648_v35 }
 0x792   : > { %v2485_v23 = vpop.xlane.xlu0 %2484  ;;  %v2651_v19 = vsel %vm1555_vm0, %v7177_v30, 0.0 }
 0x793   : > { %v7182_v38 = vpop.eup %5414  ;;  %5424 = vpow2.f32 %v2591_v44  ;;  %v2593_v29 = vmul.f32 1.442695, %v2546_v6  ;;  %v2547_v50 = vsub.f32 %v7034_v52, %v2485_v23  ;;  %2652 = vadd.xlane.f32.xlu0 %v2651_v19 }
 0x794   : > { %v2488_v36 = vpop.xlane.xlu1 %2487  ;;  %v2654_v43 = vsel %vm1555_vm0, %v7182_v38, 0.0 }
 0x795   : > { %v7187_v11 = vpop.eup %5416  ;;  %5426 = vpow2.f32 %v2593_v29  ;;  %v2595_v55 = vmul.f32 1.442695, %v2547_v50  ;;  %v2548_v51 = vsub.f32 %v7040_v17, %v2488_v36  ;;  %2655 = vadd.xlane.f32.xlu1 %v2654_v43 }
 0x796   : > { %v2491_v21 = vpop.xlane.xlu0 %2490  ;;  %v2657_v32 = vsel %vm1555_vm0, %v7187_v11, 0.0 }
 0x797   : > { %v7192_v24 = vpop.eup %5418  ;;  %5428 = vpow2.f32 %v2595_v55  ;;  %v2597_v52 = vmul.f32 1.442695, %v2548_v51  ;;  %v2549_v57 = vsub.f32 %v7028_v22, %v2491_v21  ;;  %2658 = vadd.xlane.f32.xlu0 %v2657_v32 }
 0x798   : > { %v2494_v3 = vpop.xlane.xlu1 %2493  ;;  %v2660_v7 = vsel %vm1555_vm0, %v7192_v24, 0.0 }
 0x799   : > { %v7197_v14 = vpop.eup %5420  ;;  %5430 = vpow2.f32 %v2597_v52  ;;  %v2599_v17 = vmul.f32 1.442695, %v2549_v57  ;;  %v2550_v5 = vsub.f32 %v7036_v15, %v2494_v3  ;;  %2661 = vadd.xlane.f32.xlu1 %v2660_v7 }
 0x79a   : > { %v2497_v31 = vpop.xlane.xlu0 %2496  ;;  %v2663_v48 = vsel %vm1555_vm0, %v7197_v14, 0.0 }
 0x79b   : > { %v7202_v39 = vpop.eup %5422  ;;  %5432 = vpow2.f32 %v2599_v17  ;;  %v2601_v22 = vmul.f32 1.442695, %v2550_v5  ;;  %v2551_v0 = vsub.f32 %v7056_v26, %v2497_v31  ;;  %2664 = vadd.xlane.f32.xlu0 %v2663_v48 }
 0x79c   : > { %v2500_v4 = vpop.xlane.xlu1 %2499  ;;  %v2666_v28 = vsel %vm1555_vm0, %v7202_v39, 0.0 }
 0x79d   : > { %v7207_v2 = vpop.eup %5424  ;;  %5434 = vpow2.f32 %v2601_v22  ;;  %v2603_v15 = vmul.f32 1.442695, %v2551_v0  ;;  %v2552_v40 = vsub.f32 %v7062_v53, %v2500_v4  ;;  %2667 = vadd.xlane.f32.xlu1 %v2666_v28 }
 0x79e   : > { %v2503_v33 = vpop.xlane.xlu0 %2502  ;;  %v2669_v56 = vsel %vm1555_vm0, %v7207_v2, 0.0 }
 0x79f   : > { %v7212_v35 = vpop.eup %5426  ;;  %5436 = vpow2.f32 %v2603_v15  ;;  %v2605_v26 = vmul.f32 1.442695, %v2552_v40  ;;  %v2553_v44 = vsub.f32 %v7050_v58, %v2503_v33  ;;  %2670 = vadd.xlane.f32.xlu0 %v2669_v56 }
 0x7a0   : > { %v2506_v6 = vpop.xlane.xlu1 %2505  ;;  %v2672_v23 = vsel %vm1555_vm0, %v7212_v35, 0.0 }
 0x7a1   : > { %v7217_v19 = vpop.eup %5428  ;;  %5438 = vpow2.f32 %v2605_v26  ;;  %v2607_v53 = vmul.f32 1.442695, %v2553_v44  ;;  %v2554_v29 = vsub.f32 %v7058_v59, %v2506_v6  ;;  %2673 = vadd.xlane.f32.xlu1 %v2672_v23 }
 0x7a2   : > { %v2509_v50 = vpop.xlane.xlu0 %2508  ;;  %v2675_v36 = vsel %vm1555_vm0, %v7217_v19, 0.0 }
 0x7a3   : > { %v7222_v43 = vpop.eup %5430  ;;  %5440 = vpow2.f32 %v2607_v53  ;;  %v2609_v58 = vmul.f32 1.442695, %v2554_v29  ;;  %v2555_v55 = vsub.f32 %v7078_v18, %v2509_v50  ;;  %2676 = vadd.xlane.f32.xlu0 %v2675_v36 }
 0x7a4   : > { %v2512_v51 = vpop.xlane.xlu1 %2511  ;;  %v2678_v21 = vsel %vm1555_vm0, %v7222_v43, 0.0 }
 0x7a5   : > { %v7227_v32 = vpop.eup %5432  ;;  %5442 = vpow2.f32 %v2609_v58  ;;  %v2611_v59 = vmul.f32 1.442695, %v2555_v55  ;;  %v2556_v52 = vsub.f32 %v7084_v61, %v2512_v51  ;;  %2679 = vadd.xlane.f32.xlu1 %v2678_v21 }
 0x7a6   : > { %v2515_v57 = vpop.xlane.xlu0 %2514  ;;  %v2681_v3 = vsel %vm1555_vm0, %v7227_v32, 0.0 }
 0x7a7   : > { %v7232_v7 = vpop.eup %5434  ;;  %5444 = vpow2.f32 %v2611_v59  ;;  %v2613_v18 = vmul.f32 1.442695, %v2556_v52  ;;  %v2557_v17 = vsub.f32 %v7072_v20, %v2515_v57  ;;  %2682 = vadd.xlane.f32.xlu0 %v2681_v3 }
 0x7a8   : > { %v2518_v5 = vpop.xlane.xlu1 %2517  ;;  %v2684_v31 = vsel %vm1555_vm0, %v7232_v7, 0.0 }
 0x7a9   : > { %v7237_v48 = vpop.eup %5436  ;;  %5446 = vpow2.f32 %v2613_v18  ;;  %v2615_v61 = vmul.f32 1.442695, %v2557_v17  ;;  %v2558_v22 = vsub.f32 %v7080_v37, %v2518_v5  ;;  %2685 = vadd.xlane.f32.xlu1 %v2684_v31 }
 0x7aa   : > { %v2521_v0 = vpop.xlane.xlu0 %2520  ;;  %v2687_v4 = vsel %vm1555_vm0, %v7237_v48, 0.0 }
 0x7ab   : > { %v7242_v28 = vpop.eup %5438  ;;  %5448 = vpow2.f32 %v2615_v61  ;;  %v2617_v20 = vmul.f32 1.442695, %v2558_v22  ;;  %v2559_v15 = vsub.f32 %v7100_v16, %v2521_v0  ;;  %2688 = vadd.xlane.f32.xlu0 %v2687_v4 }
 0x7ac   : > { %v2524_v40 = vpop.xlane.xlu1 %2523  ;;  %v2690_v33 = vsel %vm1555_vm0, %v7242_v28, 0.0 }
 0x7ad   : > { %v7247_v56 = vpop.eup %5440  ;;  %5450 = vpow2.f32 %v2617_v20  ;;  %v2619_v37 = vmul.f32 1.442695, %v2559_v15  ;;  %v2560_v26 = vsub.f32 %v7106_v45, %v2524_v40  ;;  %2691 = vadd.xlane.f32.xlu1 %v2690_v33 }
 0x7ae   : > { %v2527_v44 = vpop.xlane.xlu0 %2526  ;;  %v2693_v6 = vsel %vm1555_vm0, %v7247_v56, 0.0 }
 0x7af   : > { %v7252_v23 = vpop.eup %5442  ;;  %5452 = vpow2.f32 %v2619_v37  ;;  %v2621_v16 = vmul.f32 1.442695, %v2560_v26  ;;  %v2561_v53 = vsub.f32 %v7094_v27, %v2527_v44  ;;  %2694 = vadd.xlane.f32.xlu0 %v2693_v6 }
 0x7b0   : > { %v2530_v29 = vpop.xlane.xlu1 %2529  ;;  %v2696_v50 = vsel %vm1555_vm0, %v7252_v23, 0.0 }
 0x7b1   : > { %v7257_v36 = vpop.eup %5444  ;;  %5454 = vpow2.f32 %v2621_v16  ;;  %v2623_v45 = vmul.f32 1.442695, %v2561_v53  ;;  %v2562_v58 = vsub.f32 %v7102_v54, %v2530_v29  ;;  %2697 = vadd.xlane.f32.xlu1 %v2696_v50 }
 0x7b2   : > { %v2699_v55 = vsel %vm1555_vm0, %v7257_v36, 0.0 }
 0x7b3   : > { %v7262_v51 = vpop.eup %5446  ;;  %5456 = vpow2.f32 %v2623_v45  ;;  %v2625_v21 = vmul.f32 1.442695, %v2562_v58  ;;  %2700 = vadd.xlane.f32.xlu0 %v2699_v55 }
 0x7b4   : > { %v2702_v27 = vsel %vm1555_vm0, %v7262_v51, 0.0 }
 0x7b5   : > { %v7266_v59 = vpop.eup %5448  ;;  %5458 = vpow2.f32 %v2625_v21  ;;  %2703 = vadd.xlane.f32.xlu1 %v2702_v27 }
 0x7b6   : > { %v2705_v52 = vsel %vm1555_vm0, %v7266_v59, 0.0 }
 0x7b7   : > { %v7270_v54 = vpop.eup %5450  ;;  %2706 = vadd.xlane.f32.xlu0 %v2705_v52 }
 0x7b8   : > { %v2708_v57 = vsel %vm1555_vm0, %v7270_v54, 0.0 }
 0x7b9   : > { %v7274_v3 = vpop.eup %5452  ;;  %2709 = vadd.xlane.f32.xlu1 %v2708_v57 }
 0x7ba   : > { %v2711_v18 = vsel %vm1555_vm0, %v7274_v3, 0.0 }
 0x7bb   : > { %v7278_v17 = vpop.eup %5454  ;;  %2712 = vadd.xlane.f32.xlu0 %v2711_v18 }
 0x7bc   : > { %v2714_v5 = vsel %vm1555_vm0, %v7278_v17, 0.0 }
 0x7bd   : > { %v7282_v31 = vpop.eup %5456  ;;  %2715 = vadd.xlane.f32.xlu1 %v2714_v5 }
 0x7be   : > { %v2717_v61 = vsel %vm1555_vm0, %v7282_v31, 0.0 }
 0x7bf   : > { %v7286_v22 = vpop.eup %5458  ;;  %2718 = vadd.xlane.f32.xlu0 %v2717_v61 }
 0x7c0   : > { %v2720_v0 = vsel %vm1555_vm0, %v7286_v22, 0.0 }
 0x7c1   : > { %v4859_v4 = vpop.f32.mrb[8].mxu1  ;;  %2721 = vadd.xlane.f32.xlu1 %v2720_v0 }
 0x7c2   : > { %v2022_v20 = vpop.f32.mrb[9].mxu1 }
 0x7c3   : > { %v4860_v15 = vpop.f32.mrb[10].mxu1 }
 0x7c4   : > { %v2136_v40 = vpack.c.bf16 %v4860_v15, %v4859_v4  ;;  %v2025_v33 = vpop.f32.mrb[11].mxu1  ;;  %v7308_v4 = vld [vmem:[#allocation6 + $0x40] sm:$0xff]  }
 0x7c5   : > { %v2135_v37 = vpack.c.bf16 %v2025_v33, %v2022_v20  ;;  %v7311_v15 = vld [vmem:[#allocation6] sm:$0xff]  }
 0x7c6   : > { %v2149_v33 = vmul.bf16 %v7311_v15, %v2133_v9 }
 0x7c9   : > { %v7290_v26 = vpop.f32.mrb[12].mxu1 }
 0x7ca   : > { %v2038_v44 = vpop.f32.mrb[13].mxu1 }
 0x7cb   : > { %v7292_v6 = vpop.f32.mrb[14].mxu1 }
 0x7cc   : > { %v2041_v53 = vpop.f32.mrb[15].mxu1 }
 0x7cd   : > { %v2137_v29 = vpack.c.bf16 %v2041_v53, %v2038_v44  ;;  %v7317_v44 = vld [vmem:[#allocation6 + $0x48] sm:$0xff]  }
 0x7d1   : > { %v7296_v50 = vpop.f32.mrb[16].mxu1 }
 0x7d2   : > { %v7298_v45 = vpop.f32.mrb[17].mxu1 }
 0x7d3   : > { %v7300_v58 = vpop.f32.mrb[18].mxu1 }
 0x7d4   : > { %v7304_v21 = vpop.f32.mrb[19].mxu1 }
 0x7d9   : > { %v4871_v52 = vpop.f32.mrb[20].mxu1 }
 0x7da   : > { %v2070_v57 = vpop.f32.mrb[21].mxu1 }
 0x7db   : > { %v4872_v18 = vpop.f32.mrb[22].mxu1 }
 0x7dc   : > { %v2142_v5 = vpack.c.bf16 %v4872_v18, %v4871_v52  ;;  %v2073_v61 = vpop.f32.mrb[23].mxu1  ;;  %v7320_v18 = vld [vmem:[#allocation6 + $0x8] sm:$0xff]  }
 0x7dd   : > { %v2141_v0 = vpack.c.bf16 %v2073_v61, %v2070_v57  ;;  %v2150_v61 = vmul.bf16 %v7320_v18, %v2134_v47  ;;  %v7335_v47 = vld [vmem:[#allocation6 + $0x18] sm:$0xff]  }
 0x7de   : > { %v2158_v53 = vmul.bf16 %v7317_v44, %v2142_v5 }
 0x7df   : > { %v2157_v20 = vmul.bf16 %v7308_v4, %v2141_v0  ;;  %v7326_v0 = vld [vmem:[#allocation6 + $0x50] sm:$0xff]  }
 0x7e1   : > { %v4875_v55 = vpop.f32.mrb[24].mxu1  ;;  %4632 = vmatprep.subr.bf16.mxu1 %v2157_v20  ;;  %v7329_v20 = vld [vmem:[#allocation6 + $0x10] sm:$0xff]  }
 0x7e2   : > { %v2086_v52 = vpop.f32.mrb[25].mxu1  ;;  %4633 = vmatpush3.bf16.msra.mxu1 %v2149_v33  ;;  %v2151_v33 = vmul.bf16 %v7329_v20, %v2135_v37 }
 0x7e3   : > { %v4876_v57 = vpop.f32.mrb[26].mxu1  ;;  %4634 = vmatprep.subr.bf16.mxu1 %v2158_v53  ;;  %v7332_v53 = vld [vmem:[#allocation6 + $0x58] sm:$0xff]  }
 0x7e4   : > { %v2144_v13 = vpack.c.bf16 %v4876_v57, %v4875_v55  ;;  %v2089_v42 = vpop.f32.mrb[27].mxu1  ;;  %7885 = vst [vmem:[#allocation34_spill] sm:$0xff] %v7332_v53  ;;  %v2152_v55 = vmul.bf16 %v7335_v47, %v2136_v40 }
 0x7e5   : > { %v2143_v9 = vpack.c.bf16 %v2089_v42, %v2086_v52  ;;  %v7338_v42 = vld [vmem:[#allocation6 + $0x60] sm:$0xff]  }
 0x7e6   : > { %4635 = vmatpush3.bf16.msra.mxu1 %v2150_v61  ;;  %v2160_v27 = vmul.bf16 %v7332_v53, %v2144_v13 }
 0x7e7   : > { %v2159_v5 = vmul.bf16 %v7326_v0, %v2143_v9  ;;  %v7341_v9 = vld [vmem:[#allocation6 + $0x20] sm:$0xff]  }
 0x7e8   : > { %v2153_v13 = vmul.bf16 %v7341_v9, %v2137_v29 }
 0x7e9   : > { %v4879_v16 = vpop.f32.mrb[28].mxu1  ;;  %4636 = vmatprep.subr.bf16.mxu1 %v2159_v5  ;;  %v7344_v5 = vld [vmem:[#allocation6 + $0x68] sm:$0xff]  }
 0x7ea   : > { %v2102_v1 = vpop.f32.mrb[29].mxu1  ;;  %4637 = vmatpush3.bf16.msra.mxu1 %v2151_v33  ;;  %7886 = vst [vmem:[#allocation35_spill] sm:$0xff] %v7344_v5 }
 0x7eb   : > { %v4880_v63 = vpop.f32.mrb[30].mxu1  ;;  %4638 = vmatprep.subr.bf16.mxu1 %v2160_v27 }
 0x7ec   : > { %v2146_v52 = vpack.c.bf16 %v4880_v63, %v4879_v16  ;;  %v2105_v57 = vpop.f32.mrb[31].mxu1  ;;  %v7347_v16 = vld [vmem:[#allocation6 + $0x28] sm:$0xff]  }
 0x7ed   : > { %v2145_v61 = vpack.c.bf16 %v2105_v57, %v2102_v1  ;;  %v7887_v1 = vpack.c.bf16 %v7292_v6, %v7290_v26  ;;  %v7365_v6 = vld [vmem:[#allocation6 + $0x38] sm:$0xff]  }
 0x7ee   : > { %4639 = vmatpush3.bf16.msra.mxu1 %v2152_v55  ;;  %v2162_v27 = vmul.bf16 %v7344_v5, %v2146_v52  ;;  %v7362_v5 = vld [vmem:[#allocation6 + $0x78] sm:$0xff]  }
 0x7ef   : > { %v2161_v37 = vmul.bf16 %v7338_v42, %v2145_v61  ;;  %v2154_v63 = vmul.bf16 %v7347_v16, %v7887_v1  ;;  %v7353_v61 = vld [vmem:[#allocation6 + $0x70] sm:$0xff]  }
 0x7f1   : > { %v4883_v33 = vpop.f32.mrb[32].mxu1  ;;  %4640 = vmatprep.subr.bf16.mxu1 %v2161_v37  ;;  %v7356_v37 = vld [vmem:[#allocation6 + $0x30] sm:$0xff]  }
 0x7f2   : > { %v2118_v53 = vpop.f32.mrb[33].mxu1  ;;  %4641 = vmatpush3.bf16.msra.mxu1 %v2153_v13  ;;  %v7888_v13 = vpack.c.bf16 %v7304_v21, %v7298_v45 }
 0x7f3   : > { %v4884_v40 = vpop.f32.mrb[34].mxu1  ;;  %4642 = vmatprep.subr.bf16.mxu1 %v2162_v27 }
 0x7f4   : > { %v2148_v55 = vpack.c.bf16 %v4884_v40, %v4883_v33  ;;  %v2121_v57 = vpop.f32.mrb[35].mxu1  ;;  %v2155_v27 = vmul.bf16 %v7356_v37, %v7888_v13  ;;  %v7371_v40 = vld [vmem:[#allocation8] ss:$8 sps:$4 sm:$0xff]  }
 0x7f5   : > { %v2147_v29 = vpack.c.bf16 %v2121_v57, %v2118_v53  ;;  %v7889_v53 = vpack.c.bf16 %v7300_v58, %v7296_v50 }
 0x7f6   : > { %4643 = vmatpush3.bf16.msra.mxu1 %v2154_v63  ;;  %v2164_v26 = vmul.bf16 %v7362_v5, %v2148_v55 }
 0x7f7   : > { %v2163_v52 = vmul.bf16 %v7353_v61, %v2147_v29  ;;  %v2156_v33 = vmul.bf16 %v7365_v6, %v7889_v53 }
 0x7f9   : > { %4644 = vmatprep.subr.bf16.mxu1 %v2163_v52 }
 0x7fa   : > { %4645 = vmatpush3.bf16.msra.mxu1 %v2155_v27 }
 0x7fb   : > { %4646 = vmatprep.subr.bf16.mxu1 %v2164_v26 }
 0x7fe   : > { %4647 = vmatpush3.bf16.msra.mxu1 %v2156_v33 }
 0x7ff   : > { %4933 = vmatprep.subr.bf16.mxu1 %v6545_v62 }
 0x801   : > { %2208 = vmatmul.mubr.bf16.vlgmr.msra.gmra.mrb[36].mxu1 %v7371_v40 }
 0x802   : > { %4934 = vmatpush3.bf16.msra.mxu1 %v6545_v62 }
 0x810   : > { %v2629_v45 = vpop.xlane.xlu0 %2628 }
 0x811   : > { %5460 = vrcp.f32 %v2629_v45 }
 0x812   : > { %v2632_v21 = vpop.xlane.xlu1 %2631 }
 0x813   : > { %5462 = vrcp.f32 %v2632_v21 }
 0x814   : > { %v2635_v1 = vpop.xlane.xlu0 %2634 }
 0x815   : > { %5464 = vrcp.f32 %v2635_v1 }
 0x816   : > { %v2638_v63 = vpop.xlane.xlu1 %2637 }
 0x817   : > { %5466 = vrcp.f32 %v2638_v63 }
 0x818   : > { %v2641_v50 = vpop.xlane.xlu0 %2640 }
 0x819   : > { %5468 = vrcp.f32 %v2641_v50 }
 0x81a   : > { %v2644_v58 = vpop.xlane.xlu1 %2643 }
 0x81b   : > { %v5461_v55 = vpop.eup %5460  ;;  %5470 = vrcp.f32 %v2644_v58 }
 0x81c   : > { %v2647_v57 = vpop.xlane.xlu0 %2646  ;;  %v2755_v13 = vmul.f32 %v5461_v55, %v7136_v41 }
 0x81d   : > { %v5463_v29 = vpop.eup %5462  ;;  %5472 = vrcp.f32 %v2647_v57 }
 0x81e   : > { %v2650_v52 = vpop.xlane.xlu1 %2649  ;;  %v2756_v62 = vmul.f32 %v5463_v29, %v7142_v46 }
 0x81f   : > { %v5465_v27 = vpop.eup %5464  ;;  %5474 = vrcp.f32 %v2650_v52 }
 0x820   : > { %v2653_v26 = vpop.xlane.xlu0 %2652  ;;  %v2787_v53 = vpack.c.bf16 %v2756_v62, %v2755_v13  ;;  %v2757_v45 = vmul.f32 %v5465_v27, %v7147_v25 }
 0x821   : > { %v5467_v33 = vpop.eup %5466  ;;  %5476 = vrcp.f32 %v2653_v26 }
 0x822   : > { %v2758_v21 = vmul.f32 %v5467_v33, %v7152_v12  ;;  %4935 = vmatprep.mubr.msk.bf16.mxu1 %vm1555_vm0, %v2787_v53  ;;  %v2656_v1 = vpop.xlane.xlu1 %2655 }
 0x823   : > { %v5469_v63 = vpop.eup %5468  ;;  %5478 = vrcp.f32 %v2656_v1 }
 0x824   : > { %v2659_v50 = vpop.xlane.xlu0 %2658  ;;  %v2788_v58 = vpack.c.bf16 %v2758_v21, %v2757_v45  ;;  %v2759_v55 = vmul.f32 %v5469_v63, %v7157_v49 }
 0x825   : > { %v5471_v41 = vpop.eup %5470  ;;  %5480 = vrcp.f32 %v2659_v50 }
 0x826   : > { %4936 = vmatmul.mubr.msk.bf16.vlgmr.msra.gmra.mrb[40].mxu1 %vm1555_vm0, %v2788_v58  ;;  %v2662_v46 = vpop.xlane.xlu1 %2661  ;;  %v2760_v57 = vmul.f32 %v5471_v41, %v7162_v10 }
 0x827   : > { %v5473_v29 = vpop.eup %5472  ;;  %5482 = vrcp.f32 %v2662_v46 }
 0x828   : > { %v2665_v25 = vpop.xlane.xlu0 %2664  ;;  %v2789_v12 = vpack.c.bf16 %v2760_v57, %v2759_v55  ;;  %v2761_v62 = vmul.f32 %v5473_v29, %v7167_v8 }
 0x829   : > { %v5475_v52 = vpop.eup %5474  ;;  %5484 = vrcp.f32 %v2665_v25 }
 0x82a   : > { %4939 = vmatprep.mubr.msk.bf16.mxu1 %vm1555_vm0, %v2789_v12  ;;  %v2668_v13 = vpop.xlane.xlu1 %2667  ;;  %v2762_v27 = vmul.f32 %v5475_v52, %v7172_v60 }
 0x82b   : > { %v5477_v26 = vpop.eup %5476  ;;  %5486 = vrcp.f32 %v2668_v13 }
 0x82c   : > { %v2671_v53 = vpop.xlane.xlu0 %2670  ;;  %v2790_v33 = vpack.c.bf16 %v2762_v27, %v2761_v62  ;;  %v2763_v45 = vmul.f32 %v5477_v26, %v7177_v30 }
 0x82d   : > { %v5479_v49 = vpop.eup %5478  ;;  %5488 = vrcp.f32 %v2671_v53 }
 0x82e   : > { %4940 = vmatmul.mubr.msk.bf16.gmra.mrb[44].mxu1 %vm1555_vm0, %v2790_v33  ;;  %v2674_v10 = vpop.xlane.xlu1 %2673  ;;  %v2764_v21 = vmul.f32 %v5479_v49, %v7182_v38 }
 0x82f   : > { %v5481_v1 = vpop.eup %5480  ;;  %5490 = vrcp.f32 %v2674_v10 }
 0x830   : > { %v2677_v63 = vpop.xlane.xlu0 %2676  ;;  %v2791_v50 = vpack.c.bf16 %v2764_v21, %v2763_v45  ;;  %v2765_v58 = vmul.f32 %v5481_v1, %v7187_v11 }
 0x831   : > { %v5483_v8 = vpop.eup %5482  ;;  %5492 = vrcp.f32 %v2677_v63 }
 0x832   : > { %4943 = vmatprep.mubr.msk.bf16.mxu1 %vm1555_vm0, %v2791_v50  ;;  %v2680_v60 = vpop.xlane.xlu1 %2679  ;;  %v2766_v41 = vmul.f32 %v5483_v8, %v7192_v24 }
 0x833   : > { %v5485_v46 = vpop.eup %5484  ;;  %5494 = vrcp.f32 %v2680_v60 }
 0x834   : > { %v2683_v55 = vpop.xlane.xlu0 %2682  ;;  %v2792_v57 = vpack.c.bf16 %v2766_v41, %v2765_v58  ;;  %v2767_v29 = vmul.f32 %v5485_v46, %v7197_v14 }
 0x835   : > { %v5487_v30 = vpop.eup %5486  ;;  %5496 = vrcp.f32 %v2683_v55 }
 0x836   : > { %4944 = vmatmul.mubr.msk.bf16.gmra.mrb[48].mxu1 %vm1555_vm0, %v2792_v57  ;;  %v2686_v38 = vpop.xlane.xlu1 %2685  ;;  %v2768_v25 = vmul.f32 %v5487_v30, %v7202_v39 }
 0x837   : > { %v5489_v12 = vpop.eup %5488  ;;  %5498 = vrcp.f32 %v2686_v38 }
 0x838   : > { %v2689_v52 = vpop.xlane.xlu0 %2688  ;;  %v2793_v13 = vpack.c.bf16 %v2768_v25, %v2767_v29  ;;  %v2769_v62 = vmul.f32 %v5489_v12, %v7207_v2 }
 0x839   : > { %v5491_v11 = vpop.eup %5490  ;;  %5500 = vrcp.f32 %v2689_v52 }
 0x83a   : > { %4947 = vmatprep.mubr.msk.bf16.mxu1 %vm1555_vm0, %v2793_v13  ;;  %v2692_v24 = vpop.xlane.xlu1 %2691  ;;  %v2770_v27 = vmul.f32 %v5491_v11, %v7212_v35 }
 0x83b   : > { %v5493_v26 = vpop.eup %5492  ;;  %5502 = vrcp.f32 %v2692_v24 }
 0x83c   : > { %v2695_v53 = vpop.xlane.xlu0 %2694  ;;  %v2794_v33 = vpack.c.bf16 %v2770_v27, %v2769_v62  ;;  %v2771_v49 = vmul.f32 %v5493_v26, %v7217_v19 }
 0x83d   : > { %v5495_v14 = vpop.eup %5494  ;;  %5504 = vrcp.f32 %v2695_v53 }
 0x83e   : > { %4948 = vmatmul.mubr.msk.bf16.gmra.mrb[52].mxu1 %vm1555_vm0, %v2794_v33  ;;  %v2698_v39 = vpop.xlane.xlu1 %2697  ;;  %v2772_v10 = vmul.f32 %v5495_v14, %v7222_v43 }
 0x83f   : > { %v5497_v45 = vpop.eup %5496  ;;  %5506 = vrcp.f32 %v2698_v39 }
 0x840   : > { %v2701_v21 = vpop.xlane.xlu0 %2700  ;;  %v2795_v1 = vpack.c.bf16 %v2772_v10, %v2771_v49  ;;  %v2773_v63 = vmul.f32 %v5497_v45, %v7227_v32  ;;  %v5173_v45 = vld [vmem:[%s6436_s24 + $0x8] sm:$0xff]  }
 0x841   : > { %v5499_v2 = vpop.eup %5498  ;;  %5508 = vrcp.f32 %v2701_v21  ;;  %v5175_v21 = vld [vmem:[%s6436_s24 + $0x18] sm:$0xff]  }
 0x842   : > { %4951 = vmatprep.mubr.msk.bf16.mxu1 %vm1555_vm0, %v2795_v1  ;;  %v2704_v35 = vpop.xlane.xlu1 %2703  ;;  %v2774_v50 = vmul.f32 %v5499_v2, %v7232_v7 }
 0x843   : > { %v5501_v8 = vpop.eup %5500  ;;  %5510 = vrcp.f32 %v2704_v35 }
 0x844   : > { %v2707_v60 = vpop.xlane.xlu0 %2706  ;;  %v2796_v58 = vpack.c.bf16 %v2774_v50, %v2773_v63  ;;  %v2775_v41 = vmul.f32 %v5501_v8, %v7237_v48 }
 0x845   : > { %v5503_v19 = vpop.eup %5502  ;;  %5512 = vrcp.f32 %v2707_v60 }
 0x846   : > { %4952 = vmatmul.mubr.msk.bf16.gmra.mrb[56].mxu1 %vm1555_vm0, %v2796_v58  ;;  %v2710_v43 = vpop.xlane.xlu1 %2709  ;;  %v2776_v46 = vmul.f32 %v5503_v19, %v7242_v28 }
 0x847   : > { %v5505_v55 = vpop.eup %5504  ;;  %5514 = vrcp.f32 %v2710_v43 }
 0x848   : > { %v2713_v57 = vpop.xlane.xlu0 %2712  ;;  %v2797_v30 = vpack.c.bf16 %v2776_v46, %v2775_v41  ;;  %v2777_v38 = vmul.f32 %v5505_v55, %v7247_v56 }
 0x849   : > { %v5507_v32 = vpop.eup %5506  ;;  %5516 = vrcp.f32 %v2713_v57 }
 0x84a   : > { %4955 = vmatprep.mubr.msk.bf16.mxu1 %vm1555_vm0, %v2797_v30  ;;  %v2716_v7 = vpop.xlane.xlu1 %2715  ;;  %v2778_v29 = vmul.f32 %v5507_v32, %v7252_v23 }
 0x84b   : > { %v5509_v25 = vpop.eup %5508  ;;  %5518 = vrcp.f32 %v2716_v7 }
 0x84c   : > { %v2719_v12 = vpop.xlane.xlu0 %2718  ;;  %v2798_v52 = vpack.c.bf16 %v2778_v29, %v2777_v38  ;;  %v2779_v13 = vmul.f32 %v5509_v25, %v7257_v36 }
 0x84d   : > { %v5511_v48 = vpop.eup %5510  ;;  %5520 = vrcp.f32 %v2719_v12 }
 0x84e   : > { %4956 = vmatmul.mubr.msk.bf16.gmra.mrb[60].mxu1 %vm1555_vm0, %v2798_v52  ;;  %v2722_v28 = vpop.xlane.xlu1 %2721  ;;  %v2780_v11 = vmul.f32 %v5511_v48, %v7262_v51 }
 0x84f   : > { %v5513_v24 = vpop.eup %5512  ;;  %5522 = vrcp.f32 %v2722_v28 }
 0x850   : > { %v2799_v62 = vpack.c.bf16 %v2780_v11, %v2779_v13  ;;  %v2781_v56 = vmul.f32 %v5513_v24, %v7266_v59 }
 0x851   : > { %v5515_v27 = vpop.eup %5514 }
 0x852   : > { %4959 = vmatprep.mubr.msk.bf16.mxu1 %vm1555_vm0, %v2799_v62  ;;  %v2782_v23 = vmul.f32 %v5515_v27, %v7270_v54 }
 0x853   : > { %v5517_v26 = vpop.eup %5516 }
 0x854   : > { %v2800_v53 = vpack.c.bf16 %v2782_v23, %v2781_v56  ;;  %v2783_v36 = vmul.f32 %v5517_v26, %v7274_v3  ;;  %v5172_v3 = vld [vmem:[%s6436_s24] sm:$0xff]  }
 0x855   : > { %v5519_v33 = vpop.eup %5518  ;;  %4967 = vmatprep.subr.bf16.mxu0 %v5172_v3 }
 0x856   : > { %4960 = vmatmul.mubr.msk.bf16.gmra.mrb[64].mxu1 %vm1555_vm0, %v2800_v53  ;;  %v2784_v51 = vmul.f32 %v5519_v33, %v7278_v17  ;;  %4968 = vmatpush3.bf16.msra.mxu0 %v5172_v3  ;;  %v5174_v17 = vld [vmem:[%s6436_s24 + $0x10] sm:$0xff]  }
 0x857   : > { %v5521_v14 = vpop.eup %5520  ;;  %4969 = vmatprep.subr.bf16.mxu0 %v5173_v45 }
 0x858   : > { %v2801_v39 = vpack.c.bf16 %v2784_v51, %v2783_v36  ;;  %v2785_v59 = vmul.f32 %v5521_v14, %v7282_v31  ;;  %v5176_v31 = vld [vmem:[%s6436_s24 + $0x20] sm:$0xff]  }
 0x859   : > { %v5523_v49 = vpop.eup %5522 }
 0x85a   : > { %4963 = vmatprep.mubr.msk.bf16.mxu1 %vm1555_vm0, %v2801_v39  ;;  %v2786_v54 = vmul.f32 %v5523_v49, %v7286_v22  ;;  %4970 = vmatpush3.bf16.msra.mxu0 %v5173_v45  ;;  %v5177_v22 = vld [vmem:[%s6436_s24 + $0x28] sm:$0xff]  }
 0x85b   : > { %4971 = vmatprep.subr.bf16.mxu0 %v5174_v17 }
 0x85c   : > { %v2802_v10 = vpack.c.bf16 %v2786_v54, %v2785_v59 }
 0x85e   : > { %4964 = vmatmul.mubr.msk.bf16.gmra.mrb[68].mxu1 %vm1555_vm0, %v2802_v10  ;;  %4972 = vmatpush3.bf16.msra.mxu0 %v5174_v17 }
 0x85f   : > { %3076 = vmatprep.mubr.bf16.mxu1 %v7134_v34  ;;  %4973 = vmatprep.subr.bf16.mxu0 %v5175_v21 }
 0x862   : > { %4974 = vmatpush3.bf16.msra.mxu0 %v5175_v21 }
 0x863   : > { %4975 = vmatprep.subr.bf16.mxu0 %v5176_v31 }
 0x866   : > { %4976 = vmatpush3.bf16.msra.mxu0 %v5176_v31 }
 0x867   : > { %4977 = vmatprep.subr.bf16.mxu0 %v5177_v22 }
 0x86a   : > { %4978 = vmatpush3.bf16.msra.mxu0 %v5177_v22  ;;  %v7890_v22 = vld [vmem:[#allocation34_spill] sm:$0xff] }
 0x8d4   : > { %v4648_v1 = vpop.f32.mrb[36].mxu1 }
 0x8d5   : > { %v4649_v2 = vpop.f32.mrb[37].mxu1 }
 0x8d6   : > { %v4650_v34 = vadd.f32 %v4649_v2, %v4648_v1  ;;  %v4651_v35 = vpop.f32.mrb[38].mxu1 }
 0x8d7   : > { %v4652_v63 = vpop.f32.mrb[39].mxu1 }
 0x8d8   : > { %v4653_v50 = vadd.f32 %v4652_v63, %v4651_v35 }
 0x8da   : > { %v3085_v8 = vpack.c.bf16 %v4653_v50, %v4650_v34 }
 0x8dc   : > { %4983 = vmatprep.mubr.bf16.mxu0 %v3085_v8  ;;  %v7891_v8 = vld [vmem:[#allocation35_spill] sm:$0xff] }
 0x8f9   : > { %v4937_v60 = vpop.f32.mrb[40].mxu1 }
 0x8fa   : > { %v2885_v58 = vpop.f32.mrb[41].mxu1 }
 0x8fb   : > { %v4938_v19 = vpop.f32.mrb[42].mxu1 }
 0x8fc   : > { %v3013_v43 = vpack.c.bf16 %v4938_v19, %v4937_v60  ;;  %v2888_v41 = vpop.f32.mrb[43].mxu1 }
 0x8fd   : > { %v3012_v46 = vpack.c.bf16 %v2888_v41, %v2885_v58 }
 0x8fe   : > { %v3029_v3 = vmul.bf16 %v7320_v18, %v3013_v43 }
 0x8ff   : > { %v3028_v39 = vmul.bf16 %v7311_v15, %v3012_v46 }
 0x901   : > { %v4941_v55 = vpop.f32.mrb[44].mxu1 }
 0x902   : > { %v2901_v57 = vpop.f32.mrb[45].mxu1 }
 0x903   : > { %v4942_v30 = vpop.f32.mrb[46].mxu1 }
 0x904   : > { %v3015_v32 = vpack.c.bf16 %v4942_v30, %v4941_v55  ;;  %v2904_v7 = vpop.f32.mrb[47].mxu1  ;;  %v5178_v30 = vld [vmem:[%s6436_s24 + $0x30] sm:$0xff]  }
 0x905   : > { %v3014_v38 = vpack.c.bf16 %v2904_v7, %v2901_v57  ;;  %4979 = vmatprep.subr.bf16.mxu0 %v5178_v30 }
 0x906   : > { %v3031_v34 = vmul.bf16 %v7335_v47, %v3015_v32  ;;  %4980 = vmatpush3.bf16.msra.mxu0 %v5178_v30  ;;  %v5179_v32 = vld [vmem:[%s6436_s24 + $0x38] sm:$0xff]  }
 0x907   : > { %4981 = vmatprep.subr.bf16.mxu0 %v5179_v32  ;;  %v5215_v30 = vld [vmem:[%s6438_s1 + $0xac] ss:$16 sps:$4 sm:$0xff]  }
 0x909   : > { %v4945_v29 = vpop.f32.mrb[48].mxu1 }
 0x90a   : > { %v2917_v25 = vpop.f32.mrb[49].mxu1  ;;  %4982 = vmatpush3.bf16.msra.mxu0 %v5179_v32  ;;  %v5210_v32 = vld [vmem:[%s6438_s1 + $0xa0] ss:$16 sps:$4 sm:$0xff]  }
 0x90b   : > { %v4946_v12 = vpop.f32.mrb[50].mxu1 }
 0x90c   : > { %v3017_v52 = vpack.c.bf16 %v4946_v12, %v4945_v29  ;;  %v2920_v48 = vpop.f32.mrb[51].mxu1 }
 0x90d   : > { %v3016_v28 = vpack.c.bf16 %v2920_v48, %v2917_v25 }
 0x90e   : > { %v3033_v43 = vmul.bf16 %v7347_v16, %v3017_v52  ;;  %v7892_v16 = vmov 0  }
 0x911   : > { %v4949_v13 = vpop.f32.mrb[52].mxu1 }
 0x912   : > { %v2933_v11 = vpop.f32.mrb[53].mxu1 }
 0x913   : > { %v4950_v24 = vpop.f32.mrb[54].mxu1 }
 0x914   : > { %v3019_v62 = vpack.c.bf16 %v4950_v24, %v4949_v13  ;;  %v2936_v27 = vpop.f32.mrb[55].mxu1 }
 0x915   : > { %v3018_v56 = vpack.c.bf16 %v2936_v27, %v2933_v11  ;;  %v5580_v11 = vld [vmem:[#allocation2] sm:$0xff] }
 0x916   : > { %v3035_v57 = vmul.bf16 %v7365_v6, %v3019_v62  ;;  %v4497_v6 = vld [vmem:[%s826_s6] ss:$0 sm:$0xff] }
 0x919   : > { %v4953_v23 = vpop.f32.mrb[56].mxu1 }
 0x91a   : > { %v2949_v26 = vpop.f32.mrb[57].mxu1 }
 0x91b   : > { %v4954_v53 = vpop.f32.mrb[58].mxu1 }
 0x91c   : > { %v3021_v33 = vpack.c.bf16 %v4954_v53, %v4953_v23  ;;  %v2952_v36 = vpop.f32.mrb[59].mxu1 }
 0x91d   : > { %v3020_v51 = vpack.c.bf16 %v2952_v36, %v2949_v26  ;;  %v5582_v26 = vld [vmem:[#allocation2 + $0x10] sm:$0xff] }
 0x91e   : > { %v3037_v49 = vmul.bf16 %v7317_v44, %v3021_v33  ;;  %v5583_v33 = vld [vmem:[#allocation2 + $0x18] sm:$0xff] }
 0x91f   : > { %v3036_v14 = vmul.bf16 %v7308_v4, %v3020_v51  ;;  %v3030_v4 = vmul.bf16 %v7329_v20, %v3014_v38  ;;  %v5180_v51 = vld [vmem:[%s6438_s1] ss:$16 sps:$4 sm:$0xff]  }
 0x921   : > { %v4957_v59 = vpop.f32.mrb[60].mxu1  ;;  %4695 = vmatprep.subr.bf16.mxu1 %v3036_v14  ;;  %v5182_v14 = vld [vmem:[%s6438_s1 + $0x4] ss:$16 sps:$4 sm:$0xff]  }
 0x922   : > { %v2965_v54 = vpop.f32.mrb[61].mxu1  ;;  %4696 = vmatpush3.bf16.msra.mxu1 %v3028_v39  ;;  %v5183_v39 = vld [vmem:[%s6438_s1 + $0x8] ss:$16 sps:$4 sm:$0xff]  }
 0x923   : > { %v4958_v10 = vpop.f32.mrb[62].mxu1  ;;  %4697 = vmatprep.subr.bf16.mxu1 %v3037_v49  ;;  %v5185_v49 = vld [vmem:[%s6438_s1 + $0xc] ss:$16 sps:$4 sm:$0xff]  }
 0x924   : > { %v3023_v45 = vpack.c.bf16 %v4958_v10, %v4957_v59  ;;  %v2968_v17 = vpop.f32.mrb[63].mxu1  ;;  %v5188_v59 = vld [vmem:[%s6438_s1 + $0x24] ss:$16 sps:$4 sm:$0xff]   ;;  %3546 = vmatprep.subr.bf16.mxu0 %v5185_v49  ;;  %v5186_v10 = vld [vmem:[%s6438_s1 + $0x20] ss:$16 sps:$4 sm:$0xff]  }
 0x925   : > { %v3022_v21 = vpack.c.bf16 %v2968_v17, %v2965_v54  ;;  %v5191_v54 = vld [vmem:[%s6438_s1 + $0x2c] ss:$16 sps:$4 sm:$0xff]  }
 0x926   : > { %4698 = vmatpush3.bf16.msra.mxu1 %v3029_v3  ;;  %v3039_v15 = vmul.bf16 %v7890_v22, %v3023_v45  ;;  %v5189_v3 = vld [vmem:[%s6438_s1 + $0x28] ss:$16 sps:$4 sm:$0xff]  }
 0x927   : > { %v3038_v31 = vmul.bf16 %v7326_v0, %v3022_v21  ;;  %v3032_v0 = vmul.bf16 %v7341_v9, %v3016_v28  ;;  %v3034_v9 = vmul.bf16 %v7356_v37, %v3018_v56  ;;  %v5581_v56 = vld [vmem:[#allocation2 + $0x8] sm:$0xff] }
 0x929   : > { %v4961_v1 = vpop.f32.mrb[64].mxu1  ;;  %4699 = vmatprep.subr.bf16.mxu1 %v3038_v31 }
 0x92a   : > { %v2981_v44 = vpop.f32.mrb[65].mxu1  ;;  %4700 = vmatpush3.bf16.msra.mxu1 %v3030_v4 }
 0x92b   : > { %v4962_v2 = vpop.f32.mrb[66].mxu1  ;;  %4701 = vmatprep.subr.bf16.mxu1 %v3039_v15 }
 0x92c   : > { %v3025_v35 = vpack.c.bf16 %v4962_v2, %v4961_v1  ;;  %v2984_v18 = vpop.f32.mrb[67].mxu1 }
 0x92d   : > { %v3024_v63 = vpack.c.bf16 %v2984_v18, %v2981_v44 }
 0x92e   : > { %4702 = vmatpush3.bf16.msra.mxu1 %v3031_v34  ;;  %v3041_v20 = vmul.bf16 %v7891_v8, %v3025_v35  ;;  %v5194_v8 = vld [vmem:[%s6438_s1 + $0x44] ss:$16 sps:$4 sm:$0xff]  }
 0x92f   : > { %v3040_v50 = vmul.bf16 %v7338_v42, %v3024_v63 }
 0x931   : > { %v4965_v60 = vpop.f32.mrb[68].mxu1  ;;  %4703 = vmatprep.subr.bf16.mxu1 %v3040_v50 }
 0x932   : > { %v2997_v58 = vpop.f32.mrb[69].mxu1  ;;  %4704 = vmatpush3.bf16.msra.mxu1 %v3032_v0 }
 0x933   : > { %v4966_v19 = vpop.f32.mrb[70].mxu1  ;;  %4705 = vmatprep.subr.bf16.mxu1 %v3041_v20  ;;  %v5197_v20 = vld [vmem:[%s6438_s1 + $0x4c] ss:$16 sps:$4 sm:$0xff]  }
 0x934   : > { %v3027_v47 = vpack.c.bf16 %v4966_v19, %v4965_v60  ;;  %v3000_v41 = vpop.f32.mrb[71].mxu1  ;;  %v5192_v60 = vld [vmem:[%s6438_s1 + $0x40] ss:$16 sps:$4 sm:$0xff]   ;;  %v5200_v19 = vld [vmem:[%s6438_s1 + $0x64] ss:$16 sps:$4 sm:$0xff]  }
 0x935   : > { %v3026_v46 = vpack.c.bf16 %v3000_v41, %v2997_v58  ;;  %v5195_v58 = vld [vmem:[%s6438_s1 + $0x48] ss:$16 sps:$4 sm:$0xff]  }
 0x936   : > { %4706 = vmatpush3.bf16.msra.mxu1 %v3033_v43  ;;  %v3043_v55 = vmul.bf16 %v7362_v5, %v3027_v47  ;;  %v5203_v43 = vld [vmem:[%s6438_s1 + $0x6c] ss:$16 sps:$4 sm:$0xff]   ;;  %v5198_v47 = vld [vmem:[%s6438_s1 + $0x60] ss:$16 sps:$4 sm:$0xff]   ;;  %v5201_v41 = vld [vmem:[%s6438_s1 + $0x68] ss:$16 sps:$4 sm:$0xff]  }
 0x937   : > { %v3042_v42 = vmul.bf16 %v7353_v61, %v3026_v46  ;;  %v5206_v46 = vld [vmem:[%s6438_s1 + $0x84] ss:$16 sps:$4 sm:$0xff]  }
 0x939   : > { %4707 = vmatprep.subr.bf16.mxu1 %v3042_v42  ;;  %v5209_v42 = vld [vmem:[%s6438_s1 + $0x8c] ss:$16 sps:$4 sm:$0xff]  }
 0x93a   : > { %4708 = vmatpush3.bf16.msra.mxu1 %v3034_v9  ;;  %v5204_v9 = vld [vmem:[%s6438_s1 + $0x80] ss:$16 sps:$4 sm:$0xff]  }
 0x93b   : > { %4709 = vmatprep.subr.bf16.mxu1 %v3043_v55  ;;  %v5207_v55 = vld [vmem:[%s6438_s1 + $0x88] ss:$16 sps:$4 sm:$0xff]  }
 0x93e   : > { %4710 = vmatpush3.bf16.msra.mxu1 %v3035_v57  ;;  %v5212_v57 = vld [vmem:[%s6438_s1 + $0xa4] ss:$16 sps:$4 sm:$0xff]  }
 0x93f   : > { %3493 = vmatprep.subr.bf16.mxu1 %v5182_v14 }
 0x941   : > { %3077 = vmatmul.mubr.bf16.vlgmr.msra.gmra.mrb[72].mxu1 %v7371_v40 }
 0x942   : > { %3525 = vmatprep.mubr.bf16.mxu1 %v7892_v16  ;;  %3494 = vmatpush1.bf16.msra.mxu1 %v5180_v51 }
 0x943   : > { %3495 = vmatprep.subr.bf16.mxu1 %v5188_v59 }
 0x946   : > { %3496 = vmatpush1.bf16.msra.mxu1 %v5186_v10 }
 0x947   : > { %3497 = vmatprep.subr.bf16.mxu1 %v5194_v8  ;;  %v5231_v8 = vld [vmem:[%s6476_s11 + $0x80] sm:$0xff]  }
 0x94a   : > { %3498 = vmatpush1.bf16.msra.mxu1 %v5192_v60  ;;  %v5234_v60 = vld [vmem:[%s6476_s11 + $0x8] sm:$0xff]  }
 0x94b   : > { %3499 = vmatprep.subr.bf16.mxu1 %v5200_v19  ;;  %v5236_v19 = vld [vmem:[%s6476_s11 + $0x50] sm:$0xff]  }
 0x94e   : > { %3500 = vmatpush1.bf16.msra.mxu1 %v5198_v47  ;;  %v5238_v47 = vld [vmem:[%s6476_s11 + $0x10] sm:$0xff]  }
 0x94f   : > { %3501 = vmatprep.subr.bf16.mxu1 %v5206_v46  ;;  %v5240_v46 = vld [vmem:[%s6476_s11 + $0x58] sm:$0xff]  }
 0x952   : > { %3502 = vmatpush1.bf16.msra.mxu1 %v5204_v9  ;;  %v5242_v9 = vld [vmem:[%s6476_s11 + $0x18] sm:$0xff]  }
 0x953   : > { %3503 = vmatprep.subr.bf16.mxu1 %v5212_v57  ;;  %v5244_v57 = vld [vmem:[%s6476_s11 + $0x60] sm:$0xff]  }
 0x956   : > { %3504 = vmatpush1.bf16.msra.mxu1 %v5210_v32  ;;  %v5246_v32 = vld [vmem:[%s6476_s11 + $0x20] sm:$0xff]  }
 0xa14   : > { %v4711_v61 = vpop.f32.mrb[72].mxu1 }
 0xa15   : > { %v4712_v37 = vpop.f32.mrb[73].mxu1 }
 0xa16   : > { %v4713_v5 = vadd.f32 %v4712_v37, %v4711_v61  ;;  %v4714_v7 = vpop.f32.mrb[74].mxu1  ;;  %v5213_v61 = vld [vmem:[%s6438_s1 + $0xa8] ss:$16 sps:$4 sm:$0xff]   ;;  %v5216_v37 = vld [vmem:[%s6438_s1 + $0xc0] ss:$16 sps:$4 sm:$0xff]  }
 0xa17   : > { %v4715_v38 = vpop.f32.mrb[75].mxu1 }
 0xa18   : > { %v4716_v29 = vadd.f32 %v4715_v38, %v4714_v7  ;;  %v5219_v7 = vld [vmem:[%s6438_s1 + $0xc8] ss:$16 sps:$4 sm:$0xff]   ;;  %v5221_v38 = vld [vmem:[%s6438_s1 + $0xcc] ss:$16 sps:$4 sm:$0xff]  }
 0xa1a   : > { %v3086_v25 = vpack.c.bf16 %v4716_v29, %v4713_v5  ;;  %v5218_v5 = vld [vmem:[%s6438_s1 + $0xc4] ss:$16 sps:$4 sm:$0xff]  }
 0xa1b   : > { %v5224_v29 = vld [vmem:[%s6438_s1 + $0xe4] ss:$16 sps:$4 sm:$0xff]   ;;  %3505 = vmatprep.subr.bf16.mxu1 %v5218_v5  ;;  %v5249_v5 = vld [vmem:[%s6476_s11 + $0xe8] sm:$0xff]  }
 0xa1c   : > { %4984 = vmatmul.mubr.bf16.vlgmr.msra.gmra.mrb[72].mxu0 %v3086_v25  ;;  %v5227_v25 = vld [vmem:[%s6438_s1 + $0xec] ss:$16 sps:$4 sm:$0xff]   ;;  %3506 = vmatpush1.bf16.msra.mxu1 %v5216_v37 }
 0xa1d   : > { %3578 = vmatprep.mubr.bf16.mxu0 %v7892_v16  ;;  %3547 = vmatpush1.bf16.msra.mxu0 %v5183_v39  ;;  %v4506_v39 = vld [vmem:[%s829_s16] ss:$0 sm:$0xff] }
 0xa1e   : > { %3548 = vmatprep.subr.bf16.mxu0 %v5191_v54  ;;  %3507 = vmatprep.subr.bf16.mxu1 %v5224_v29  ;;  %v5248_v37 = vld [vmem:[%s6476_s11 + $0x68] sm:$0xff]   ;;  %v5252_v29 = vld [vmem:[%s6476_s11 + $0x70] sm:$0xff]  }
 0xa21   : > { %3549 = vmatpush1.bf16.msra.mxu0 %v5189_v3 }
 0xa22   : > { %3550 = vmatprep.subr.bf16.mxu0 %v5197_v20  ;;  %v5233_v20 = vld [vmem:[%s6476_s11 + $0xc8] sm:$0xff]  }
 0xa25   : > { %3551 = vmatpush1.bf16.msra.mxu0 %v5195_v58  ;;  %v5235_v58 = vld [vmem:[%s6476_s11 + $0x88] sm:$0xff]  }
 0xa26   : > { %3552 = vmatprep.subr.bf16.mxu0 %v5203_v43  ;;  %v5237_v43 = vld [vmem:[%s6476_s11 + $0xd0] sm:$0xff]  }
 0xa29   : > { %3553 = vmatpush1.bf16.msra.mxu0 %v5201_v41  ;;  %v5239_v41 = vld [vmem:[%s6476_s11 + $0x90] sm:$0xff]  }
 0xa2a   : > { %3554 = vmatprep.subr.bf16.mxu0 %v5209_v42  ;;  %v5241_v42 = vld [vmem:[%s6476_s11 + $0xd8] sm:$0xff]  }
 0xa2d   : > { %3555 = vmatpush1.bf16.msra.mxu0 %v5207_v55  ;;  %v5243_v55 = vld [vmem:[%s6476_s11 + $0x98] sm:$0xff]  }
 0xa2e   : > { %3556 = vmatprep.subr.bf16.mxu0 %v5215_v30  ;;  %v5245_v30 = vld [vmem:[%s6476_s11 + $0xe0] sm:$0xff]  }
 0xa31   : > { %3557 = vmatpush1.bf16.msra.mxu0 %v5213_v61  ;;  %v5247_v61 = vld [vmem:[%s6476_s11 + $0xa0] sm:$0xff]  }
 0xa32   : > { %3558 = vmatprep.subr.bf16.mxu0 %v5221_v38  ;;  %v5251_v38 = vld [vmem:[%s6476_s11 + $0xa8] sm:$0xff]  }
 0xa35   : > { %3559 = vmatpush1.bf16.msra.mxu0 %v5219_v7  ;;  %v5250_v7 = vld [vmem:[%s6476_s11 + $0x28] sm:$0xff]  }
 0xa36   : > { %3560 = vmatprep.subr.bf16.mxu0 %v5227_v25  ;;  %v5253_v25 = vld [vmem:[%s6476_s11 + $0xf0] sm:$0xff]  }
 0xaef   : > { %v4985_v40 = vpop.f32.mrb[72].mxu0 }
 0xaf0   : > { %v3192_v12 = vpop.f32.mrb[73].mxu0  ;;  %v3201_v13 = vadd.f32 %v4985_v40, %v4497_v6  ;;  %v5225_v40 = vld [vmem:[%s6438_s1 + $0xe8] ss:$16 sps:$4 sm:$0xff]  }
 0xaf1   : > { %v3193_v52 = vadd.f32 %v4497_v6, %v3192_v12  ;;  %v4986_v48 = vpop.f32.mrb[74].mxu0  ;;  %3561 = vmatpush1.bf16.msra.mxu0 %v5225_v40  ;;  %v5255_v40 = vld [vmem:[%s6476_s11 + $0xb0] sm:$0xff]  }
 0xaf2   : > { %v3195_v28 = vpop.f32.mrb[75].mxu0  ;;  %v3204_v27 = vadd.f32 %v4986_v48, %v4497_v6  ;;  %v7462_v53 = vadd.f32 %v5582_v26, %v3201_v13 }
 0xaf3   : > { %v7457_v24 = vadd.f32 %v5580_v11, %v3193_v52  ;;  %v3196_v62 = vadd.f32 %v4497_v6, %v3195_v28  ;;  %v5222_v6 = vld [vmem:[%s6438_s1 + $0xe0] ss:$16 sps:$4 sm:$0xff]  }
 0xaf4   : > { %v7465_v36 = vadd.f32 %v5583_v33, %v3204_v27  ;;  %3508 = vmatpush1.bf16.msra.mxu1 %v5222_v6  ;;  %v5254_v6 = vld [vmem:[%s6476_s11 + $0x30] sm:$0xff]  }
 0xaf5   : > { %v7459_v23 = vadd.f32 %v5581_v56, %v3196_v62  ;;  %3211 = vadd.xlane.f32.xlu0 %v7457_v24 }
 0xaf7   : > { %3213 = vadd.xlane.f32.xlu1 %v7459_v23 }
 0xaf9   : > { %3215 = vadd.xlane.f32.xlu0 %v7462_v53 }
 0xafb   : > { %3217 = vadd.xlane.f32.xlu1 %v7465_v36 }
 0xb82   : > { %v3212_v45 = vpop.xlane.xlu0 %3211 }
 0xb83   : > { %v3219_v17 = vmul.f32 0.0078125, %v3212_v45  ;;  %v4507_v45 = vld [vmem:[%s832_s29] ss:$0 sm:$0xff] }
 0xb84   : > { %v3214_v21 = vpop.xlane.xlu1 %3213 }
 0xb85   : > { %v7478_v31 = vsub.f32 %v7457_v24, %v3219_v17  ;;  %v3220_v4 = vmul.f32 0.0078125, %v3214_v21 }
 0xb86   : > { %v3216_v22 = vpop.xlane.xlu0 %3215 }
 0xb87   : > { %v7481_v15 = vsub.f32 %v7459_v23, %v3220_v4  ;;  %v3221_v1 = vmul.f32 0.0078125, %v3216_v22  ;;  %v3227_v44 = vmul.f32 %v7478_v31, %v7478_v31 }
 0xb88   : > { %v3218_v2 = vpop.xlane.xlu1 %3217 }
 0xb89   : > { %v7486_v34 = vsub.f32 %v7462_v53, %v3221_v1  ;;  %v3222_v35 = vmul.f32 0.0078125, %v3218_v2  ;;  %3231 = vadd.xlane.f32.xlu0 %v3227_v44  ;;  %v3228_v18 = vmul.f32 %v7481_v15, %v7481_v15 }
 0xb8b   : > { %v7491_v63 = vsub.f32 %v7465_v36, %v3222_v35  ;;  %3233 = vadd.xlane.f32.xlu1 %v3228_v18  ;;  %v3229_v50 = vmul.f32 %v7486_v34, %v7486_v34 }
 0xb8d   : > { %3235 = vadd.xlane.f32.xlu0 %v3229_v50  ;;  %v3230_v0 = vmul.f32 %v7491_v63, %v7491_v63 }
 0xb8f   : > { %3237 = vadd.xlane.f32.xlu1 %v3230_v0  ;;  %v5230_v0 = vld [vmem:[%s6476_s11] sm:$0xff]  }
 0xc16   : > { %v3232_v12 = vpop.xlane.xlu0 %3231 }
 0xc17   : > { %v3239_v52 = vmul.f32 0.0078125, %v3232_v12  ;;  %v5256_v12 = vld [vmem:[%s6476_s11 + $0x78] sm:$0xff]  }
 0xc18   : > { %v3234_v48 = vpop.xlane.xlu1 %3233 }
 0xc19   : > { %v3243_v28 = vadd.f32 1e-05, %v3239_v52  ;;  %v3240_v13 = vmul.f32 0.0078125, %v3234_v48  ;;  %v5257_v52 = vld [vmem:[%s6476_s11 + $0xf8] sm:$0xff]  }
 0xc1a   : > { %v3236_v11 = vpop.xlane.xlu0 %3235  ;;  %v5258_v48 = vld [vmem:[%s6476_s11 + $0x38] sm:$0xff]  }
 0xc1b   : > { %5524 = vrsqrt.f32 %v3243_v28  ;;  %v3244_v62 = vadd.f32 1e-05, %v3240_v13  ;;  %v3241_v27 = vmul.f32 0.0078125, %v3236_v11  ;;  %v5259_v28 = vld [vmem:[%s6476_s11 + $0xb8] sm:$0xff]   ;;  %v3311_v13 = vld [vmem:[%s6470_s7] sm:$0xf] }
 0xc1c   : > { %v3238_v56 = vpop.xlane.xlu1 %3237  ;;  %v7896_v11 = vld [vmem:[#allocation33_spill] sm:$0xff] }
 0xc1d   : > { %5526 = vrsqrt.f32 %v3244_v62  ;;  %v3245_v26 = vadd.f32 1e-05, %v3241_v27  ;;  %v3242_v33 = vmul.f32 0.0078125, %v3238_v56  ;;  %v3327_v62 = vsub.s32 3, %v7896_v11 }
 0xc1e   : > { %v7897_v27 = vsub.s32 0, %v7896_v11 }
 0xc1f   : > { %5528 = vrsqrt.f32 %v3245_v26  ;;  %v3246_v51 = vadd.f32 1e-05, %v3242_v33  ;;  %v7898_v26 = vsub.s32 2, %v7896_v11 }
 0xc20   : > { %v7573_v56 = vrot.slane %v3311_v13, %v7897_v27 }
 0xc21   : > { %5530 = vrsqrt.f32 %v3246_v51  ;;  %v7577_v33 = vrot.slane %v3311_v13, %v7898_v26  ;;  %v7899_v51 = vsub.s32 1, %v7896_v11 }
 0xc25   : > { %v5525_v14 = vpop.eup %5524 }
 0xc26   : > { %v3251_v49 = vmul.f32 %v5525_v14, %v7478_v31  ;;  %v7581_v14 = vrot.slane %v3311_v13, %v7899_v51 }
 0xc27   : > { %v5527_v59 = vpop.eup %5526 }
 0xc28   : > { %v3252_v54 = vmul.f32 %v5527_v59, %v7481_v15  ;;  %v3262_v10 = vmul.f32 %v4506_v39, %v3251_v49 }
 0xc29   : > { %v5529_v3 = vpop.eup %5528 }
 0xc2a   : > { %v3263_v17 = vmul.f32 %v4506_v39, %v3252_v54  ;;  %v3273_v4 = vadd.f32 %v4507_v45, %v3262_v10  ;;  %v3253_v1 = vmul.f32 %v5529_v3, %v7486_v34  ;;  %v5228_v34 = vld [vmem:[%s6476_s11 + $0x40] sm:$0xff]  }
 0xc2b   : > { %v5531_v21 = vpop.eup %5530  ;;  %4727 = vmatprep.subr.bf16.mxu1 %v5228_v34 }
 0xc2c   : > { %v3274_v22 = vadd.f32 %v4507_v45, %v3263_v17  ;;  %v3254_v31 = vmul.f32 %v5531_v21, %v7491_v63  ;;  %v3264_v2 = vmul.f32 %v4506_v39, %v3253_v1  ;;  %v5229_v63 = vld [vmem:[%s6476_s11 + $0xc0] sm:$0xff]  }
 0xc2d   : > { %4755 = vmatprep.subr.bf16.mxu0 %v5229_v63 }
 0xc2e   : > { %v3277_v15 = vpack.c.bf16 %v3274_v22, %v3273_v4  ;;  %v3265_v44 = vmul.f32 %v4506_v39, %v3254_v31  ;;  %v3275_v18 = vadd.f32 %v4507_v45, %v3264_v2  ;;  %v7583_v39 = vrot.slane %v3311_v13, %v3327_v62 }
 0xc30   : > { %3526 = vmatmul.mubr.bf16.vlgmr.msra.gmra.mrb[76].mxu1 %v3277_v15  ;;  %3579 = vmatmul.mubr.bf16.vlgmr.msra.gmra.mrb[76].mxu0 %v3277_v15  ;;  %v3276_v35 = vadd.f32 %v4507_v45, %v3265_v44 }
 0xc31   : > { %3535 = vmatprep.mubr.bf16.mxu1 %v7892_v16  ;;  %3588 = vmatprep.mubr.bf16.mxu0 %v7892_v16  ;;  %v5232_v16 = vld [vmem:[%s6476_s11 + $0x48] sm:$0xff]  }
 0xc32   : > { %v3278_v50 = vpack.c.bf16 %v3276_v35, %v3275_v18  ;;  %4728 = vmatpush3.bf16.msra.mxu1 %v5230_v0  ;;  %4756 = vmatpush3.bf16.msra.mxu0 %v5231_v8 }
 0xc33   : > { %4729 = vmatprep.subr.bf16.mxu1 %v5232_v16  ;;  %4757 = vmatprep.subr.bf16.mxu0 %v5233_v20 }
 0xc36   : > { %4730 = vmatpush3.bf16.msra.mxu1 %v5234_v60  ;;  %4758 = vmatpush3.bf16.msra.mxu0 %v5235_v58 }
 0xc37   : > { %4731 = vmatprep.subr.bf16.mxu1 %v5236_v19  ;;  %4759 = vmatprep.subr.bf16.mxu0 %v5237_v43 }
 0xc38   : > { %3536 = vmatmul.mubr.bf16.gmra.mrb[80].mxu1 %v3278_v50  ;;  %3589 = vmatmul.mubr.bf16.gmra.mrb[80].mxu0 %v3278_v50 }
 0xc3a   : > { %4732 = vmatpush3.bf16.msra.mxu1 %v5238_v47  ;;  %4760 = vmatpush3.bf16.msra.mxu0 %v5239_v41 }
 0xc3b   : > { %4733 = vmatprep.subr.bf16.mxu1 %v5240_v46  ;;  %4761 = vmatprep.subr.bf16.mxu0 %v5241_v42 }
 0xc3e   : > { %4734 = vmatpush3.bf16.msra.mxu1 %v5242_v9  ;;  %4762 = vmatpush3.bf16.msra.mxu0 %v5243_v55 }
 0xc3f   : > { %4735 = vmatprep.subr.bf16.mxu1 %v5244_v57  ;;  %4763 = vmatprep.subr.bf16.mxu0 %v5245_v30 }
 0xc42   : > { %4736 = vmatpush3.bf16.msra.mxu1 %v5246_v32  ;;  %4764 = vmatpush3.bf16.msra.mxu0 %v5247_v61 }
 0xc43   : > { %4737 = vmatprep.subr.bf16.mxu1 %v5248_v37  ;;  %4765 = vmatprep.subr.bf16.mxu0 %v5249_v5 }
 0xc46   : > { %4738 = vmatpush3.bf16.msra.mxu1 %v5250_v7  ;;  %4766 = vmatpush3.bf16.msra.mxu0 %v5251_v38 }
 0xc47   : > { %4739 = vmatprep.subr.bf16.mxu1 %v5252_v29  ;;  %4767 = vmatprep.subr.bf16.mxu0 %v5253_v25 }
 0xc4a   : > { %4740 = vmatpush3.bf16.msra.mxu1 %v5254_v6  ;;  %4768 = vmatpush3.bf16.msra.mxu0 %v5255_v40 }
 0xc4b   : > { %4741 = vmatprep.subr.bf16.mxu1 %v5256_v12  ;;  %4769 = vmatprep.subr.bf16.mxu0 %v5257_v52 }
 0xc4e   : > { %4742 = vmatpush3.bf16.msra.mxu1 %v5258_v48  ;;  %4770 = vmatpush3.bf16.msra.mxu0 %v5259_v28 }
 0xd03   : > { %v3527_v49 = vpop.f32.mrb[76].mxu1  ;;  %v3580_v59 = vpop.f32.mrb[76].mxu0 }
 0xd04   : > { %v7586_v54 = vadd.f32 %v3527_v49, %v7573_v56  ;;  %v7589_v10 = vadd.f32 %v3580_v59, %v7577_v33  ;;  %v3529_v3 = vpop.f32.mrb[77].mxu1  ;;  %v3582_v45 = vpop.f32.mrb[77].mxu0 }
 0xd05   : > { %v7592_v17 = vadd.f32 %v3529_v3, %v7581_v14  ;;  %v7595_v21 = vadd.f32 %v3582_v45, %v7583_v39  ;;  %v3531_v4 = vpop.f32.mrb[78].mxu1  ;;  %v3584_v22 = vpop.f32.mrb[78].mxu0 }
 0xd06   : > { %v3599_v1 = vmul.f32 %v7586_v54, %v7586_v54  ;;  %v3601_v31 = vmul.f32 %v7589_v10, %v7589_v10  ;;  %v7602_v15 = vadd.f32 %v3531_v4, %v7573_v56  ;;  %v7605_v44 = vadd.f32 %v3584_v22, %v7577_v33  ;;  %v3533_v2 = vpop.f32.mrb[79].mxu1  ;;  %v3586_v35 = vpop.f32.mrb[79].mxu0 }
 0xd07   : > { %v3600_v18 = vmul.f32 %v7592_v17, %v7592_v17  ;;  %v3602_v50 = vmul.f32 %v7595_v21, %v7595_v21  ;;  %v7612_v34 = vadd.f32 %v3533_v2, %v7581_v14  ;;  %v7615_v63 = vadd.f32 %v3586_v35, %v7583_v39 }
 0xd08   : > { %v3615_v0 = vmul.f32 %v3599_v1, %v7586_v54  ;;  %v3617_v8 = vmul.f32 %v3601_v31, %v7589_v10  ;;  %v3603_v16 = vmul.f32 %v7602_v15, %v7602_v15  ;;  %v3605_v20 = vmul.f32 %v7605_v44, %v7605_v44 }
 0xd09   : > { %v3616_v60 = vmul.f32 %v3600_v18, %v7592_v17  ;;  %v3618_v58 = vmul.f32 %v3602_v50, %v7595_v21  ;;  %v3604_v19 = vmul.f32 %v7612_v34, %v7612_v34  ;;  %v3606_v43 = vmul.f32 %v7615_v63, %v7615_v63 }
 0xd0a   : > { %v3631_v47 = vmul.f32 0.044715, %v3615_v0  ;;  %v3633_v41 = vmul.f32 0.044715, %v3617_v8  ;;  %v3619_v46 = vmul.f32 %v3603_v16, %v7602_v15  ;;  %v3621_v42 = vmul.f32 %v3605_v20, %v7605_v44 }
 0xd0b   : > { %v3632_v9 = vmul.f32 0.044715, %v3616_v60  ;;  %v3634_v55 = vmul.f32 0.044715, %v3618_v58  ;;  %v3620_v57 = vmul.f32 %v3604_v19, %v7612_v34  ;;  %v3622_v30 = vmul.f32 %v3606_v43, %v7615_v63  ;;  %v3537_v32 = vpop.f32.mrb[80].mxu1  ;;  %v3590_v61 = vpop.f32.mrb[80].mxu0 }
 0xd0c   : > { %v3647_v37 = vadd.f32 %v3631_v47, %v7586_v54  ;;  %v3649_v5 = vadd.f32 %v3633_v41, %v7589_v10  ;;  %v3635_v7 = vmul.f32 0.044715, %v3619_v46  ;;  %v3637_v38 = vmul.f32 0.044715, %v3621_v42  ;;  %v3539_v29 = vpop.f32.mrb[81].mxu1  ;;  %v3592_v25 = vpop.f32.mrb[81].mxu0 }
 0xd0d   : > { %v3648_v6 = vadd.f32 %v3632_v9, %v7592_v17  ;;  %v3650_v40 = vadd.f32 %v3634_v55, %v7595_v21  ;;  %v3636_v12 = vmul.f32 0.044715, %v3620_v57  ;;  %v3638_v52 = vmul.f32 0.044715, %v3622_v30  ;;  %v3541_v48 = vpop.f32.mrb[82].mxu1  ;;  %v3594_v28 = vpop.f32.mrb[82].mxu0 }
 0xd0e   : > { %v3663_v13 = vmul.f32 0.7978846, %v3647_v37  ;;  %v3665_v11 = vmul.f32 0.7978846, %v3649_v5  ;;  %v3651_v62 = vadd.f32 %v3635_v7, %v7602_v15  ;;  %v3653_v27 = vadd.f32 %v3637_v38, %v7605_v44  ;;  %v3543_v26 = vpop.f32.mrb[83].mxu1  ;;  %v3596_v51 = vpop.f32.mrb[83].mxu0 }
 0xd0f   : > { %v3664_v49 = vmul.f32 0.7978846, %v3648_v6  ;;  %v3666_v59 = vmul.f32 0.7978846, %v3650_v40  ;;  %v3652_v3 = vadd.f32 %v3636_v12, %v7612_v34  ;;  %v3654_v45 = vadd.f32 %v3638_v52, %v7615_v63 }
 0xd10   : > { %5532 = vtanh.f32 %v3663_v13  ;;  %v3667_v4 = vmul.f32 0.7978846, %v3651_v62  ;;  %v3669_v22 = vmul.f32 0.7978846, %v3653_v27  ;;  %v7642_v1 = vadd.f32 %v3537_v32, %v7573_v56 }
 0xd11   : > { %5534 = vtanh.f32 %v3665_v11  ;;  %v3668_v31 = vmul.f32 0.7978846, %v3652_v3  ;;  %v3670_v2 = vmul.f32 0.7978846, %v3654_v45  ;;  %v7645_v35 = vadd.f32 %v3590_v61, %v7577_v33 }
 0xd12   : > { %5536 = vtanh.f32 %v3664_v49  ;;  %v3607_v18 = vmul.f32 %v7642_v1, %v7642_v1  ;;  %v7650_v50 = vadd.f32 %v3539_v29, %v7581_v14  ;;  %v7653_v0 = vadd.f32 %v3592_v25, %v7583_v39 }
 0xd13   : > { %5538 = vtanh.f32 %v3666_v59  ;;  %v3609_v8 = vmul.f32 %v7645_v35, %v7645_v35  ;;  %v7658_v16 = vadd.f32 %v3541_v48, %v7573_v56  ;;  %v7661_v20 = vadd.f32 %v3594_v28, %v7577_v33 }
 0xd14   : > { %5540 = vtanh.f32 %v3667_v4  ;;  %v3623_v60 = vmul.f32 %v3607_v18, %v7642_v1  ;;  %v3608_v58 = vmul.f32 %v7650_v50, %v7650_v50  ;;  %v3610_v19 = vmul.f32 %v7653_v0, %v7653_v0 }
 0xd15   : > { %5542 = vtanh.f32 %v3669_v22  ;;  %v3625_v43 = vmul.f32 %v3609_v8, %v7645_v35  ;;  %v3611_v47 = vmul.f32 %v7658_v16, %v7658_v16  ;;  %v3613_v56 = vmul.f32 %v7661_v20, %v7661_v20 }
 0xd16   : > { %5544 = vtanh.f32 %v3668_v31  ;;  %v3639_v33 = vmul.f32 0.044715, %v3623_v60  ;;  %v3624_v41 = vmul.f32 %v3608_v58, %v7650_v50  ;;  %v3626_v46 = vmul.f32 %v3610_v19, %v7653_v0 }
 0xd17   : > { %5546 = vtanh.f32 %v3670_v2  ;;  %v3641_v42 = vmul.f32 0.044715, %v3625_v43  ;;  %v3627_v9 = vmul.f32 %v3611_v47, %v7658_v16  ;;  %v3629_v55 = vmul.f32 %v3613_v56, %v7661_v20 }
 0xd18   : > { %v3655_v57 = vadd.f32 %v3639_v33, %v7642_v1  ;;  %v3640_v30 = vmul.f32 0.044715, %v3624_v41  ;;  %v3642_v32 = vmul.f32 0.044715, %v3626_v46  ;;  %v7679_v61 = vadd.f32 %v3543_v26, %v7581_v14 }
 0xd19   : > { %v3657_v37 = vadd.f32 %v3641_v42, %v7645_v35  ;;  %v3643_v5 = vmul.f32 0.044715, %v3627_v9  ;;  %v3645_v7 = vmul.f32 0.044715, %v3629_v55  ;;  %v7683_v38 = vadd.f32 %v3596_v51, %v7583_v39 }
 0xd1a   : > { %v5533_v29 = vpop.eup %5532  ;;  %v3671_v25 = vmul.f32 0.7978846, %v3655_v57  ;;  %v3656_v6 = vadd.f32 %v3640_v30, %v7650_v50  ;;  %v3658_v40 = vadd.f32 %v3642_v32, %v7653_v0  ;;  %v3612_v12 = vmul.f32 %v7679_v61, %v7679_v61 }
 0xd1b   : > { %v5535_v52 = vpop.eup %5534  ;;  %v3695_v48 = vadd.f32 1.0, %v5533_v29  ;;  %v3673_v14 = vmul.f32 0.7978846, %v3657_v37  ;;  %v3659_v28 = vadd.f32 %v3643_v5, %v7658_v16  ;;  %v3661_v13 = vadd.f32 %v3645_v7, %v7661_v20 }
 0xd1c   : > { %v5537_v11 = vpop.eup %5536  ;;  %v3697_v62 = vadd.f32 1.0, %v5535_v52  ;;  %5548 = vtanh.f32 %v3671_v25  ;;  %v3672_v39 = vmul.f32 0.7978846, %v3656_v6  ;;  %v3674_v27 = vmul.f32 0.7978846, %v3658_v40 }
 0xd1d   : > { %v5539_v26 = vpop.eup %5538  ;;  %v3711_v51 = vmul.f32 0.5, %v3695_v48  ;;  %5550 = vtanh.f32 %v3673_v14  ;;  %v3675_v49 = vmul.f32 0.7978846, %v3659_v28  ;;  %v3677_v59 = vmul.f32 0.7978846, %v3661_v13 }
 0xd1e   : > { %v5541_v3 = vpop.eup %5540  ;;  %v3713_v45 = vmul.f32 0.5, %v3697_v62  ;;  %5552 = vtanh.f32 %v3672_v39  ;;  %v3628_v4 = vmul.f32 %v3612_v12, %v7679_v61  ;;  %v3614_v22 = vmul.f32 %v7683_v38, %v7683_v38 }
 0xd1f   : > { %v5543_v31 = vpop.eup %5542  ;;  %v3727_v2 = vmul.f32 %v3711_v51, %v7586_v54  ;;  %v3699_v18 = vadd.f32 1.0, %v5541_v3  ;;  %5554 = vtanh.f32 %v3674_v27  ;;  %v3696_v8 = vadd.f32 1.0, %v5537_v11 }
 0xd20   : > { %v5545_v60 = vpop.eup %5544  ;;  %v3729_v58 = vmul.f32 %v3713_v45, %v7589_v10  ;;  %v3701_v19 = vadd.f32 1.0, %v5543_v31  ;;  %5556 = vtanh.f32 %v3675_v49  ;;  %v3644_v43 = vmul.f32 0.044715, %v3628_v4 }
 0xd21   : > { %v5547_v47 = vpop.eup %5546  ;;  %v3715_v56 = vmul.f32 0.5, %v3699_v18  ;;  %5558 = vtanh.f32 %v3677_v59  ;;  %v3630_v33 = vmul.f32 %v3614_v22, %v7683_v38  ;;  %v3700_v41 = vadd.f32 1.0, %v5545_v60 }
 0xd22   : > { %v3717_v46 = vmul.f32 0.5, %v3701_v19  ;;  %v3660_v42 = vadd.f32 %v3644_v43, %v7679_v61  ;;  %v3712_v9 = vmul.f32 0.5, %v3696_v8  ;;  %v3698_v54 = vadd.f32 1.0, %v5539_v26 }
 0xd23   : > { %v3731_v55 = vmul.f32 %v3715_v56, %v7602_v15  ;;  %v3646_v57 = vmul.f32 0.044715, %v3630_v33  ;;  %v3716_v30 = vmul.f32 0.5, %v3700_v41  ;;  %v3702_v32 = vadd.f32 1.0, %v5547_v47 }
 0xd24   : > { %v3733_v10 = vmul.f32 %v3717_v46, %v7605_v44  ;;  %v3676_v37 = vmul.f32 0.7978846, %v3660_v42  ;;  %v3728_v5 = vmul.f32 %v3712_v9, %v7592_v17  ;;  %v3714_v7 = vmul.f32 0.5, %v3698_v54  ;;  %v4540_v54 = vld [vmem:[%s839_s21] ss:$0 sm:$0xff] }
 0xd25   : > { %v3743_v29 = vpack.c.bf16 %v3731_v55, %v3727_v2  ;;  %v3662_v25 = vadd.f32 %v3646_v57, %v7683_v38  ;;  %v3732_v6 = vmul.f32 %v3716_v30, %v7612_v34  ;;  %v3718_v40 = vmul.f32 0.5, %v3702_v32 }
 0xd26   : > { %v5549_v12 = vpop.eup %5548  ;;  %v3745_v52 = vpack.c.bf16 %v3733_v10, %v3729_v58  ;;  %5560 = vtanh.f32 %v3676_v37  ;;  %v3730_v15 = vmul.f32 %v3714_v7, %v7595_v21 }
 0xd27   : > { %v5551_v48 = vpop.eup %5550  ;;  %v3678_v14 = vmul.f32 0.7978846, %v3662_v25  ;;  %v3744_v28 = vpack.c.bf16 %v3732_v6, %v3728_v5  ;;  %v3734_v44 = vmul.f32 %v3718_v40, %v7615_v63  ;;  %v3703_v13 = vadd.f32 1.0, %v5549_v12 }
 0xd28   : > { %v5553_v11 = vpop.eup %5552  ;;  %v3705_v17 = vadd.f32 1.0, %v5551_v48 }
 0xd29   : > { %v5555_v62 = vpop.eup %5554  ;;  %5562 = vtanh.f32 %v3678_v14  ;;  %4046 = vmatprep.mubr.bf16.mxu1 %v3744_v28  ;;  %v3746_v39 = vpack.c.bf16 %v3734_v44, %v3730_v15  ;;  %v3719_v51 = vmul.f32 0.5, %v3703_v13  ;;  %v3704_v59 = vadd.f32 1.0, %v5553_v11 }
 0xd2a   : > { %v5557_v27 = vpop.eup %5556  ;;  %4047 = vmatmul.mubr.bf16.vlgmr.msra.gmra.mrb[84].mxu1 %v3743_v29  ;;  %v3721_v49 = vmul.f32 0.5, %v3705_v17  ;;  %v3706_v31 = vadd.f32 1.0, %v5555_v62 }
 0xd2b   : > { %v5559_v34 = vpop.eup %5558  ;;  %4095 = vmatprep.mubr.bf16.mxu0 %v3746_v39  ;;  %v3707_v26 = vadd.f32 1.0, %v5557_v27  ;;  %v3735_v63 = vmul.f32 %v3719_v51, %v7642_v1  ;;  %v3720_v60 = vmul.f32 0.5, %v3704_v59 }
 0xd2c   : > { %4096 = vmatmul.mubr.bf16.vlgmr.msra.gmra.mrb[84].mxu0 %v3745_v52  ;;  %v3709_v21 = vadd.f32 1.0, %v5559_v34  ;;  %v3737_v2 = vmul.f32 %v3721_v49, %v7645_v35  ;;  %v3722_v33 = vmul.f32 0.5, %v3706_v31 }
 0xd2d   : > { %v3723_v3 = vmul.f32 0.5, %v3707_v26  ;;  %v3736_v41 = vmul.f32 %v3720_v60, %v7650_v50 }
 0xd2e   : > { %v3725_v45 = vmul.f32 0.5, %v3709_v21  ;;  %v3738_v42 = vmul.f32 %v3722_v33, %v7653_v0 }
 0xd2f   : > { %v3739_v4 = vmul.f32 %v3723_v3, %v7658_v16 }
 0xd30   : > { %v5561_v22 = vpop.eup %5560  ;;  %v3741_v18 = vmul.f32 %v3725_v45, %v7661_v20 }
 0xd31   : > { %v3708_v8 = vadd.f32 1.0, %v5561_v22  ;;  %v3747_v58 = vpack.c.bf16 %v3739_v4, %v3735_v63 }
 0xd32   : > { %v3749_v19 = vpack.c.bf16 %v3741_v18, %v3737_v2 }
 0xd33   : > { %v5563_v43 = vpop.eup %5562  ;;  %v3724_v47 = vmul.f32 0.5, %v3708_v8 }
 0xd34   : > { %v3710_v56 = vadd.f32 1.0, %v5563_v43 }
 0xd35   : > { %v3740_v1 = vmul.f32 %v3724_v47, %v7679_v61 }
 0xd36   : > { %v3726_v16 = vmul.f32 0.5, %v3710_v56 }
 0xd37   : > { %v3748_v46 = vpack.c.bf16 %v3740_v1, %v3736_v41 }
 0xd38   : > { %v3742_v35 = vmul.f32 %v3726_v16, %v7683_v38 }
 0xd39   : > { %4054 = vmatprep.mubr.bf16.mxu1 %v3748_v46 }
 0xd3a   : > { %v3750_v20 = vpack.c.bf16 %v3742_v35, %v3738_v42  ;;  %4055 = vmatmul.mubr.bf16.gmra.mrb[88].mxu1 %v3747_v58 }
 0xd3c   : > { %4103 = vmatprep.mubr.bf16.mxu0 %v3750_v20 }
 0xd3d   : > { %4104 = vmatmul.mubr.bf16.gmra.mrb[88].mxu0 %v3749_v19 }
 0xdfd   : > { %v4743_v9 = vpop.f32.mrb[84].mxu1 }
 0xdfe   : > { %v4744_v50 = vpop.f32.mrb[85].mxu1 }
 0xdff   : > { %v4771_v55 = vpop.f32.mrb[84].mxu0  ;;  %v4745_v61 = vadd.f32 %v4744_v50, %v4743_v9  ;;  %v4746_v57 = vpop.f32.mrb[86].mxu1 }
 0xe00   : > { %v4772_v30 = vpop.f32.mrb[85].mxu0  ;;  %v4747_v32 = vpop.f32.mrb[87].mxu1 }
 0xe01   : > { %v4049_v0 = vadd.f32 %v4745_v61, %v4540_v54  ;;  %v4773_v10 = vadd.f32 %v4772_v30, %v4771_v55  ;;  %v4774_v38 = vpop.f32.mrb[86].mxu0  ;;  %v4748_v37 = vadd.f32 %v4747_v32, %v4746_v57 }
 0xe02   : > { %v4775_v5 = vpop.f32.mrb[87].mxu0 }
 0xe03   : > { %v4098_v7 = vadd.f32 %v4773_v10, %v4049_v0  ;;  %v4052_v29 = vadd.f32 %v4748_v37, %v4540_v54  ;;  %v4776_v25 = vadd.f32 %v4775_v5, %v4774_v38 }
 0xe05   : > { %v4112_v6 = vadd.f32 %v4098_v7, %v7457_v24  ;;  %v4101_v40 = vadd.f32 %v4776_v25, %v4052_v29 }
 0xe07   : > { %4116 = vst [vmem:[#allocation2] sm:$0xff] %v4112_v6  ;;  %v4113_v12 = vadd.f32 %v4101_v40, %v7459_v23  ;;  %4124 = vst [vmem:[#allocation18] sm:$0xff] (!%p4573_p5), %v4112_v6 }
 0xe09   : > { %4117 = vst [vmem:[#allocation2 + $0x8] sm:$0xff] %v4113_v12  ;;  %4125 = vst [vmem:[#allocation18 + $0x8] sm:$0xff] (!%p4573_p5), %v4113_v12 }
 0xe0d   : > { %v4749_v52 = vpop.f32.mrb[88].mxu1 }
 0xe0e   : > { %v4750_v15 = vpop.f32.mrb[89].mxu1 }
 0xe0f   : > { %v4751_v48 = vadd.f32 %v4750_v15, %v4749_v52  ;;  %v4752_v14 = vpop.f32.mrb[90].mxu1 }
 0xe10   : > { %v4777_v28 = vpop.f32.mrb[88].mxu0  ;;  %v4753_v44 = vpop.f32.mrb[91].mxu1 }
 0xe11   : > { %v4057_v13 = vadd.f32 %v4751_v48, %v4540_v54  ;;  %v4778_v11 = vpop.f32.mrb[89].mxu0  ;;  %v4754_v17 = vadd.f32 %v4753_v44, %v4752_v14 }
 0xe12   : > { %v4779_v62 = vadd.f32 %v4778_v11, %v4777_v28  ;;  %v4780_v39 = vpop.f32.mrb[90].mxu0 }
 0xe13   : > { %v4060_v27 = vadd.f32 %v4754_v17, %v4540_v54  ;;  %v4781_v34 = vpop.f32.mrb[91].mxu0 }
 0xe14   : > { %v4106_v26 = vadd.f32 %v4779_v62, %v4057_v13  ;;  %v4782_v24 = vadd.f32 %v4781_v34, %v4780_v39  ;;  %4123 = sbr.rel (%p4573_p5) target bundleno = 3611 (0xe1b), region = 124 }
 0xe16   : > { %v4114_v51 = vadd.f32 %v4106_v26, %v7462_v53  ;;  %v4109_v21 = vadd.f32 %v4782_v24, %v4060_v27 }
 0xe18   : > { %4118 = vst [vmem:[#allocation2 + $0x10] sm:$0xff] %v4114_v51  ;;  %v4115_v23 = vadd.f32 %v4109_v21, %v7465_v36  ;;  %4126 = vst [vmem:[#allocation18 + $0x10] sm:$0xff] (!%p4573_p5), %v4114_v51 }
 0xe1a   : > { %4119 = vst [vmem:[#allocation2 + $0x18] sm:$0xff] %v4115_v23  ;;  %4127 = vst [vmem:[#allocation18 + $0x18] sm:$0xff] (!%p4573_p5), %v4115_v23 }
 0xe1b PF: > { %s7902_s28 = sld [smem:[#allocation29_spill]]  ;;  %s5964_s16 = smov [#allocation18]  }
 0xe1c   : > { %s4137_s18 = sshll.u32 %s5964_s16, 4  ;;  %s4138_s18 = int_to_ptr.vmem [resolvable:$true] %s4137_s18 }
 0xe1d   : > { %s5848_s12 = scalar_lea.vmem %s4138_s18, 512  ;;  %p5855_p13 = scmp.lt.s32.totalorder %s4138_s18, %s4138_s18 }
 0xe1e   : > { %p5849_p4 = scmp.ne.s32.totalorder %s4138_s18, %s5848_s12  ;;  %p5856_p2 = scmp.lt.s32.totalorder %s5848_s12, %s5848_s12 }
 0xe20   : > { %p5857_p8 = por %p5856_p2, %p5855_p13 }
 0xe21   : > { %p5055_p3 = scmp.eq.s32.totalorder %s7902_s28, 1 }
 0xe23   : > { %p5850_p10 = pnand %p5849_p4, %p5055_p3 }
 0xe25   : > { %p5851_p11 = pneg %p5850_p10 }
 0xe27   : > { %p5858_p12 = pnand %p5857_p8, %p5851_p11 }
 0xe29   : > { %5861 = shalt.err (!%p5858_p12)
}
 0xe2a   : > { %s7903_s15 = sld [smem:[#allocation50_spill]] }
 0xe30   : > { %s5862_s23 = scalar_lea.hbm %s7903_s15, 512 }
 0xe31   : > { %p5863_p6 = scmp.ne.s32.totalorder %s7903_s15, %s5862_s23  ;;  %p5868_p7 = scmp.lt.u32.totalorder %s5862_s23, %s7903_s15 }
 0xe33   : > { %p5864_p0 = pnand %p5863_p6, %p5055_p3 }
 0xe35   : > { %p5865_p1 = pneg %p5864_p0 }
 0xe37   : > { %p5870_p9 = pnand %p5868_p7, %p5865_p1 }
 0xe39   : > { %5873 = shalt.err (!%p5870_p9)
}
 0xe3a   : > { %s5965_s21 = smov 128   ;;  %s5966_s11 = smov 8  }
 0xe3b   : > { %5016 = dma.vmem_to_hbm [thread:$0]  (%p5055_p3), %s4138_s18, 512, %s7903_s15, [#allocation5], %s5965_s21, %s5965_s21, %s5966_s11  }
 0xe3c   : > { %5919 = dma.done.wait (%p5055_p3), [#allocation5], 512  }
 0xe3d   : > { %5921 = vsyncadd (%p5055_p3), [#allocation5], 4294966784 }
 0xe3e PF: > { %s7904_s4 = sld [smem:[#allocation28_spill]]  ;;  %s7905_s18 = sld [smem:[#allocation25_spill]] }
 0xe3f   : > { %s7906_s19 = sld [smem:[#allocation26_spill]]  ;;  %s7907_s20 = sld [smem:[#allocation32_spill]] }
 0xe40   : > { %s7908_s8 = sld [smem:[#allocation31_spill]]  ;;  %s7909_s21 = smov %s5940_s22 }
 0xe44   : > { %s37_s23 = sadd.s32 1, %s7904_s4  }
 0xe45   : > { %p34_p5 = scmp.ge.s32.totalorder %s37_s23, 4  }
 0xe46   : > { %s7910_s22 = smov %s7908_s8 }
 0xe47   :  { %36 = sbr.rel (!%p34_p5) target bundleno = 27 (0x1b), region = 217 }
 0xe4e   :  { %4153 = vsyncpa [#allocation4], 1 }
 0xe4f   :  { %4155 = vsyncpa [#allocation4 + $0x1], 1 }
 0xe50   :  { %4156 = vsyncpa [#allocation7], 1 }
 0xe51   :  { %4157 = vsyncpa [#allocation10], 1 }
 0xe52   :  { %4159 = vsyncpa [#allocation10 + $0x1], 1 }
 0xe53   :  { %4160 = vsyncpa [#allocation13], 1 }
 0xe54   :  { %4162 = vsyncpa [#allocation13 + $0x1], 1 }
 0xe55   :  { %4163 = vsyncpa [#allocation16], 1 }
 0xe56   :  { %4165 = vsyncpa [#allocation16 + $0x1], 1 }
 0xe57   :  { %4166 = vsyncpa [#allocation5], 1 }
 0xe58   :  { %4168 = vsyncpa [#allocation5 + $0x1], 1 }

</bundles_post_ra>
